<compile_context>
chip_gen: v7x
topology: tpu7x:2x2x1
jax: 0.10.0
libtpu: 0.0.40
codegen_flags: <defaults>
</compile_context>

<pallas_src>
import functools
import math

import jax
import jax.numpy as jnp
from jax.experimental import pallas as pl
from jax.experimental.pallas import tpu as pltpu

_VMEM_LIMIT = 48 * 1024 * 1024        # <= ~48 MiB keeps v7x (64 MiB/TC) safe;
                                      # v6e/v5e could raise it but don't need to.
_TILE_BYTE_BUDGET = 12 * 1024 * 1024  # per-call working-set target (dbl-buffered)


def _round_up(x, m):
    return ((x + m - 1) // m) * m


def _pick_tile_rows(rows, bytes_per_row, budget):
    """Rows per grid step: fill the VMEM byte budget, keep >=2 grid steps when
    there is enough work (so both v7x TensorCores get a share), and stay
    16-row aligned unless a single full-extent tile is used."""
    budget = max(budget, 2 << 20)
    t = min(4096, max(16, budget // max(1, bytes_per_row)))
    t = max(16, (t // 16) * 16)
    if rows > 32:                      # enough work to split across 2 TCs
        t = min(t, max(16, _round_up((rows + 1) // 2, 16)))
    if t >= rows:
        return rows                    # single tile == full dim (always legal)
    return t


# ----------------------------------------------------------------------------
# Pallas kernels
# ----------------------------------------------------------------------------
def conv_stats_kernel(cols_ref, w_ref, y_ref, stats_ref, *, rows_total, tile_r):
    """y_tile = cols_tile @ W (bf16 in, f32 accumulate), stored as bf16, plus
    per-tile BN partial sums computed from the f32 accumulator in-register.

    cols: (TR, K) bf16   w: (K, C) bf16
    y:    (TR, C) bf16   stats: (1, 2, C) f32  (row 0 = sum, row 1 = sum of sq)
    """
    y = jnp.dot(cols_ref[...], w_ref[...], preferred_element_type=jnp.float32)
    y_ref[...] = y.astype(y_ref.dtype)
    if rows_total % tile_r != 0:
        # Ragged last tile: OOB block reads are garbage, so they MUST be
        # masked out of the statistics (the ragged y writeback itself is
        # masked by Pallas).
        valid = jnp.minimum(tile_r, rows_total - pl.program_id(0) * tile_r)
        rows = jax.lax.broadcasted_iota(jnp.int32, (tile_r, 1), 0)
        y = jnp.where(rows < valid, y, 0.0)
    stats_ref[0, 0:1, :] = jnp.sum(y, axis=0, keepdims=True)
    stats_ref[0, 1:2, :] = jnp.sum(y * y, axis=0, keepdims=True)


def pool_project_kernel(y_ref, scale_ref, shift_ref, wl_ref, bl_ref, out_ref):
    """Last layer's BN affine + ReLU fused with AdaptiveAvgPool2d(1) + Linear.

    y: (TM, HW, C) bf16 (pre-BN conv output); scale/shift: (1,1,C) f32;
    wl: (C, E) bf16; bl: (1, E) f32; out: (TM, E) f32.
    """
    x = jnp.maximum(
        y_ref[...].astype(jnp.float32) * scale_ref[...] + shift_ref[...], 0.0)
    pooled = jnp.mean(x, axis=1)                                  # (TM, C) f32
    out_ref[...] = (jnp.dot(pooled.astype(jnp.bfloat16), wl_ref[...],
                            preferred_element_type=jnp.float32) + bl_ref[...])


# ----------------------------------------------------------------------------
# Pallas wrappers
# ----------------------------------------------------------------------------
def conv_stats(cols, w_bf):
    """cols: (R, K) bf16, w_bf: (K, C) bf16 ->
       y (R, C) bf16 (conv output, bias folded out), stats (nt, 2, C) f32."""
    R, K = cols.shape
    C = w_bf.shape[1]
    bytes_per_row = 4 * (K + C)                 # double-buffered bf16 cols + y
    budget = _TILE_BYTE_BUDGET - 4 * K * C      # minus double-buffered weights
    tile_r = _pick_tile_rows(R, bytes_per_row, budget)
    nt = pl.cdiv(R, tile_r)
    kernel = functools.partial(conv_stats_kernel, rows_total=R, tile_r=tile_r)
    return pl.pallas_call(
        kernel,
        out_shape=(jax.ShapeDtypeStruct((R, C), jnp.bfloat16),
                   jax.ShapeDtypeStruct((nt, 2, C), jnp.float32)),
        grid=(nt,),
        in_specs=[pl.BlockSpec((tile_r, K), lambda i: (i, 0)),
                  pl.BlockSpec((K, C), lambda i: (0, 0))],
        out_specs=(pl.BlockSpec((tile_r, C), lambda i: (i, 0)),
                   pl.BlockSpec((1, 2, C), lambda i: (i, 0, 0))),
        compiler_params=pltpu.CompilerParams(
            dimension_semantics=("parallel",),
            vmem_limit_bytes=_VMEM_LIMIT),
    )(cols, w_bf)


def bn_scale_shift(stats, gamma, beta, n_rows, pack):
    """(C,)-sized glue: finalize global batch stats -> BN affine scale/shift.
    Training-mode BN: biased variance, eps=1e-5; conv bias folded out (exact
    only for training-mode BN)."""
    s = jnp.sum(stats[:, 0, :], axis=0)
    ss = jnp.sum(stats[:, 1, :], axis=0)
    if pack > 1:                                 # fold lane-packed pixel copies
        C = s.shape[0] // pack
        s = s.reshape(pack, C).sum(axis=0)
        ss = ss.reshape(pack, C).sum(axis=0)
    inv_n = 1.0 / float(n_rows)
    mean = s * inv_n
    # TODO(synk): one-pass variance (E[y^2]-mean^2) can cancel if |mean|>>std
    # on real data; switch to a shifted two-pass update if BN becomes noisy.
    var = ss * inv_n - mean * mean
    inv = jax.lax.rsqrt(var + 1e-5)
    scale = gamma.reshape(-1) * inv
    shift = beta.reshape(-1) - mean * scale
    return scale, shift


def pool_project(feat, scale, shift, wl_bf, bl):
    """feat: (M, HW, C) bf16 pre-BN conv output -> (M, E) f32."""
    M, HW, C = feat.shape
    E = wl_bf.shape[1]
    bytes_per_row = 4 * HW * C + 8 * E
    tile_m = _pick_tile_rows(M, bytes_per_row, _TILE_BYTE_BUDGET - 4 * C * E)
    nt = pl.cdiv(M, tile_m)
    return pl.pallas_call(
        pool_project_kernel,
        out_shape=jax.ShapeDtypeStruct((M, E), jnp.float32),
        grid=(nt,),
        in_specs=[pl.BlockSpec((tile_m, HW, C), lambda i: (i, 0, 0)),
                  pl.BlockSpec((1, 1, C), lambda i: (0, 0, 0)),
                  pl.BlockSpec((1, 1, C), lambda i: (0, 0, 0)),
                  pl.BlockSpec((C, E), lambda i: (0, 0)),
                  pl.BlockSpec((1, E), lambda i: (0, 0))],
        out_specs=pl.BlockSpec((tile_m, E), lambda i: (i, 0)),
        compiler_params=pltpu.CompilerParams(
            dimension_semantics=("parallel",),
            vmem_limit_bytes=_VMEM_LIMIT),
    )(feat, scale.reshape(1, 1, C), shift.reshape(1, 1, C), wl_bf, bl)


# ----------------------------------------------------------------------------
# Glue: im2col for 3x3 / stride 2 / pad 1 (plain JAX data rearrangement)
# ----------------------------------------------------------------------------
def im2col_s2(x):
    """x: (M, H, W, Cin) -> cols (M*Ho*Wo, 9*Cin), Ho = ceil(H/2)."""
    M, H, W, Cin = x.shape
    Ho, Wo = (H + 1) // 2, (W + 1) // 2
    xp = jnp.pad(x, ((0, 0), (1, 1), (1, 1), (0, 0)))
    pieces = []
    for dy in range(3):
        for dx in range(3):
            pieces.append(xp[:, dy::2, dx::2, :][:, :Ho, :Wo, :])
    cols = jnp.concatenate(pieces, axis=-1)            # (M, Ho, Wo, 9*Cin)
    return cols.reshape(M * Ho * Wo, 9 * Cin), M, Ho, Wo


# ----------------------------------------------------------------------------
# Model: parameters + forward
# ----------------------------------------------------------------------------
CHANNELS = [1, 64, 128, 256, 512]


def init_params(key, embed_dim):
    convs = []
    for i in range(4):
        cin, cout = CHANNELS[i], CHANNELS[i + 1]
        key, k1, k2, k3, k4 = jax.random.split(key, 5)
        # conv weight stored as (3,3,Cin,Cout) flattened to (9*Cin, Cout),
        # kept in bf16 (MXU input dtype; halves weight HBM traffic per call).
        w = jax.random.normal(k1, (3, 3, cin, cout), jnp.float32)
        w = w * (1.0 / math.sqrt(9 * cin))
        cb = 0.1 * jax.random.normal(k2, (1, cout), jnp.float32)
        gamma = 1.0 + 0.1 * jax.random.normal(k3, (1, cout), jnp.float32)
        beta = 0.1 * jax.random.normal(k4, (1, cout), jnp.float32)
        convs.append((w.reshape(9 * cin, cout).astype(jnp.bfloat16),
                      cb, gamma, beta))
    key, k5, k6 = jax.random.split(key, 3)
    wl = (jax.random.normal(k5, (512, embed_dim), jnp.float32)
          / math.sqrt(512.0)).astype(jnp.bfloat16)
    bl = 0.1 * jax.random.normal(k6, (1, embed_dim), jnp.float32)
    return {"convs": convs, "wl": wl, "bl": bl}


@jax.jit
def patch_encoder_forward(patches, params):
    """patches: (B, num_patches, H, W) -> (B, num_patches, embed_dim)."""
    B, N, H, W = patches.shape
    x = patches.reshape(B * N, H, W, 1).astype(jnp.bfloat16)
    n_layers = len(params["convs"])
    out = None
    for li, (w_bf, _cb, gamma, beta) in enumerate(params["convs"]):
        # conv bias _cb cancels exactly under training-mode BN; folded out.
        C = w_bf.shape[1]
        # TODO(synk): im2col is still materialized by XLA; an in-kernel 3x3
        # halo gather (pl.ANY + manual DMA) would remove ~2.25x HBM traffic.
        cols, M, Ho, Wo = im2col_s2(x)                  # (R, 9*Cin) bf16
        R = cols.shape[0]
        # Lane-dense packing for narrow layers (C < 128): fold `pack`
        # consecutive output pixels per row via a block-diagonal weight, so
        # y stores are full-128-lane vst instead of masked vst.msk.
        pack = 1
        if C < 128 and 128 % C == 0 and R % (128 // C) == 0:
            pack = 128 // C
            cols = cols.reshape(R // pack, pack * cols.shape[1])
            w_bf = jnp.kron(jnp.eye(pack, dtype=w_bf.dtype), w_bf)
        y, stats = conv_stats(cols, w_bf)               # y: (R/pack, pack*C) bf16
        scale, shift = bn_scale_shift(stats, gamma, beta, R, pack)
        if li < n_layers - 1:
            # BN affine + ReLU as plain jnp (f32 math, bf16 store): XLA fuses
            # it with the next layer's im2col gather — no second Pallas pass.
            sp = jnp.tile(scale, pack).reshape(1, pack * C)
            hp = jnp.tile(shift, pack).reshape(1, pack * C)
            act = jnp.maximum(y.astype(jnp.float32) * sp + hp, 0.0)
            x = act.astype(jnp.bfloat16).reshape(M, Ho, Wo, C)
        else:
            # Last conv: BN affine + ReLU fused into the pool/projection kernel.
            feat = y.reshape(M, Ho * Wo, C)
            out = pool_project(feat, scale, shift, params["wl"], params["bl"])
    return out.reshape(B, N, -1)


# ----------------------------------------------------------------------------
# Pure-JAX f32 reference (correctness check; includes the conv bias and the
# two-pass variance, verifying that the kernel's folds are exact).
# ----------------------------------------------------------------------------
def reference_forward(patches, params):
    B, N, H, W = patches.shape
    x = patches.reshape(B * N, H, W, 1).astype(jnp.float32)
    for (w_bf, cb, gamma, beta) in params["convs"]:
        cin, cout = x.shape[-1], w_bf.shape[1]
        wk = w_bf.astype(jnp.float32).reshape(3, 3, cin, cout)      # HWIO
        y = jax.lax.conv_general_dilated(
            x, wk, window_strides=(2, 2), padding=((1, 1), (1, 1)),
            dimension_numbers=("NHWC", "HWIO", "NHWC")) + cb
        mean = jnp.mean(y, axis=(0, 1, 2), keepdims=True)
        var = jnp.mean((y - mean) ** 2, axis=(0, 1, 2), keepdims=True)
        y = (y - mean) * jax.lax.rsqrt(var + 1e-5) * gamma + beta
        x = jnp.maximum(y, 0.0)
    pooled = jnp.mean(x, axis=(1, 2))
    out = pooled @ params["wl"].astype(jnp.float32) + params["bl"]
    return out.reshape(B, N, -1)


# ----------------------------------------------------------------------------
if __name__ == "__main__":
    key = jax.random.PRNGKey(0)
    k_x, k_p = jax.random.split(key)

    B, N, H, W = 2, 4, 16, 16          # small shapes; 16 -> 8 -> 4 -> 2 -> 1
    embed_dim = 128

    patches = jax.random.normal(k_x, (B, N, H, W), jnp.float32)
    params = init_params(k_p, embed_dim)

    out = patch_encoder_forward(patches, params)
    out = jax.block_until_ready(out)
    assert out.shape == (B, N, embed_dim), out.shape
    assert bool(jnp.all(jnp.isfinite(out)))

    ref = reference_forward(patches, params)
    max_err = float(jnp.max(jnp.abs(out - ref)))
    # bf16 matmul inputs, bf16 intermediate activations, f32 accumulation:
    # a few e-2 absolute on O(1) outputs is the expected rounding level.
    assert jnp.allclose(out, ref, atol=1e-1, rtol=1e-1), max_err

    print("KERNEL_OK")
</pallas_src>

<mosaic_0001>
module attributes {stable_mosaic.version = 11 : i64} {
  func.func @conv_stats_kernel(%arg0: i32, %arg1: memref<128x18xbf16, #tpu.memory_space<vmem>>, %arg2: memref<18x128xbf16, #tpu.memory_space<vmem>>, %arg3: memref<128x128xbf16, #tpu.memory_space<vmem>>, %arg4: memref<1x2x128xf32, #tpu.memory_space<vmem>>) attributes {dimension_semantics = [#tpu.dimension_semantics<parallel>], iteration_bounds = array<i64: 2>, scalar_prefetch = 0 : i64, scratch_operands = 0 : i64, tpu.core_type = #tpu.core_type<tc>, window_params = [{transform_indices = @transform_0, window_bounds = array<i64: 128, 18>}, {pipeline_mode = #tpu.pipeline_mode<synchronous>, transform_indices = @transform_1, window_bounds = array<i64: 18, 128>}, {transform_indices = @transform_2, window_bounds = array<i64: 128, 128>}, {transform_indices = @transform_3, window_bounds = array<i64: 1, 2, 128>}]} {
    %c0 = arith.constant 0 : index
    %c0_0 = arith.constant 0 : index
    %0 = vector.load %arg1[%c0, %c0_0] : memref<128x18xbf16, #tpu.memory_space<vmem>>, vector<128x18xbf16>
    %c0_1 = arith.constant 0 : index
    %c0_2 = arith.constant 0 : index
    %1 = vector.load %arg2[%c0_1, %c0_2] : memref<18x128xbf16, #tpu.memory_space<vmem>>, vector<18x128xbf16>
    %cst = arith.constant dense<0.000000e+00> : vector<128x128xf32>
    %2 = tpu.matmul %0, %1, %cst {dimension_numbers = #tpu.dot_dimension_numbers<[1], [0], [0], [1], [0, 0, 1, 1], [], []>} : vector<128x18xbf16>, vector<18x128xbf16>, vector<128x128xf32> -> vector<128x128xf32>
    %3 = arith.truncf %2 : vector<128x128xf32> to vector<128x128xbf16>
    %c0_3 = arith.constant 0 : index
    %c0_4 = arith.constant 0 : index
    %4 = vector.load %arg3[%c0_3, %c0_4] : memref<128x128xbf16, #tpu.memory_space<vmem>>, vector<128x128xbf16>
    tpu.vector_store %arg3[%c0_3, %c0_4], %3 {strides = array<i32>} : memref<128x128xbf16, #tpu.memory_space<vmem>>, vector<128x128xbf16>,
    %cst_5 = arith.constant dense<0.000000e+00> : vector<128xf32>
    %5 = vector.multi_reduction <add>, %2, %cst_5 [0] : vector<128x128xf32> to vector<128xf32>
    %6 = vector.shape_cast %5 : vector<128xf32> to vector<1x128xf32>
    %c0_6 = arith.constant 0 : index
    %c0_7 = arith.constant 0 : index
    %c0_8 = arith.constant 0 : index
    %7 = vector.load %arg4[%c0_6, %c0_7, %c0_8] : memref<1x2x128xf32, #tpu.memory_space<vmem>>, vector<1x1x128xf32>
    %8 = vector.shape_cast %7 : vector<1x1x128xf32> to vector<1x128xf32>
    %9 = vector.shape_cast %6 : vector<1x128xf32> to vector<1x1x128xf32>
    tpu.vector_store %arg4[%c0_6, %c0_7, %c0_8], %9 {strides = array<i32>} : memref<1x2x128xf32, #tpu.memory_space<vmem>>, vector<1x1x128xf32>,
    %10 = arith.mulf %2, %2 : vector<128x128xf32>
    %cst_9 = arith.constant dense<0.000000e+00> : vector<128xf32>
    %11 = vector.multi_reduction <add>, %10, %cst_9 [0] : vector<128x128xf32> to vector<128xf32>
    %12 = vector.shape_cast %11 : vector<128xf32> to vector<1x128xf32>
    %c0_10 = arith.constant 0 : index
    %c1 = arith.constant 1 : index
    %c0_11 = arith.constant 0 : index
    %13 = vector.load %arg4[%c0_10, %c1, %c0_11] : memref<1x2x128xf32, #tpu.memory_space<vmem>>, vector<1x1x128xf32>
    %14 = vector.shape_cast %13 : vector<1x1x128xf32> to vector<1x128xf32>
    %15 = vector.shape_cast %12 : vector<1x128xf32> to vector<1x1x128xf32>
    tpu.vector_store %arg4[%c0_10, %c1, %c0_11], %15 {strides = array<i32>} : memref<1x2x128xf32, #tpu.memory_space<vmem>>, vector<1x1x128xf32>,
    return
  }
  func.func @transform_0(%arg0: i32) -> (i32, i32) {
    %c0_i32 = arith.constant 0 : i32
    %c0_i32_0 = arith.constant 0 : i32
    return %arg0, %c0_i32 : i32, i32
  }
  func.func @transform_1(%arg0: i32) -> (i32, i32) {
    %c0_i32 = arith.constant 0 : i32
    %c0_i32_0 = arith.constant 0 : i32
    %c0_i32_1 = arith.constant 0 : i32
    return %c0_i32, %c0_i32_0 : i32, i32
  }
  func.func @transform_2(%arg0: i32) -> (i32, i32) {
    %c0_i32 = arith.constant 0 : i32
    %c0_i32_0 = arith.constant 0 : i32
    return %arg0, %c0_i32 : i32, i32
  }
  func.func @transform_3(%arg0: i32) -> (i32, i32, i32) {
    %c0_i32 = arith.constant 0 : i32
    %c0_i32_0 = arith.constant 0 : i32
    %c0_i32_1 = arith.constant 0 : i32
    return %arg0, %c0_i32, %c0_i32_0 : i32, i32, i32
  }
}

module attributes {stable_mosaic.version = 11 : i64} {
  func.func @conv_stats_kernel(%arg0: i32, %arg1: memref<64x576xbf16, #tpu.memory_space<vmem>>, %arg2: memref<576x128xbf16, #tpu.memory_space<vmem>>, %arg3: memref<64x128xbf16, #tpu.memory_space<vmem>>, %arg4: memref<1x2x128xf32, #tpu.memory_space<vmem>>) attributes {dimension_semantics = [#tpu.dimension_semantics<parallel>], iteration_bounds = array<i64: 2>, scalar_prefetch = 0 : i64, scratch_operands = 0 : i64, tpu.core_type = #tpu.core_type<tc>, window_params = [{transform_indices = @transform_0, window_bounds = array<i64: 64, 576>}, {pipeline_mode = #tpu.pipeline_mode<synchronous>, transform_indices = @transform_1, window_bounds = array<i64: 576, 128>}, {transform_indices = @transform_2, window_bounds = array<i64: 64, 128>}, {transform_indices = @transform_3, window_bounds = array<i64: 1, 2, 128>}]} {
    %c0 = arith.constant 0 : index
    %c0_0 = arith.constant 0 : index
    %0 = vector.load %arg1[%c0, %c0_0] : memref<64x576xbf16, #tpu.memory_space<vmem>>, vector<64x576xbf16>
    %c0_1 = arith.constant 0 : index
    %c0_2 = arith.constant 0 : index
    %1 = vector.load %arg2[%c0_1, %c0_2] : memref<576x128xbf16, #tpu.memory_space<vmem>>, vector<576x128xbf16>
    %cst = arith.constant dense<0.000000e+00> : vector<64x128xf32>
    %2 = tpu.matmul %0, %1, %cst {dimension_numbers = #tpu.dot_dimension_numbers<[1], [0], [0], [1], [0, 0, 1, 1], [], []>} : vector<64x576xbf16>, vector<576x128xbf16>, vector<64x128xf32> -> vector<64x128xf32>
    %3 = arith.truncf %2 : vector<64x128xf32> to vector<64x128xbf16>
    %c0_3 = arith.constant 0 : index
    %c0_4 = arith.constant 0 : index
    %4 = vector.load %arg3[%c0_3, %c0_4] : memref<64x128xbf16, #tpu.memory_space<vmem>>, vector<64x128xbf16>
    tpu.vector_store %arg3[%c0_3, %c0_4], %3 {strides = array<i32>} : memref<64x128xbf16, #tpu.memory_space<vmem>>, vector<64x128xbf16>,
    %cst_5 = arith.constant dense<0.000000e+00> : vector<128xf32>
    %5 = vector.multi_reduction <add>, %2, %cst_5 [0] : vector<64x128xf32> to vector<128xf32>
    %6 = vector.shape_cast %5 : vector<128xf32> to vector<1x128xf32>
    %c0_6 = arith.constant 0 : index
    %c0_7 = arith.constant 0 : index
    %c0_8 = arith.constant 0 : index
    %7 = vector.load %arg4[%c0_6, %c0_7, %c0_8] : memref<1x2x128xf32, #tpu.memory_space<vmem>>, vector<1x1x128xf32>
    %8 = vector.shape_cast %7 : vector<1x1x128xf32> to vector<1x128xf32>
    %9 = vector.shape_cast %6 : vector<1x128xf32> to vector<1x1x128xf32>
    tpu.vector_store %arg4[%c0_6, %c0_7, %c0_8], %9 {strides = array<i32>} : memref<1x2x128xf32, #tpu.memory_space<vmem>>, vector<1x1x128xf32>,
    %10 = arith.mulf %2, %2 : vector<64x128xf32>
    %cst_9 = arith.constant dense<0.000000e+00> : vector<128xf32>
    %11 = vector.multi_reduction <add>, %10, %cst_9 [0] : vector<64x128xf32> to vector<128xf32>
    %12 = vector.shape_cast %11 : vector<128xf32> to vector<1x128xf32>
    %c0_10 = arith.constant 0 : index
    %c1 = arith.constant 1 : index
    %c0_11 = arith.constant 0 : index
    %13 = vector.load %arg4[%c0_10, %c1, %c0_11] : memref<1x2x128xf32, #tpu.memory_space<vmem>>, vector<1x1x128xf32>
    %14 = vector.shape_cast %13 : vector<1x1x128xf32> to vector<1x128xf32>
    %15 = vector.shape_cast %12 : vector<1x128xf32> to vector<1x1x128xf32>
    tpu.vector_store %arg4[%c0_10, %c1, %c0_11], %15 {strides = array<i32>} : memref<1x2x128xf32, #tpu.memory_space<vmem>>, vector<1x1x128xf32>,
    return
  }
  func.func @transform_0(%arg0: i32) -> (i32, i32) {
    %c0_i32 = arith.constant 0 : i32
    %c0_i32_0 = arith.constant 0 : i32
    return %arg0, %c0_i32 : i32, i32
  }
  func.func @transform_1(%arg0: i32) -> (i32, i32) {
    %c0_i32 = arith.constant 0 : i32
    %c0_i32_0 = arith.constant 0 : i32
    %c0_i32_1 = arith.constant 0 : i32
    return %c0_i32, %c0_i32_0 : i32, i32
  }
  func.func @transform_2(%arg0: i32) -> (i32, i32) {
    %c0_i32 = arith.constant 0 : i32
    %c0_i32_0 = arith.constant 0 : i32
    return %arg0, %c0_i32 : i32, i32
  }
  func.func @transform_3(%arg0: i32) -> (i32, i32, i32) {
    %c0_i32 = arith.constant 0 : i32
    %c0_i32_0 = arith.constant 0 : i32
    %c0_i32_1 = arith.constant 0 : i32
    return %arg0, %c0_i32, %c0_i32_0 : i32, i32, i32
  }
}

module attributes {stable_mosaic.version = 11 : i64} {
  func.func @conv_stats_kernel(%arg0: i32, %arg1: memref<32x1152xbf16, #tpu.memory_space<vmem>>, %arg2: memref<1152x256xbf16, #tpu.memory_space<vmem>>, %arg3: memref<32x256xbf16, #tpu.memory_space<vmem>>, %arg4: memref<1x2x256xf32, #tpu.memory_space<vmem>>) attributes {dimension_semantics = [#tpu.dimension_semantics<parallel>], iteration_bounds = array<i64: 1>, scalar_prefetch = 0 : i64, scratch_operands = 0 : i64, tpu.core_type = #tpu.core_type<tc>, window_params = [{transform_indices = @transform_0, window_bounds = array<i64: 32, 1152>}, {pipeline_mode = #tpu.pipeline_mode<synchronous>, transform_indices = @transform_1, window_bounds = array<i64: 1152, 256>}, {transform_indices = @transform_2, window_bounds = array<i64: 32, 256>}, {transform_indices = @transform_3, window_bounds = array<i64: 1, 2, 256>}]} {
    %c0 = arith.constant 0 : index
    %c0_0 = arith.constant 0 : index
    %0 = vector.load %arg1[%c0, %c0_0] : memref<32x1152xbf16, #tpu.memory_space<vmem>>, vector<32x1152xbf16>
    %c0_1 = arith.constant 0 : index
    %c0_2 = arith.constant 0 : index
    %1 = vector.load %arg2[%c0_1, %c0_2] : memref<1152x256xbf16, #tpu.memory_space<vmem>>, vector<1152x256xbf16>
    %cst = arith.constant dense<0.000000e+00> : vector<32x256xf32>
    %2 = tpu.matmul %0, %1, %cst {dimension_numbers = #tpu.dot_dimension_numbers<[1], [0], [0], [1], [0, 0, 1, 1], [], []>} : vector<32x1152xbf16>, vector<1152x256xbf16>, vector<32x256xf32> -> vector<32x256xf32>
    %3 = arith.truncf %2 : vector<32x256xf32> to vector<32x256xbf16>
    %c0_3 = arith.constant 0 : index
    %c0_4 = arith.constant 0 : index
    %4 = vector.load %arg3[%c0_3, %c0_4] : memref<32x256xbf16, #tpu.memory_space<vmem>>, vector<32x256xbf16>
    tpu.vector_store %arg3[%c0_3, %c0_4], %3 {strides = array<i32>} : memref<32x256xbf16, #tpu.memory_space<vmem>>, vector<32x256xbf16>,
    %cst_5 = arith.constant dense<0.000000e+00> : vector<256xf32>
    %5 = vector.multi_reduction <add>, %2, %cst_5 [0] : vector<32x256xf32> to vector<256xf32>
    %6 = vector.shape_cast %5 : vector<256xf32> to vector<1x256xf32>
    %c0_6 = arith.constant 0 : index
    %c0_7 = arith.constant 0 : index
    %c0_8 = arith.constant 0 : index
    %7 = vector.load %arg4[%c0_6, %c0_7, %c0_8] : memref<1x2x256xf32, #tpu.memory_space<vmem>>, vector<1x1x256xf32>
    %8 = vector.shape_cast %7 : vector<1x1x256xf32> to vector<1x256xf32>
    %9 = vector.shape_cast %6 : vector<1x256xf32> to vector<1x1x256xf32>
    tpu.vector_store %arg4[%c0_6, %c0_7, %c0_8], %9 {strides = array<i32>} : memref<1x2x256xf32, #tpu.memory_space<vmem>>, vector<1x1x256xf32>,
    %10 = arith.mulf %2, %2 : vector<32x256xf32>
    %cst_9 = arith.constant dense<0.000000e+00> : vector<256xf32>
    %11 = vector.multi_reduction <add>, %10, %cst_9 [0] : vector<32x256xf32> to vector<256xf32>
    %12 = vector.shape_cast %11 : vector<256xf32> to vector<1x256xf32>
    %c0_10 = arith.constant 0 : index
    %c1 = arith.constant 1 : index
    %c0_11 = arith.constant 0 : index
    %13 = vector.load %arg4[%c0_10, %c1, %c0_11] : memref<1x2x256xf32, #tpu.memory_space<vmem>>, vector<1x1x256xf32>
    %14 = vector.shape_cast %13 : vector<1x1x256xf32> to vector<1x256xf32>
    %15 = vector.shape_cast %12 : vector<1x256xf32> to vector<1x1x256xf32>
    tpu.vector_store %arg4[%c0_10, %c1, %c0_11], %15 {strides = array<i32>} : memref<1x2x256xf32, #tpu.memory_space<vmem>>, vector<1x1x256xf32>,
    return
  }
  func.func @transform_0(%arg0: i32) -> (i32, i32) {
    %c0_i32 = arith.constant 0 : i32
    %c0_i32_0 = arith.constant 0 : i32
    return %arg0, %c0_i32 : i32, i32
  }
  func.func @transform_1(%arg0: i32) -> (i32, i32) {
    %c0_i32 = arith.constant 0 : i32
    %c0_i32_0 = arith.constant 0 : i32
    %c0_i32_1 = arith.constant 0 : i32
    return %c0_i32, %c0_i32_0 : i32, i32
  }
  func.func @transform_2(%arg0: i32) -> (i32, i32) {
    %c0_i32 = arith.constant 0 : i32
    %c0_i32_0 = arith.constant 0 : i32
    return %arg0, %c0_i32 : i32, i32
  }
  func.func @transform_3(%arg0: i32) -> (i32, i32, i32) {
    %c0_i32 = arith.constant 0 : i32
    %c0_i32_0 = arith.constant 0 : i32
    %c0_i32_1 = arith.constant 0 : i32
    return %arg0, %c0_i32, %c0_i32_0 : i32, i32, i32
  }
}

module attributes {stable_mosaic.version = 11 : i64} {
  func.func @conv_stats_kernel(%arg0: i32, %arg1: memref<8x2304xbf16, #tpu.memory_space<vmem>>, %arg2: memref<2304x512xbf16, #tpu.memory_space<vmem>>, %arg3: memref<8x512xbf16, #tpu.memory_space<vmem>>, %arg4: memref<1x2x512xf32, #tpu.memory_space<vmem>>) attributes {dimension_semantics = [#tpu.dimension_semantics<parallel>], iteration_bounds = array<i64: 1>, scalar_prefetch = 0 : i64, scratch_operands = 0 : i64, tpu.core_type = #tpu.core_type<tc>, window_params = [{transform_indices = @transform_0, window_bounds = array<i64: 8, 2304>}, {pipeline_mode = #tpu.pipeline_mode<synchronous>, transform_indices = @transform_1, window_bounds = array<i64: 2304, 512>}, {transform_indices = @transform_2, window_bounds = array<i64: 8, 512>}, {transform_indices = @transform_3, window_bounds = array<i64: 1, 2, 512>}]} {
    %c0 = arith.constant 0 : index
    %c0_0 = arith.constant 0 : index
    %0 = vector.load %arg1[%c0, %c0_0] : memref<8x2304xbf16, #tpu.memory_space<vmem>>, vector<8x2304xbf16>
    %c0_1 = arith.constant 0 : index
    %c0_2 = arith.constant 0 : index
    %1 = vector.load %arg2[%c0_1, %c0_2] : memref<2304x512xbf16, #tpu.memory_space<vmem>>, vector<2304x512xbf16>
    %cst = arith.constant dense<0.000000e+00> : vector<8x512xf32>
    %2 = tpu.matmul %0, %1, %cst {dimension_numbers = #tpu.dot_dimension_numbers<[1], [0], [0], [1], [0, 0, 1, 1], [], []>} : vector<8x2304xbf16>, vector<2304x512xbf16>, vector<8x512xf32> -> vector<8x512xf32>
    %3 = arith.truncf %2 : vector<8x512xf32> to vector<8x512xbf16>
    %c0_3 = arith.constant 0 : index
    %c0_4 = arith.constant 0 : index
    %4 = vector.load %arg3[%c0_3, %c0_4] : memref<8x512xbf16, #tpu.memory_space<vmem>>, vector<8x512xbf16>
    tpu.vector_store %arg3[%c0_3, %c0_4], %3 {strides = array<i32>} : memref<8x512xbf16, #tpu.memory_space<vmem>>, vector<8x512xbf16>,
    %cst_5 = arith.constant dense<0.000000e+00> : vector<512xf32>
    %5 = vector.multi_reduction <add>, %2, %cst_5 [0] : vector<8x512xf32> to vector<512xf32>
    %6 = vector.shape_cast %5 : vector<512xf32> to vector<1x512xf32>
    %c0_6 = arith.constant 0 : index
    %c0_7 = arith.constant 0 : index
    %c0_8 = arith.constant 0 : index
    %7 = vector.load %arg4[%c0_6, %c0_7, %c0_8] : memref<1x2x512xf32, #tpu.memory_space<vmem>>, vector<1x1x512xf32>
    %8 = vector.shape_cast %7 : vector<1x1x512xf32> to vector<1x512xf32>
    %9 = vector.shape_cast %6 : vector<1x512xf32> to vector<1x1x512xf32>
    tpu.vector_store %arg4[%c0_6, %c0_7, %c0_8], %9 {strides = array<i32>} : memref<1x2x512xf32, #tpu.memory_space<vmem>>, vector<1x1x512xf32>,
    %10 = arith.mulf %2, %2 : vector<8x512xf32>
    %cst_9 = arith.constant dense<0.000000e+00> : vector<512xf32>
    %11 = vector.multi_reduction <add>, %10, %cst_9 [0] : vector<8x512xf32> to vector<512xf32>
    %12 = vector.shape_cast %11 : vector<512xf32> to vector<1x512xf32>
    %c0_10 = arith.constant 0 : index
    %c1 = arith.constant 1 : index
    %c0_11 = arith.constant 0 : index
    %13 = vector.load %arg4[%c0_10, %c1, %c0_11] : memref<1x2x512xf32, #tpu.memory_space<vmem>>, vector<1x1x512xf32>
    %14 = vector.shape_cast %13 : vector<1x1x512xf32> to vector<1x512xf32>
    %15 = vector.shape_cast %12 : vector<1x512xf32> to vector<1x1x512xf32>
    tpu.vector_store %arg4[%c0_10, %c1, %c0_11], %15 {strides = array<i32>} : memref<1x2x512xf32, #tpu.memory_space<vmem>>, vector<1x1x512xf32>,
    return
  }
  func.func @transform_0(%arg0: i32) -> (i32, i32) {
    %c0_i32 = arith.constant 0 : i32
    %c0_i32_0 = arith.constant 0 : i32
    return %arg0, %c0_i32 : i32, i32
  }
  func.func @transform_1(%arg0: i32) -> (i32, i32) {
    %c0_i32 = arith.constant 0 : i32
    %c0_i32_0 = arith.constant 0 : i32
    %c0_i32_1 = arith.constant 0 : i32
    return %c0_i32, %c0_i32_0 : i32, i32
  }
  func.func @transform_2(%arg0: i32) -> (i32, i32) {
    %c0_i32 = arith.constant 0 : i32
    %c0_i32_0 = arith.constant 0 : i32
    return %arg0, %c0_i32 : i32, i32
  }
  func.func @transform_3(%arg0: i32) -> (i32, i32, i32) {
    %c0_i32 = arith.constant 0 : i32
    %c0_i32_0 = arith.constant 0 : i32
    %c0_i32_1 = arith.constant 0 : i32
    return %arg0, %c0_i32, %c0_i32_0 : i32, i32, i32
  }
}

module attributes {stable_mosaic.version = 11 : i64} {
  func.func @pool_project_kernel(%arg0: i32, %arg1: memref<8x1x512xbf16, #tpu.memory_space<vmem>>, %arg2: memref<1x1x512xf32, #tpu.memory_space<vmem>>, %arg3: memref<1x1x512xf32, #tpu.memory_space<vmem>>, %arg4: memref<512x128xbf16, #tpu.memory_space<vmem>>, %arg5: memref<1x128xf32, #tpu.memory_space<vmem>>, %arg6: memref<8x128xf32, #tpu.memory_space<vmem>>) attributes {dimension_semantics = [#tpu.dimension_semantics<parallel>], iteration_bounds = array<i64: 1>, scalar_prefetch = 0 : i64, scratch_operands = 0 : i64, tpu.core_type = #tpu.core_type<tc>, window_params = [{transform_indices = @transform_0, window_bounds = array<i64: 8, 1, 512>}, {pipeline_mode = #tpu.pipeline_mode<synchronous>, transform_indices = @transform_1, window_bounds = array<i64: 1, 1, 512>}, {pipeline_mode = #tpu.pipeline_mode<synchronous>, transform_indices = @transform_2, window_bounds = array<i64: 1, 1, 512>}, {pipeline_mode = #tpu.pipeline_mode<synchronous>, transform_indices = @transform_3, window_bounds = array<i64: 512, 128>}, {pipeline_mode = #tpu.pipeline_mode<synchronous>, transform_indices = @transform_4, window_bounds = array<i64: 1, 128>}, {transform_indices = @transform_5, window_bounds = array<i64: 8, 128>}]} {
    %c0 = arith.constant 0 : index
    %c0_0 = arith.constant 0 : index
    %c0_1 = arith.constant 0 : index
    %0 = vector.load %arg1[%c0, %c0_0, %c0_1] : memref<8x1x512xbf16, #tpu.memory_space<vmem>>, vector<8x1x512xbf16>
    %1 = arith.extf %0 : vector<8x1x512xbf16> to vector<8x1x512xf32>
    %c0_2 = arith.constant 0 : index
    %c0_3 = arith.constant 0 : index
    %c0_4 = arith.constant 0 : index
    %2 = vector.load %arg2[%c0_2, %c0_3, %c0_4] : memref<1x1x512xf32, #tpu.memory_space<vmem>>, vector<1x1x512xf32>
    %3 = vector.broadcast %2 : vector<1x1x512xf32> to vector<8x1x512xf32>
    %4 = arith.mulf %1, %3 : vector<8x1x512xf32>
    %c0_5 = arith.constant 0 : index
    %c0_6 = arith.constant 0 : index
    %c0_7 = arith.constant 0 : index
    %5 = vector.load %arg3[%c0_5, %c0_6, %c0_7] : memref<1x1x512xf32, #tpu.memory_space<vmem>>, vector<1x1x512xf32>
    %6 = vector.broadcast %5 : vector<1x1x512xf32> to vector<8x1x512xf32>
    %7 = arith.addf %4, %6 : vector<8x1x512xf32>
    %cst = arith.constant 0.000000e+00 : f32
    %8 = vector.broadcast %cst : f32 to vector<8x1x512xf32>
    %9 = arith.maximumf %7, %8 : vector<8x1x512xf32>
    %cst_8 = arith.constant dense<0.000000e+00> : vector<8x512xf32>
    %10 = vector.multi_reduction <add>, %9, %cst_8 [1] : vector<8x1x512xf32> to vector<8x512xf32>
    %cst_9 = arith.constant 1.000000e+00 : f32
    %11 = vector.broadcast %cst_9 : f32 to vector<8x512xf32>
    %12 = arith.divf %10, %11 : vector<8x512xf32>
    %13 = arith.truncf %12 : vector<8x512xf32> to vector<8x512xbf16>
    %c0_10 = arith.constant 0 : index
    %c0_11 = arith.constant 0 : index
    %14 = vector.load %arg4[%c0_10, %c0_11] : memref<512x128xbf16, #tpu.memory_space<vmem>>, vector<512x128xbf16>
    %cst_12 = arith.constant dense<0.000000e+00> : vector<8x128xf32>
    %15 = tpu.matmul %13, %14, %cst_12 {dimension_numbers = #tpu.dot_dimension_numbers<[1], [0], [0], [1], [0, 0, 1, 1], [], []>} : vector<8x512xbf16>, vector<512x128xbf16>, vector<8x128xf32> -> vector<8x128xf32>
    %c0_13 = arith.constant 0 : index
    %c0_14 = arith.constant 0 : index
    %16 = vector.load %arg5[%c0_13, %c0_14] : memref<1x128xf32, #tpu.memory_space<vmem>>, vector<1x128xf32>
    %17 = vector.broadcast %16 : vector<1x128xf32> to vector<8x128xf32>
    %18 = arith.addf %15, %17 : vector<8x128xf32>
    %c0_15 = arith.constant 0 : index
    %c0_16 = arith.constant 0 : index
    %19 = vector.load %arg6[%c0_15, %c0_16] : memref<8x128xf32, #tpu.memory_space<vmem>>, vector<8x128xf32>
    tpu.vector_store %arg6[%c0_15, %c0_16], %18 {strides = array<i32>} : memref<8x128xf32, #tpu.memory_space<vmem>>, vector<8x128xf32>,
    return
  }
  func.func @transform_0(%arg0: i32) -> (i32, i32, i32) {
    %c0_i32 = arith.constant 0 : i32
    %c0_i32_0 = arith.constant 0 : i32
    %c0_i32_1 = arith.constant 0 : i32
    return %arg0, %c0_i32, %c0_i32_0 : i32, i32, i32
  }
  func.func @transform_1(%arg0: i32) -> (i32, i32, i32) {
    %c0_i32 = arith.constant 0 : i32
    %c0_i32_0 = arith.constant 0 : i32
    %c0_i32_1 = arith.constant 0 : i32
    %c0_i32_2 = arith.constant 0 : i32
    return %c0_i32, %c0_i32_0, %c0_i32_1 : i32, i32, i32
  }
  func.func @transform_2(%arg0: i32) -> (i32, i32, i32) {
    %c0_i32 = arith.constant 0 : i32
    %c0_i32_0 = arith.constant 0 : i32
    %c0_i32_1 = arith.constant 0 : i32
    %c0_i32_2 = arith.constant 0 : i32
    return %c0_i32, %c0_i32_0, %c0_i32_1 : i32, i32, i32
  }
  func.func @transform_3(%arg0: i32) -> (i32, i32) {
    %c0_i32 = arith.constant 0 : i32
    %c0_i32_0 = arith.constant 0 : i32
    %c0_i32_1 = arith.constant 0 : i32
    return %c0_i32, %c0_i32_0 : i32, i32
  }
  func.func @transform_4(%arg0: i32) -> (i32, i32) {
    %c0_i32 = arith.constant 0 : i32
    %c0_i32_0 = arith.constant 0 : i32
    %c0_i32_1 = arith.constant 0 : i32
    return %c0_i32, %c0_i32_0 : i32, i32
  }
  func.func @transform_5(%arg0: i32) -> (i32, i32) {
    %c0_i32 = arith.constant 0 : i32
    %c0_i32_0 = arith.constant 0 : i32
    return %arg0, %c0_i32 : i32, i32
  }
}

</mosaic_0001>

<bundles_post_ra>
// kernel: tile.22
= control target key start
LH: loop header
LB: loop body
LE: loop exit
PB: predicated region body
PF: predicated region fallthrough
CT: control target
= control target key end

     0   :  { %s22_s0 = inlined_call_operand.vmem [shape: f32[64], index: 0, kind: input, shape index: {}]   ;;  %s23_s1 = inlined_call_operand.vmem [shape: f32[2,64], index: 1, kind: output, shape index: {}]  }
   0x1   :  { %v4_v0 = vld [vmem:[%s22_s0] ss:$0 sm:$0xff] }
   0x2   :  { %5 = vst [vmem:[%s23_s1] sm:$0x3] %v4_v0 }

// kernel: patch_encoder_forward.5
= control target key start
LH: loop header
LB: loop body
LE: loop exit
PB: predicated region body
PF: predicated region fallthrough
CT: control target
= control target key end

     0   :  { %s798_s12 = smov 0   ;;  %s847_s0 = inlined_call_operand.vmem [shape: bf16[256,18], index: 0, kind: input, shape index: {}]   ;;  %s848_s1 = inlined_call_operand.vmem [shape: bf16[18,128], index: 1, kind: input, shape index: {}]   ;;  %s849_s2 = inlined_call_operand.vmem [shape: bf16[256,128], index: 2, kind: output, shape index: {0}]   ;;  %s850_s3 = inlined_call_operand.vmem [shape: f32[2,2,128], index: 3, kind: output, shape index: {1}]  }
   0x1 LB: > { %s804_s13 = sadd.s32 4294967295, %s776_s12   ;;  %p611_p0 = scmp.ge.s32.totalorder %s776_s12, 1  ;;  %s776_s12 = sphi %s798_s12, %s14_s12  }
   0x2   : > { %p141_p1 = scmp.lt.s32.totalorder %s776_s12, 3 }
   0x4   : > { %p142_p2 = pnand %p611_p0, %p141_p1 }
   0x5   : > { %v760_v0 = vld [vmem:[%s848_s1] sm:$0xff] (!%p142_p2)   ;;  %vm279_vm0 = vcmask (!%p142_p2), 1040384   ;;  %v761_v1 = vld [vmem:[%s848_s1 + $0x8] ss:$0 sps:$4 sm:$0x11] (!%p142_p2)   ;;  %s612_s18 = sshll.u32 (!%p142_p2), %s804_s13, 4 }
   0x6   : > { %145 = sbr.rel (%p142_p2) target bundleno = 278 (0x116), region = 28  ;;  %726 = vmatprep.subr.bf16.mxu0 (!%p142_p2), %v760_v0  ;;  %p170_p3 = scmp.lt.s32.totalorder (!%p142_p2), %s612_s18, 31  ;;  %746 = vmatprep.subr.bf16.mxu1 (!%p142_p2), %v760_v0  ;;  %v281_v2 = vsel (!%p142_p2), %vm279_vm0, %v761_v1, 0  ;;  %vm254_vm1 = vcmask (!%p142_p2), 146432  }
   0x7   : > { %727 = vmatpush3.bf16.msra.mxu0 (!%p142_p2), %v760_v0  ;;  %748 = vmatpush3.bf16.msra.mxu1 (!%p142_p2), %v760_v0  ;;  %p181_p4 = scmp.lt.s32.totalorder (!%p142_p2), %s804_s13, 1 }
   0x8   : > { %750 = vmatprep.subr.msk.bf16.mxu0 (!%p142_p2), %vm279_vm0, %v761_v1  ;;  %751 = vmatprep.subr.msk.bf16.mxu1 (!%p142_p2), %vm279_vm0, %v761_v1 }
   0xb   : > { %729 = vmatpush3.bf16.msra.mxu0 (!%p142_p2), %v281_v2  ;;  %749 = vmatpush3.bf16.msra.mxu1 (!%p142_p2), %v281_v2 }
   0xd   : > { %s852_s18 = smov (!%p170_p3, %s612_s18), 31  ;;  %s854_s13 = smov (!%p181_p4, %s804_s13), 1 }
   0xe   : > { %s613_s19 = sshll.u32 %s852_s18, 2  ;;  %s616_s26 = sshll.u32 %s854_s13, 1 }
   0xf   : > { %s173_s22 = scalar_lea.vmem %s847_s0, %s613_s19  ;;  %s829_s25 = scalar_lea.vmem %s849_s2, %s613_s19 }
  0x10   : > { %v762_v3 = vld [vmem:[%s173_s22] sm:$0xff]   ;;  %v763_v4 = vld [vmem:[%s173_s22 + $0x8] sm:$0xff]   ;;  %v764_v5 = vld [vmem:[%s173_s22 + $0x10] sm:$0xff]   ;;  %s184_s29 = scalar_lea.vmem %s850_s3, %s616_s26 }
  0x11   : > { %730 = vmatprep.mubr.msk.bf16.mxu0 %vm254_vm1, %v762_v3  ;;  %v766_v6 = vld [vmem:[%s173_s22 + $0x20] sm:$0xff]   ;;  %v767_v7 = vld [vmem:[%s173_s22 + $0x28] sm:$0xff]   ;;  %v768_v8 = vld [vmem:[%s173_s22 + $0x30] sm:$0xff]  }
  0x12   : > { %731 = vmatmul.mubr.msk.bf16.vlgmr.msra.gmra.mrb[0].mxu0 %vm254_vm1, %v763_v4  ;;  %738 = vmatprep.mubr.msk.bf16.mxu1 %vm254_vm1, %v766_v6  ;;  %v765_v9 = vld [vmem:[%s173_s22 + $0x18] sm:$0xff]  }
  0x13   : > { %734 = vmatprep.mubr.msk.bf16.mxu0 %vm254_vm1, %v764_v5  ;;  %739 = vmatmul.mubr.msk.bf16.vlgmr.msra.gmra.mrb[0].mxu1 %vm254_vm1, %v767_v7  ;;  %v769_v10 = vld [vmem:[%s173_s22 + $0x38] sm:$0xff]  }
  0x14   : > { %742 = vmatprep.mubr.msk.bf16.mxu1 %vm254_vm1, %v768_v8 }
  0x1a   : > { %735 = vmatmul.mubr.msk.bf16.gmra.mrb[4].mxu0 %vm254_vm1, %v765_v9 }
  0x1b   : > { %743 = vmatmul.mubr.msk.bf16.gmra.mrb[4].mxu1 %vm254_vm1, %v769_v10 }
  0xe5   : > { %v732_v11 = vpop.f32.mrb[0].mxu0 }
  0xe6   : > { %v317_v12 = vpop.f32.mrb[1].mxu0  ;;  %v740_v20 = vpop.f32.mrb[0].mxu1  ;;  %v484_v22 = vmul.f32 %v732_v11, %v732_v11 }
  0xe7   : > { %v733_v13 = vpop.f32.mrb[2].mxu0  ;;  %v482_v16 = vmul.f32 %v317_v12, %v317_v12  ;;  %v349_v21 = vpop.f32.mrb[1].mxu1  ;;  %v492_v62 = vmul.f32 %v740_v20, %v740_v20 }
  0xe8   : > { %v677_v14 = vpack.c.bf16 %v733_v13, %v732_v11  ;;  %v320_v15 = vpop.f32.mrb[3].mxu0  ;;  %v741_v25 = vpop.f32.mrb[2].mxu1  ;;  %v485_v28 = vmul.f32 %v733_v13, %v733_v13  ;;  %v490_v50 = vmul.f32 %v349_v21, %v349_v21 }
  0xe9   : > { %v672_v17 = vpack.c.bf16 %v320_v15, %v317_v12  ;;  %v460_v18 = vadd.f32 %v320_v15, %v317_v12  ;;  %v483_v19 = vmul.f32 %v320_v15, %v320_v15  ;;  %v697_v26 = vpack.c.bf16 %v741_v25, %v740_v20  ;;  %v352_v27 = vpop.f32.mrb[3].mxu1 }
  0xea   : > { %709 = vst [vmem:[%s829_s25 + $0x8] sm:$0xff] %v677_v14   ;;  %v692_v32 = vpack.c.bf16 %v352_v27, %v349_v21  ;;  %v491_v61 = vmul.f32 %v352_v27, %v352_v27  ;;  %v493_v1 = vmul.f32 %v741_v25, %v741_v25 }
  0xeb   : > { %673 = vst [vmem:[%s829_s25] sm:$0xff] %v672_v17   ;;  %v461_v23 = vadd.f32 %v732_v11, %v460_v18  ;;  %v498_v24 = vadd.f32 %v483_v19, %v482_v16  ;;  %713 = vst [vmem:[%s829_s25 + $0x28] sm:$0xff] %v697_v26  }
  0xec   : > { %712 = vst [vmem:[%s829_s25 + $0x20] sm:$0xff] %v692_v32  }
  0xed   : > { %v499_v29 = vadd.f32 %v498_v24, %v484_v22  ;;  %v736_v30 = vpop.f32.mrb[4].mxu0  ;;  %v462_v31 = vadd.f32 %v733_v13, %v461_v23 }
  0xee   : > { %v333_v33 = vpop.f32.mrb[5].mxu0  ;;  %v744_v44 = vpop.f32.mrb[4].mxu1  ;;  %v488_v46 = vmul.f32 %v736_v30, %v736_v30 }
  0xef   : > { %v463_v34 = vadd.f32 %v462_v31, %v333_v33  ;;  %v486_v35 = vmul.f32 %v333_v33, %v333_v33  ;;  %v500_v36 = vadd.f32 %v499_v29, %v485_v28  ;;  %v737_v37 = vpop.f32.mrb[6].mxu0  ;;  %v365_v45 = vpop.f32.mrb[5].mxu1  ;;  %v496_v10 = vmul.f32 %v744_v44, %v744_v44 }
  0xf0   : > { %v687_v38 = vpack.c.bf16 %v737_v37, %v736_v30  ;;  %v336_v39 = vpop.f32.mrb[7].mxu0  ;;  %v745_v49 = vpop.f32.mrb[6].mxu1  ;;  %v489_v53 = vmul.f32 %v737_v37, %v737_v37  ;;  %v494_v4 = vmul.f32 %v365_v45, %v365_v45 }
  0xf1   : > { %v501_v40 = vadd.f32 %v500_v36, %v486_v35  ;;  %v682_v41 = vpack.c.bf16 %v336_v39, %v333_v33  ;;  %v464_v42 = vadd.f32 %v463_v34, %v336_v39  ;;  %v487_v43 = vmul.f32 %v336_v39, %v336_v39  ;;  %v368_v52 = vpop.f32.mrb[7].mxu1 }
  0xf2   : > { %711 = vst [vmem:[%s829_s25 + $0x18] sm:$0xff] %v687_v38   ;;  %v707_v51 = vpack.c.bf16 %v745_v49, %v744_v44  ;;  %v702_v56 = vpack.c.bf16 %v368_v52, %v365_v45  ;;  %v495_v9 = vmul.f32 %v368_v52, %v368_v52  ;;  %v497_v13 = vmul.f32 %v745_v49, %v745_v49 }
  0xf3   : > { %710 = vst [vmem:[%s829_s25 + $0x10] sm:$0xff] %v682_v41   ;;  %v465_v47 = vadd.f32 %v736_v30, %v464_v42  ;;  %v502_v48 = vadd.f32 %v501_v40, %v487_v43 }
  0xf4   : > { %715 = vst [vmem:[%s829_s25 + $0x38] sm:$0xff] %v707_v51   ;;  %714 = vst [vmem:[%s829_s25 + $0x30] sm:$0xff] %v702_v56  }
  0xf5   : > { %v503_v54 = vadd.f32 %v502_v48, %v488_v46  ;;  %v466_v55 = vadd.f32 %v737_v37, %v465_v47 }
  0xf7   : > { %v467_v57 = vadd.f32 %v466_v55, %v349_v21  ;;  %v504_v58 = vadd.f32 %v503_v54, %v489_v53 }
  0xf9   : > { %v505_v59 = vadd.f32 %v504_v58, %v490_v50  ;;  %v468_v60 = vadd.f32 %v467_v57, %v352_v27 }
  0xfb   : > { %v469_v63 = vadd.f32 %v740_v20, %v468_v60  ;;  %v506_v0 = vadd.f32 %v505_v59, %v491_v61 }
  0xfd   : > { %v507_v2 = vadd.f32 %v506_v0, %v492_v62  ;;  %v470_v3 = vadd.f32 %v741_v25, %v469_v63 }
  0xff   : > { %v471_v5 = vadd.f32 %v470_v3, %v365_v45  ;;  %v508_v6 = vadd.f32 %v507_v2, %v493_v1 }
 0x101   : > { %v509_v7 = vadd.f32 %v508_v6, %v494_v4  ;;  %v472_v8 = vadd.f32 %v471_v5, %v368_v52 }
 0x103   : > { %v473_v11 = vadd.f32 %v744_v44, %v472_v8  ;;  %v510_v12 = vadd.f32 %v509_v7, %v495_v9 }
 0x105   : > { %v474_v14 = vadd.f32 %v745_v49, %v473_v11  ;;  %v511_v15 = vadd.f32 %v510_v12, %v496_v10 }
 0x107   : > { %v475_v16 = vrot.slane %v474_v14, 4  ;;  %v512_v17 = vadd.f32 %v511_v15, %v497_v13 }
 0x109   : > { %v476_v18 = vadd.f32 %v475_v16, %v474_v14  ;;  %v513_v19 = vrot.slane %v512_v17, 4 }
 0x10b   : > { %v477_v20 = vrot.slane %v476_v18, 2  ;;  %v514_v21 = vadd.f32 %v513_v19, %v512_v17 }
 0x10d   : > { %v478_v22 = vadd.f32 %v477_v20, %v476_v18  ;;  %v515_v23 = vrot.slane %v514_v21, 2 }
 0x10f   : > { %v479_v24 = vrot.slane %v478_v22, 1  ;;  %v516_v25 = vadd.f32 %v515_v23, %v514_v21 }
 0x111   : > { %v480_v26 = vadd.f32 %v479_v24, %v478_v22  ;;  %v517_v27 = vrot.slane %v516_v25, 1 }
 0x113   : > { %481 = vst [vmem:[%s184_s29] sm:$0x1] %v480_v26  ;;  %v518_v28 = vadd.f32 %v517_v27, %v516_v25 }
 0x115   : > { %519 = vst [vmem:[%s184_s29 + $0x1] sm:$0x1] %v518_v28 }
 0x116 PF: > { %s14_s12 = sadd.s32 1, %s776_s12  }
 0x117   : > { %p11_p5 = scmp.ge.s32.totalorder %s14_s12, 4  }
 0x119   :  { %13 = sbr.rel (!%p11_p5) target bundleno = 1 (0x1), region = 70 }

// kernel: patch_encoder_forward.6
= control target key start
LH: loop header
LB: loop body
LE: loop exit
PB: predicated region body
PF: predicated region fallthrough
CT: control target
= control target key end

     0   :  { %s1296_s12 = smov 0   ;;  %s1455_s0 = inlined_call_operand.vmem [shape: bf16[128,576], index: 0, kind: input, shape index: {}]   ;;  %s1456_s1 = inlined_call_operand.vmem [shape: bf16[576,128], index: 1, kind: input, shape index: {}]   ;;  %s1457_s2 = inlined_call_operand.vmem [shape: bf16[128,128], index: 2, kind: output, shape index: {0}]   ;;  %s1458_s3 = inlined_call_operand.vmem [shape: f32[2,2,128], index: 3, kind: output, shape index: {1}]  }
   0x1 LB: > { %s1302_s13 = sadd.s32 4294967295, %s1274_s12   ;;  %p976_p0 = scmp.ge.s32.totalorder %s1274_s12, 1  ;;  %s1274_s12 = sphi %s1296_s12, %s14_s12  }
   0x2   : > { %p142_p1 = scmp.lt.s32.totalorder %s1274_s12, 3 }
   0x4   : > { %p143_p2 = pnand %p976_p0, %p142_p1 }
   0x5   : > { %v1204_v0 = vld [vmem:[%s1456_s1 + $0x40] sm:$0xff] (!%p143_p2)   ;;  %v1208_v4 = vld [vmem:[%s1456_s1 + $0x48] sm:$0xff] (!%p143_p2)   ;;  %v1212_v8 = vld [vmem:[%s1456_s1 + $0x50] sm:$0xff] (!%p143_p2)   ;;  %s977_s19 = sshll.u32 (!%p143_p2), %s1302_s13, 3  ;;  %vm601_vm0 = vcmask (!%p143_p2), 523264   ;;  %p184_p4 = scmp.lt.s32.totalorder (!%p143_p2), %s1302_s13, 1 }
   0x6   : > { %146 = sbr.rel (%p143_p2) target bundleno = 317 (0x13d), region = 28  ;;  %v1205_v1 = vld [vmem:[%s1456_s1 + $0xc0] sm:$0xff] (!%p143_p2)   ;;  %1083 = vmatprep.subr.bf16.mxu0 (!%p143_p2), %v1204_v0  ;;  %v1209_v5 = vld [vmem:[%s1456_s1 + $0xc8] sm:$0xff] (!%p143_p2)   ;;  %v1213_v9 = vld [vmem:[%s1456_s1 + $0xd0] sm:$0xff] (!%p143_p2)   ;;  %p172_p3 = scmp.lt.s32.totalorder (!%p143_p2), %s977_s19, 15 }
   0x7   : > { %v1206_v2 = vld [vmem:[%s1456_s1] sm:$0xff] (!%p143_p2)   ;;  %1123 = vmatprep.subr.bf16.mxu1 (!%p143_p2), %v1205_v1  ;;  %v1210_v6 = vld [vmem:[%s1456_s1 + $0x8] sm:$0xff] (!%p143_p2)   ;;  %v1214_v10 = vld [vmem:[%s1456_s1 + $0x10] sm:$0xff] (!%p143_p2)  }
   0x8   : > { %v1207_v3 = vld [vmem:[%s1456_s1 + $0x80] sm:$0xff] (!%p143_p2)   ;;  %1084 = vmatpush3.bf16.msra.mxu0 (!%p143_p2), %v1206_v2  ;;  %v1211_v7 = vld [vmem:[%s1456_s1 + $0x88] sm:$0xff] (!%p143_p2)   ;;  %v1215_v11 = vld [vmem:[%s1456_s1 + $0x90] sm:$0xff] (!%p143_p2)  }
   0x9   : > { %1124 = vmatpush3.bf16.msra.mxu1 (!%p143_p2), %v1207_v3  ;;  %1085 = vmatprep.subr.bf16.mxu0 (!%p143_p2), %v1208_v4  ;;  %v1216_v12 = vld [vmem:[%s1456_s1 + $0x58] sm:$0xff] (!%p143_p2)   ;;  %v1220_v16 = vld [vmem:[%s1456_s1 + $0x60] sm:$0xff] (!%p143_p2)   ;;  %v1224_v20 = vld [vmem:[%s1456_s1 + $0x68] sm:$0xff] (!%p143_p2)  }
   0xa   : > { %1125 = vmatprep.subr.bf16.mxu1 (!%p143_p2), %v1209_v5  ;;  %v1217_v13 = vld [vmem:[%s1456_s1 + $0xd8] sm:$0xff] (!%p143_p2)   ;;  %v1221_v17 = vld [vmem:[%s1456_s1 + $0xe0] sm:$0xff] (!%p143_p2)   ;;  %v1225_v21 = vld [vmem:[%s1456_s1 + $0xe8] sm:$0xff] (!%p143_p2)  }
   0xb   : > { %v1218_v14 = vld [vmem:[%s1456_s1 + $0x18] sm:$0xff] (!%p143_p2)   ;;  %v1222_v18 = vld [vmem:[%s1456_s1 + $0x20] sm:$0xff] (!%p143_p2)   ;;  %v1226_v22 = vld [vmem:[%s1456_s1 + $0x28] sm:$0xff] (!%p143_p2)  }
   0xc   : > { %1086 = vmatpush3.bf16.msra.mxu0 (!%p143_p2), %v1210_v6  ;;  %v1219_v15 = vld [vmem:[%s1456_s1 + $0x98] sm:$0xff] (!%p143_p2)   ;;  %v1223_v19 = vld [vmem:[%s1456_s1 + $0xa0] sm:$0xff] (!%p143_p2)   ;;  %v1227_v23 = vld [vmem:[%s1456_s1 + $0xa8] sm:$0xff] (!%p143_p2)  }
   0xd   : > { %1126 = vmatpush3.bf16.msra.mxu1 %v1211_v7  ;;  %1087 = vmatprep.subr.bf16.mxu0 %v1212_v8  ;;  %s1460_s19 = smov (!%p172_p3, %s977_s19), 15  ;;  %v1228_v24 = vld [vmem:[%s1456_s1 + $0x70] sm:$0xff]   ;;  %v1232_v28 = vld [vmem:[%s1456_s1 + $0x78] sm:$0xff]   ;;  %v1242_v36 = vld [vmem:[%s1456_s1 + $0x100] sm:$0xff]   ;;  %s1462_s13 = smov (!%p184_p4, %s1302_s13), 1 }
   0xe   : > { %1127 = vmatprep.subr.bf16.mxu1 %v1213_v9  ;;  %v1229_v25 = vld [vmem:[%s1456_s1 + $0xf0] sm:$0xff]   ;;  %s1195_s17 = smul.u32 20, %s1460_s19  ;;  %v1233_v29 = vld [vmem:[%s1456_s1 + $0xf8] sm:$0xff]   ;;  %v1249_v39 = vld [vmem:[%s1456_s1 + $0x108] sm:$0xff]  }
   0xf   : > { %v1230_v26 = vld [vmem:[%s1456_s1 + $0x30] sm:$0xff]   ;;  %v1234_v30 = vld [vmem:[%s1456_s1 + $0x38] sm:$0xff]  }
  0x10   : > { %1088 = vmatpush3.bf16.msra.mxu0 %v1214_v10  ;;  %v1231_v27 = vld [vmem:[%s1456_s1 + $0xb0] sm:$0xff]   ;;  %s1403_s29 = scalar_lea.vmem %s1455_s0, %s1195_s17  ;;  %v1235_v31 = vld [vmem:[%s1456_s1 + $0xb8] sm:$0xff]   ;;  %s980_s17 = sshll.u32 %s1460_s19, 2 }
  0x11   : > { %1128 = vmatpush3.bf16.msra.mxu1 %v1215_v11  ;;  %1089 = vmatprep.subr.bf16.mxu0 %v1216_v12  ;;  %v1236_v32 = vld [vmem:[%s1403_s29] ss:$20 sps:$4 sm:$0xff]   ;;  %v1238_v33 = vld [vmem:[%s1403_s29 + $0x4] ss:$20 sps:$4 sm:$0xff]   ;;  %v1239_v34 = vld [vmem:[%s1403_s29 + $0x8] ss:$20 sps:$4 sm:$0xff]   ;;  %s182_s21 = scalar_lea.vmem %s1457_s2, %s980_s17 }
  0x12   : > { %1129 = vmatprep.subr.bf16.mxu1 %v1217_v13  ;;  %v1241_v35 = vld [vmem:[%s1403_s29 + $0xc] ss:$20 sps:$4 sm:$0xff]   ;;  %646 = vmatprep.mubr.bf16.mxu0 %v1238_v33  ;;  %v1245_v38 = vld [vmem:[%s1403_s29 + $0x34] ss:$20 sps:$4 sm:$0xff]   ;;  %v1248_v41 = vld [vmem:[%s1403_s29 + $0x30] ss:$20 sps:$4 sm:$0xff]  }
  0x13   : > { %711 = vmatprep.mubr.bf16.mxu1 %v1241_v35  ;;  %v1243_v37 = vld [vmem:[%s1403_s29 + $0x2c] ss:$20 sps:$4 sm:$0xff]   ;;  %v1247_v40 = vld [vmem:[%s1403_s29 + $0x28] ss:$20 sps:$4 sm:$0xff]   ;;  %v1256_v44 = vld [vmem:[%s1456_s1 + $0x110] sm:$0xff]   ;;  %s981_s19 = sshll.u32 %s1462_s13, 1 }
  0x14   : > { %1090 = vmatpush3.bf16.msra.mxu0 %v1218_v14  ;;  %v1250_v42 = vld [vmem:[%s1403_s29 + $0x54] ss:$20 sps:$4 sm:$0xff]   ;;  %v1252_v43 = vld [vmem:[%s1403_s29 + $0x5c] ss:$20 sps:$4 sm:$0xff]   ;;  %v1255_v47 = vld [vmem:[%s1403_s29 + $0x58] ss:$20 sps:$4 sm:$0xff]   ;;  %s187_s24 = scalar_lea.vmem %s1458_s3, %s981_s19 }
  0x15   : > { %1130 = vmatpush3.bf16.msra.mxu1 %v1219_v15  ;;  %1091 = vmatprep.subr.bf16.mxu0 %v1220_v16  ;;  %v1263_v45 = vld [vmem:[%s1456_s1 + $0x118] sm:$0xff]   ;;  %v1254_v46 = vld [vmem:[%s1403_s29 + $0x50] ss:$20 sps:$4 sm:$0xff]   ;;  %v1262_v51 = vld [vmem:[%s1403_s29 + $0x80] ss:$20 sps:$4 sm:$0xff]  }
  0x16   : > { %1131 = vmatprep.subr.bf16.mxu1 %v1221_v17  ;;  %v1257_v48 = vld [vmem:[%s1403_s29 + $0x7c] ss:$20 sps:$4 sm:$0xff]   ;;  %v1259_v49 = vld [vmem:[%s1403_s29 + $0x84] ss:$20 sps:$4 sm:$0xff]   ;;  %v1265_v53 = vld [vmem:[%s1403_s29 + $0x60] ss:$20 sps:$4 sm:$0xff]  }
  0x17   : > { %v1261_v50 = vld [vmem:[%s1403_s29 + $0x78] ss:$20 sps:$4 sm:$0xff]   ;;  %v1264_v52 = vld [vmem:[%s1403_s29 + $0x10] ss:$20 sps:$4 sm:$0xff]   ;;  %v1267_v55 = vld [vmem:[%s1403_s29 + $0x88] ss:$20 sps:$4 sm:$0xff]  }
  0x18   : > { %1092 = vmatpush3.bf16.msra.mxu0 %v1222_v18  ;;  %v1266_v54 = vld [vmem:[%s1403_s29 + $0x38] ss:$20 sps:$4 sm:$0xff]  }
  0x19   : > { %1132 = vmatpush3.bf16.msra.mxu1 %v1223_v19  ;;  %1093 = vmatprep.subr.bf16.mxu0 %v1224_v20 }
  0x1a   : > { %1133 = vmatprep.subr.bf16.mxu1 %v1225_v21 }
  0x1c   : > { %1094 = vmatpush3.bf16.msra.mxu0 %v1226_v22 }
  0x1d   : > { %1134 = vmatpush3.bf16.msra.mxu1 %v1227_v23  ;;  %1095 = vmatprep.subr.bf16.mxu0 %v1228_v24 }
  0x1e   : > { %1135 = vmatprep.subr.bf16.mxu1 %v1229_v25 }
  0x20   : > { %1096 = vmatpush3.bf16.msra.mxu0 %v1230_v26 }
  0x21   : > { %1136 = vmatpush3.bf16.msra.mxu1 %v1231_v27  ;;  %1097 = vmatprep.subr.bf16.mxu0 %v1232_v28 }
  0x22   : > { %1137 = vmatprep.subr.bf16.mxu1 %v1233_v29 }
  0x24   : > { %1098 = vmatpush3.bf16.msra.mxu0 %v1234_v30 }
  0x25   : > { %1138 = vmatpush3.bf16.msra.mxu1 %v1235_v31  ;;  %1171 = vmatprep.subr.bf16.mxu0 %v1242_v36 }
  0x26   : > { %1187 = vmatprep.subr.bf16.mxu1 %v1242_v36 }
  0x27   : > { %647 = vmatmul.mubr.bf16.vlgmr.msra.gmra.mrb[0].mxu0 %v1236_v32 }
  0x28   : > { %712 = vmatmul.mubr.bf16.vlgmr.msra.gmra.mrb[0].mxu1 %v1239_v34  ;;  %1172 = vmatpush3.bf16.msra.mxu0 %v1242_v36 }
  0x29   : > { %654 = vmatprep.mubr.bf16.mxu0 %v1243_v37  ;;  %719 = vmatprep.mubr.bf16.mxu1 %v1245_v38 }
  0x2a   : > { %1191 = vmatpush3.bf16.msra.mxu1 %v1242_v36  ;;  %1173 = vmatprep.subr.bf16.mxu0 %v1249_v39 }
  0x2b   : > { %1188 = vmatprep.subr.bf16.mxu1 %v1249_v39 }
  0x2c   : > { %1174 = vmatpush3.bf16.msra.mxu0 %v1249_v39 }
  0x2d   : > { %1175 = vmatprep.subr.bf16.mxu0 %v1256_v44 }
  0x2e   : > { %1192 = vmatpush3.bf16.msra.mxu1 %v1249_v39 }
  0x2f   : > { %655 = vmatmul.mubr.bf16.gmra.mrb[4].mxu0 %v1247_v40  ;;  %1189 = vmatprep.subr.bf16.mxu1 %v1256_v44 }
  0x30   : > { %720 = vmatmul.mubr.bf16.gmra.mrb[4].mxu1 %v1248_v41  ;;  %662 = vmatprep.mubr.bf16.mxu0 %v1250_v42 }
  0x31   : > { %727 = vmatprep.mubr.bf16.mxu1 %v1252_v43  ;;  %1176 = vmatpush3.bf16.msra.mxu0 %v1256_v44 }
  0x32   : > { %1177 = vmatprep.subr.bf16.mxu0 %v1263_v45  ;;  %1193 = vmatpush3.bf16.msra.mxu1 %v1256_v44 }
  0x33   : > { %1190 = vmatprep.subr.bf16.mxu1 %v1263_v45 }
  0x35   : > { %1178 = vmatpush3.bf16.msra.mxu0 %v1263_v45 }
  0x36   : > { %1194 = vmatpush3.bf16.msra.mxu1 %v1263_v45 }
  0x37   : > { %663 = vmatmul.mubr.bf16.gmra.mrb[8].mxu0 %v1254_v46 }
  0x38   : > { %728 = vmatmul.mubr.bf16.gmra.mrb[8].mxu1 %v1255_v47  ;;  %670 = vmatprep.mubr.bf16.mxu0 %v1257_v48 }
  0x39   : > { %735 = vmatprep.mubr.bf16.mxu1 %v1259_v49 }
  0x3f   : > { %671 = vmatmul.mubr.bf16.gmra.mrb[12].mxu0 %v1261_v50 }
  0x40   : > { %736 = vmatmul.mubr.bf16.gmra.mrb[12].mxu1 %v1262_v51  ;;  %1179 = vmatprep.mubr.msk.bf16.mxu0 %vm601_vm0, %v1264_v52 }
  0x41   : > { %1183 = vmatprep.mubr.msk.bf16.mxu1 %vm601_vm0, %v1265_v53 }
  0x47   : > { %1180 = vmatmul.mubr.msk.bf16.vlgmr.msra.gmra.mrb[16].mxu0 %vm601_vm0, %v1266_v54 }
  0x48   : > { %1184 = vmatmul.mubr.msk.bf16.vlgmr.msra.gmra.mrb[16].mxu1 %vm601_vm0, %v1267_v55 }
  0xfa   : > { %v1099_v56 = vpop.f32.mrb[0].mxu0 }
  0xfb   : > { %v1139_v57 = vpop.f32.mrb[0].mxu1  ;;  %v1100_v58 = vpop.f32.mrb[1].mxu0 }
  0xfc   : > { %v1101_v59 = vadd.f32 %v1100_v58, %v1099_v56  ;;  %v1140_v60 = vpop.f32.mrb[1].mxu1  ;;  %v1102_v61 = vpop.f32.mrb[2].mxu0 }
  0xfd   : > { %v1141_v62 = vadd.f32 %v1140_v60, %v1139_v57  ;;  %v1142_v63 = vpop.f32.mrb[2].mxu1  ;;  %v1103_v0 = vpop.f32.mrb[3].mxu0 }
  0xfe   : > { %v1104_v1 = vadd.f32 %v1103_v0, %v1102_v61  ;;  %v1143_v2 = vpop.f32.mrb[3].mxu1 }
  0xff   : > { %v1144_v3 = vadd.f32 %v1143_v2, %v1142_v63  ;;  %v714_v4 = vadd.f32 %v1141_v62, %v1101_v59 }
 0x101   : > { %v717_v5 = vadd.f32 %v1144_v3, %v1104_v1 }
 0x102   : > { %v1105_v6 = vpop.f32.mrb[4].mxu0 }
 0x103   : > { %v1145_v7 = vpop.f32.mrb[4].mxu1  ;;  %v1106_v8 = vpop.f32.mrb[5].mxu0 }
 0x104   : > { %v1107_v9 = vadd.f32 %v1106_v8, %v1105_v6  ;;  %v1146_v10 = vpop.f32.mrb[5].mxu1  ;;  %v1108_v11 = vpop.f32.mrb[6].mxu0 }
 0x105   : > { %v1147_v12 = vadd.f32 %v1146_v10, %v1145_v7  ;;  %v1148_v13 = vpop.f32.mrb[6].mxu1  ;;  %v1109_v14 = vpop.f32.mrb[7].mxu0 }
 0x106   : > { %v1110_v15 = vadd.f32 %v1109_v14, %v1108_v11  ;;  %v1149_v16 = vpop.f32.mrb[7].mxu1 }
 0x107   : > { %v1150_v17 = vadd.f32 %v1149_v16, %v1148_v13  ;;  %v722_v18 = vadd.f32 %v1147_v12, %v1107_v9 }
 0x109   : > { %v725_v19 = vadd.f32 %v1150_v17, %v1110_v15 }
 0x10a   : > { %v1111_v20 = vpop.f32.mrb[8].mxu0 }
 0x10b   : > { %v1151_v21 = vpop.f32.mrb[8].mxu1  ;;  %v1112_v22 = vpop.f32.mrb[9].mxu0 }
 0x10c   : > { %v1113_v23 = vadd.f32 %v1112_v22, %v1111_v20  ;;  %v1152_v24 = vpop.f32.mrb[9].mxu1  ;;  %v1114_v25 = vpop.f32.mrb[10].mxu0 }
 0x10d   : > { %v1153_v26 = vadd.f32 %v1152_v24, %v1151_v21  ;;  %v1154_v27 = vpop.f32.mrb[10].mxu1  ;;  %v1115_v28 = vpop.f32.mrb[11].mxu0 }
 0x10e   : > { %v1116_v29 = vadd.f32 %v1115_v28, %v1114_v25  ;;  %v1155_v30 = vpop.f32.mrb[11].mxu1 }
 0x10f   : > { %v1156_v31 = vadd.f32 %v1155_v30, %v1154_v27  ;;  %v730_v32 = vadd.f32 %v1153_v26, %v1113_v23 }
 0x111   : > { %v733_v33 = vadd.f32 %v1156_v31, %v1116_v29 }
 0x112   : > { %v1117_v34 = vpop.f32.mrb[12].mxu0 }
 0x113   : > { %v1157_v35 = vpop.f32.mrb[12].mxu1  ;;  %v1118_v36 = vpop.f32.mrb[13].mxu0 }
 0x114   : > { %v1119_v37 = vadd.f32 %v1118_v36, %v1117_v34  ;;  %v1158_v38 = vpop.f32.mrb[13].mxu1  ;;  %v1120_v39 = vpop.f32.mrb[14].mxu0 }
 0x115   : > { %v1159_v40 = vadd.f32 %v1158_v38, %v1157_v35  ;;  %v1160_v41 = vpop.f32.mrb[14].mxu1  ;;  %v1121_v42 = vpop.f32.mrb[15].mxu0 }
 0x116   : > { %v1122_v43 = vadd.f32 %v1121_v42, %v1120_v39  ;;  %v1161_v44 = vpop.f32.mrb[15].mxu1 }
 0x117   : > { %v1162_v45 = vadd.f32 %v1161_v44, %v1160_v41  ;;  %v738_v46 = vadd.f32 %v1159_v40, %v1119_v37 }
 0x119   : > { %v741_v47 = vadd.f32 %v1162_v45, %v1122_v43 }
 0x11a   : > { %v1181_v48 = vpop.f32.mrb[16].mxu0 }
 0x11b   : > { %v787_v49 = vadd.f32 %v1181_v48, %v722_v18  ;;  %v1185_v50 = vpop.f32.mrb[16].mxu1  ;;  %v778_v51 = vpop.f32.mrb[17].mxu0 }
 0x11c   : > { %v803_v52 = vadd.f32 %v1185_v50, %v738_v46  ;;  %v779_v53 = vadd.f32 %v778_v51, %v714_v4  ;;  %v794_v54 = vpop.f32.mrb[17].mxu1  ;;  %v1182_v55 = vpop.f32.mrb[18].mxu0 }
 0x11d   : > { %v795_v56 = vadd.f32 %v794_v54, %v730_v32  ;;  %v790_v57 = vadd.f32 %v1182_v55, %v725_v19  ;;  %v1186_v58 = vpop.f32.mrb[18].mxu1  ;;  %v781_v59 = vpop.f32.mrb[19].mxu0  ;;  %v865_v9 = vmul.f32 %v787_v49, %v787_v49 }
 0x11e   : > { %v806_v60 = vadd.f32 %v1186_v58, %v741_v47  ;;  %v782_v61 = vadd.f32 %v781_v59, %v717_v5  ;;  %v797_v62 = vpop.f32.mrb[19].mxu1  ;;  %v863_v6 = vmul.f32 %v779_v53, %v779_v53  ;;  %v869_v20 = vmul.f32 %v803_v52, %v803_v52 }
 0x11f   : > { %v1068_v63 = vpack.c.bf16 %v790_v57, %v787_v49  ;;  %v798_v0 = vadd.f32 %v797_v62, %v733_v33  ;;  %v866_v12 = vmul.f32 %v790_v57, %v790_v57  ;;  %v867_v14 = vmul.f32 %v795_v56, %v795_v56 }
 0x120   : > { %v1078_v1 = vpack.c.bf16 %v806_v60, %v803_v52  ;;  %v1063_v2 = vpack.c.bf16 %v782_v61, %v779_v53  ;;  %v849_v3 = vadd.f32 %v782_v61, %v779_v53  ;;  %v864_v4 = vmul.f32 %v782_v61, %v782_v61 }
 0x121   : > { %1080 = vst [vmem:[%s182_s21 + $0x8] sm:$0xff] %v1068_v63   ;;  %v1073_v7 = vpack.c.bf16 %v798_v0, %v795_v56  ;;  %v868_v17 = vmul.f32 %v798_v0, %v798_v0  ;;  %v870_v23 = vmul.f32 %v806_v60, %v806_v60 }
 0x122   : > { %1082 = vst [vmem:[%s182_s21 + $0x18] sm:$0xff] %v1078_v1   ;;  %1064 = vst [vmem:[%s182_s21] sm:$0xff] %v1063_v2   ;;  %v850_v8 = vadd.f32 %v849_v3, %v787_v49  ;;  %v871_v10 = vadd.f32 %v864_v4, %v863_v6 }
 0x123   : > { %1081 = vst [vmem:[%s182_s21 + $0x10] sm:$0xff] %v1073_v7  }
 0x124   : > { %v851_v11 = vadd.f32 %v850_v8, %v790_v57  ;;  %v872_v5 = vadd.f32 %v871_v10, %v865_v9 }
 0x126   : > { %v852_v13 = vadd.f32 %v851_v11, %v795_v56  ;;  %v873_v15 = vadd.f32 %v872_v5, %v866_v12 }
 0x128   : > { %v853_v16 = vadd.f32 %v852_v13, %v798_v0  ;;  %v874_v18 = vadd.f32 %v873_v15, %v867_v14 }
 0x12a   : > { %v854_v19 = vadd.f32 %v853_v16, %v803_v52  ;;  %v875_v21 = vadd.f32 %v874_v18, %v868_v17 }
 0x12c   : > { %v855_v22 = vadd.f32 %v854_v19, %v806_v60  ;;  %v876_v24 = vadd.f32 %v875_v21, %v869_v20 }
 0x12e   : > { %v856_v25 = vrot.slane %v855_v22, 4  ;;  %v877_v26 = vadd.f32 %v876_v24, %v870_v23 }
 0x130   : > { %v857_v27 = vadd.f32 %v856_v25, %v855_v22  ;;  %v878_v28 = vrot.slane %v877_v26, 4 }
 0x132   : > { %v858_v29 = vrot.slane %v857_v27, 2  ;;  %v879_v30 = vadd.f32 %v878_v28, %v877_v26 }
 0x134   : > { %v859_v31 = vadd.f32 %v858_v29, %v857_v27  ;;  %v880_v32 = vrot.slane %v879_v30, 2 }
 0x136   : > { %v860_v33 = vrot.slane %v859_v31, 1  ;;  %v881_v34 = vadd.f32 %v880_v32, %v879_v30 }
 0x138   : > { %v861_v35 = vadd.f32 %v860_v33, %v859_v31  ;;  %v882_v36 = vrot.slane %v881_v34, 1 }
 0x13a   : > { %862 = vst [vmem:[%s187_s24] sm:$0x1] %v861_v35  ;;  %v883_v37 = vadd.f32 %v882_v36, %v881_v34 }
 0x13c   : > { %884 = vst [vmem:[%s187_s24 + $0x1] sm:$0x1] %v883_v37 }
 0x13d PF: > { %s14_s12 = sadd.s32 1, %s1274_s12  }
 0x13e   : > { %p11_p5 = scmp.ge.s32.totalorder %s14_s12, 4  }
 0x140   :  { %13 = sbr.rel (!%p11_p5) target bundleno = 1 (0x1), region = 70 }

// kernel: patch_encoder_forward.7
= control target key start
LH: loop header
LB: loop body
LE: loop exit
PB: predicated region body
PF: predicated region fallthrough
CT: control target
= control target key end

     0   :  { %s2367_s1 = inlined_call_operand.vmem [shape: bf16[1152,256], index: 1, kind: input, shape index: {}]   ;;  %s2368_s0 = inlined_call_operand.vmem [shape: bf16[32,1152], index: 0, kind: input, shape index: {}]   ;;  %s2369_s2 = inlined_call_operand.vmem [shape: bf16[32,256], index: 2, kind: output, shape index: {0}]   ;;  %s2370_s3 = inlined_call_operand.vmem [shape: f32[1,2,256], index: 3, kind: output, shape index: {1}]  }
   0x1   :  { %v1599_v0 = vld [vmem:[%s2367_s1 + $0x4] ss:$8 sps:$4 sm:$0xff]   ;;  %v1603_v2 = vld [vmem:[%s2367_s1] ss:$8 sps:$4 sm:$0xff]   ;;  %v1605_v4 = vld [vmem:[%s2367_s1 + $0x14] ss:$8 sps:$4 sm:$0xff]  }
   0x2   :  { %v1601_v1 = vld [vmem:[%s2367_s1 + $0x204] ss:$8 sps:$4 sm:$0xff]   ;;  %990 = vmatprep.subr.bf16.mxu1 %v1599_v0  ;;  %v1604_v3 = vld [vmem:[%s2367_s1 + $0x200] ss:$8 sps:$4 sm:$0xff]   ;;  %v1607_v5 = vld [vmem:[%s2367_s1 + $0x214] ss:$8 sps:$4 sm:$0xff]  }
   0x3   :  { %1096 = vmatprep.subr.bf16.mxu0 %v1601_v1  ;;  %991 = vmatpush1.bf16.msra.mxu1 %v1603_v2  ;;  %v1609_v6 = vld [vmem:[%s2367_s1 + $0x10] ss:$8 sps:$4 sm:$0xff]   ;;  %v1611_v8 = vld [vmem:[%s2367_s1 + $0x24] ss:$8 sps:$4 sm:$0xff]   ;;  %v1615_v10 = vld [vmem:[%s2367_s1 + $0x20] ss:$8 sps:$4 sm:$0xff]  }
   0x4   :  { %1097 = vmatpush1.bf16.msra.mxu0 %v1604_v3  ;;  %992 = vmatprep.subr.bf16.mxu1 %v1605_v4  ;;  %v1610_v7 = vld [vmem:[%s2367_s1 + $0x210] ss:$8 sps:$4 sm:$0xff]   ;;  %v1613_v9 = vld [vmem:[%s2367_s1 + $0x224] ss:$8 sps:$4 sm:$0xff]   ;;  %v1616_v11 = vld [vmem:[%s2367_s1 + $0x220] ss:$8 sps:$4 sm:$0xff]  }
   0x5   :  { %1098 = vmatprep.subr.bf16.mxu0 %v1607_v5  ;;  %v1617_v12 = vld [vmem:[%s2367_s1 + $0x34] ss:$8 sps:$4 sm:$0xff]   ;;  %v1621_v14 = vld [vmem:[%s2367_s1 + $0x30] ss:$8 sps:$4 sm:$0xff]   ;;  %v1623_v16 = vld [vmem:[%s2367_s1 + $0x44] ss:$8 sps:$4 sm:$0xff]  }
   0x6   :  { %v1619_v13 = vld [vmem:[%s2367_s1 + $0x234] ss:$8 sps:$4 sm:$0xff]   ;;  %v1622_v15 = vld [vmem:[%s2367_s1 + $0x230] ss:$8 sps:$4 sm:$0xff]   ;;  %v1625_v17 = vld [vmem:[%s2367_s1 + $0x244] ss:$8 sps:$4 sm:$0xff]  }
   0x7   :  { %993 = vmatpush1.bf16.msra.mxu1 %v1609_v6  ;;  %v1627_v18 = vld [vmem:[%s2367_s1 + $0x40] ss:$8 sps:$4 sm:$0xff]   ;;  %v1629_v20 = vld [vmem:[%s2367_s1 + $0x54] ss:$8 sps:$4 sm:$0xff]   ;;  %v1633_v22 = vld [vmem:[%s2367_s1 + $0x50] ss:$8 sps:$4 sm:$0xff]  }
   0x8   :  { %1099 = vmatpush1.bf16.msra.mxu0 %v1610_v7  ;;  %994 = vmatprep.subr.bf16.mxu1 %v1611_v8  ;;  %v1628_v19 = vld [vmem:[%s2367_s1 + $0x240] ss:$8 sps:$4 sm:$0xff]   ;;  %v1631_v21 = vld [vmem:[%s2367_s1 + $0x254] ss:$8 sps:$4 sm:$0xff]   ;;  %v1634_v23 = vld [vmem:[%s2367_s1 + $0x250] ss:$8 sps:$4 sm:$0xff]  }
   0x9   :  { %1100 = vmatprep.subr.bf16.mxu0 %v1613_v9  ;;  %v1635_v24 = vld [vmem:[%s2367_s1 + $0x64] ss:$8 sps:$4 sm:$0xff]   ;;  %v1639_v26 = vld [vmem:[%s2367_s1 + $0x60] ss:$8 sps:$4 sm:$0xff]   ;;  %v1641_v28 = vld [vmem:[%s2367_s1 + $0x74] ss:$8 sps:$4 sm:$0xff]  }
   0xa   :  { %v1637_v25 = vld [vmem:[%s2367_s1 + $0x264] ss:$8 sps:$4 sm:$0xff]   ;;  %v1640_v27 = vld [vmem:[%s2367_s1 + $0x260] ss:$8 sps:$4 sm:$0xff]   ;;  %v1643_v29 = vld [vmem:[%s2367_s1 + $0x274] ss:$8 sps:$4 sm:$0xff]  }
   0xb   :  { %995 = vmatpush1.bf16.msra.mxu1 %v1615_v10  ;;  %v1645_v30 = vld [vmem:[%s2367_s1 + $0x70] ss:$8 sps:$4 sm:$0xff]   ;;  %v1647_v32 = vld [vmem:[%s2367_s1 + $0x84] ss:$8 sps:$4 sm:$0xff]   ;;  %v1651_v34 = vld [vmem:[%s2367_s1 + $0x80] ss:$8 sps:$4 sm:$0xff]  }
   0xc   :  { %1101 = vmatpush1.bf16.msra.mxu0 %v1616_v11  ;;  %996 = vmatprep.subr.bf16.mxu1 %v1617_v12  ;;  %v1646_v31 = vld [vmem:[%s2367_s1 + $0x270] ss:$8 sps:$4 sm:$0xff]   ;;  %v1649_v33 = vld [vmem:[%s2367_s1 + $0x284] ss:$8 sps:$4 sm:$0xff]   ;;  %v1652_v35 = vld [vmem:[%s2367_s1 + $0x280] ss:$8 sps:$4 sm:$0xff]  }
   0xd   :  { %1102 = vmatprep.subr.bf16.mxu0 %v1619_v13  ;;  %v1653_v36 = vld [vmem:[%s2367_s1 + $0x94] ss:$8 sps:$4 sm:$0xff]   ;;  %v1657_v38 = vld [vmem:[%s2367_s1 + $0x90] ss:$8 sps:$4 sm:$0xff]   ;;  %v1659_v40 = vld [vmem:[%s2367_s1 + $0xa4] ss:$8 sps:$4 sm:$0xff]  }
   0xe   :  { %v1655_v37 = vld [vmem:[%s2367_s1 + $0x294] ss:$8 sps:$4 sm:$0xff]   ;;  %v1658_v39 = vld [vmem:[%s2367_s1 + $0x290] ss:$8 sps:$4 sm:$0xff]   ;;  %v1661_v41 = vld [vmem:[%s2367_s1 + $0x2a4] ss:$8 sps:$4 sm:$0xff]  }
   0xf   :  { %997 = vmatpush1.bf16.msra.mxu1 %v1621_v14  ;;  %v1663_v42 = vld [vmem:[%s2367_s1 + $0xa0] ss:$8 sps:$4 sm:$0xff]   ;;  %v1665_v44 = vld [vmem:[%s2367_s1 + $0xb4] ss:$8 sps:$4 sm:$0xff]   ;;  %v1669_v46 = vld [vmem:[%s2367_s1 + $0xb0] ss:$8 sps:$4 sm:$0xff]  }
  0x10   :  { %1103 = vmatpush1.bf16.msra.mxu0 %v1622_v15  ;;  %998 = vmatprep.subr.bf16.mxu1 %v1623_v16  ;;  %v1664_v43 = vld [vmem:[%s2367_s1 + $0x2a0] ss:$8 sps:$4 sm:$0xff]   ;;  %v1667_v45 = vld [vmem:[%s2367_s1 + $0x2b4] ss:$8 sps:$4 sm:$0xff]   ;;  %v1670_v47 = vld [vmem:[%s2367_s1 + $0x2b0] ss:$8 sps:$4 sm:$0xff]  }
  0x11   :  { %1104 = vmatprep.subr.bf16.mxu0 %v1625_v17  ;;  %v1697_v48 = vld [vmem:[%s2368_s0 + $0x4] ss:$36 sps:$4 sm:$0xff]   ;;  %v1703_v51 = vld [vmem:[%s2368_s0 + $0x14] ss:$36 sps:$4 sm:$0xff]  }
  0x12   :  { %v1671_v49 = vld [vmem:[%s2367_s1 + $0xc4] ss:$8 sps:$4 sm:$0xff]   ;;  %1022 = vmatprep.mubr.bf16.mxu1 %v1697_v48  ;;  %v1675_v52 = vld [vmem:[%s2367_s1 + $0xc0] ss:$8 sps:$4 sm:$0xff]   ;;  %v1677_v54 = vld [vmem:[%s2367_s1 + $0xd4] ss:$8 sps:$4 sm:$0xff]   ;;  %1128 = vmatprep.mubr.bf16.mxu0 %v1703_v51 }
  0x13   :  { %999 = vmatpush1.bf16.msra.mxu1 %v1627_v18  ;;  %v1673_v50 = vld [vmem:[%s2367_s1 + $0x2c4] ss:$8 sps:$4 sm:$0xff]   ;;  %v1676_v53 = vld [vmem:[%s2367_s1 + $0x2c0] ss:$8 sps:$4 sm:$0xff]   ;;  %v1679_v55 = vld [vmem:[%s2367_s1 + $0x2d4] ss:$8 sps:$4 sm:$0xff]  }
  0x14   :  { %1105 = vmatpush1.bf16.msra.mxu0 %v1628_v19  ;;  %1000 = vmatprep.subr.bf16.mxu1 %v1629_v20  ;;  %v1681_v56 = vld [vmem:[%s2367_s1 + $0xd0] ss:$8 sps:$4 sm:$0xff]   ;;  %v1683_v58 = vld [vmem:[%s2367_s1 + $0xe4] ss:$8 sps:$4 sm:$0xff]   ;;  %v1687_v60 = vld [vmem:[%s2367_s1 + $0xe0] ss:$8 sps:$4 sm:$0xff]  }
  0x15   :  { %1106 = vmatprep.subr.bf16.mxu0 %v1631_v21  ;;  %v1682_v57 = vld [vmem:[%s2367_s1 + $0x2d0] ss:$8 sps:$4 sm:$0xff]   ;;  %v1685_v59 = vld [vmem:[%s2367_s1 + $0x2e4] ss:$8 sps:$4 sm:$0xff]   ;;  %v1688_v61 = vld [vmem:[%s2367_s1 + $0x2e0] ss:$8 sps:$4 sm:$0xff]  }
  0x16   :  { %v1689_v62 = vld [vmem:[%s2367_s1 + $0xf4] ss:$8 sps:$4 sm:$0xff]   ;;  %v1693_v0 = vld [vmem:[%s2367_s1 + $0xf0] ss:$8 sps:$4 sm:$0xff]   ;;  %v1700_v2 = vld [vmem:[%s2367_s1 + $0x104] ss:$8 sps:$4 sm:$0xff]  }
  0x17   :  { %1001 = vmatpush1.bf16.msra.mxu1 %v1633_v22  ;;  %v1691_v63 = vld [vmem:[%s2367_s1 + $0x2f4] ss:$8 sps:$4 sm:$0xff]   ;;  %v1694_v1 = vld [vmem:[%s2367_s1 + $0x2f0] ss:$8 sps:$4 sm:$0xff]   ;;  %v1706_v3 = vld [vmem:[%s2367_s1 + $0x304] ss:$8 sps:$4 sm:$0xff]  }
  0x18   :  { %1107 = vmatpush1.bf16.msra.mxu0 %v1634_v23  ;;  %1002 = vmatprep.subr.bf16.mxu1 %v1635_v24  ;;  %v1695_v4 = vld [vmem:[%s2368_s0] ss:$36 sps:$4 sm:$0xff]   ;;  %v1701_v6 = vld [vmem:[%s2368_s0 + $0x10] ss:$36 sps:$4 sm:$0xff]  }
  0x19   :  { %1108 = vmatprep.subr.bf16.mxu0 %v1637_v25  ;;  %v1698_v5 = vld [vmem:[%s2367_s1 + $0x100] ss:$8 sps:$4 sm:$0xff]   ;;  %v1709_v8 = vld [vmem:[%s2367_s1 + $0x114] ss:$8 sps:$4 sm:$0xff]   ;;  %v1707_v10 = vld [vmem:[%s2367_s1 + $0x110] ss:$8 sps:$4 sm:$0xff]  }
  0x1a   :  { %v1704_v7 = vld [vmem:[%s2367_s1 + $0x300] ss:$8 sps:$4 sm:$0xff]   ;;  %v1712_v9 = vld [vmem:[%s2367_s1 + $0x314] ss:$8 sps:$4 sm:$0xff]   ;;  %v1710_v11 = vld [vmem:[%s2367_s1 + $0x310] ss:$8 sps:$4 sm:$0xff]  }
  0x1b   :  { %1003 = vmatpush1.bf16.msra.mxu1 %v1639_v26  ;;  %v1715_v12 = vld [vmem:[%s2367_s1 + $0x124] ss:$8 sps:$4 sm:$0xff]   ;;  %v1713_v14 = vld [vmem:[%s2367_s1 + $0x120] ss:$8 sps:$4 sm:$0xff]   ;;  %v1721_v16 = vld [vmem:[%s2367_s1 + $0x134] ss:$8 sps:$4 sm:$0xff]  }
  0x1c   :  { %1109 = vmatpush1.bf16.msra.mxu0 %v1640_v27  ;;  %1004 = vmatprep.subr.bf16.mxu1 %v1641_v28  ;;  %v1718_v13 = vld [vmem:[%s2367_s1 + $0x324] ss:$8 sps:$4 sm:$0xff]   ;;  %v1716_v15 = vld [vmem:[%s2367_s1 + $0x320] ss:$8 sps:$4 sm:$0xff]   ;;  %v1724_v17 = vld [vmem:[%s2367_s1 + $0x334] ss:$8 sps:$4 sm:$0xff]  }
  0x1d   :  { %1110 = vmatprep.subr.bf16.mxu0 %v1643_v29  ;;  %v1719_v18 = vld [vmem:[%s2367_s1 + $0x130] ss:$8 sps:$4 sm:$0xff]   ;;  %v1727_v20 = vld [vmem:[%s2367_s1 + $0x144] ss:$8 sps:$4 sm:$0xff]   ;;  %v1725_v22 = vld [vmem:[%s2367_s1 + $0x140] ss:$8 sps:$4 sm:$0xff]  }
  0x1e   :  { %v1722_v19 = vld [vmem:[%s2367_s1 + $0x330] ss:$8 sps:$4 sm:$0xff]   ;;  %v1730_v21 = vld [vmem:[%s2367_s1 + $0x344] ss:$8 sps:$4 sm:$0xff]   ;;  %v1728_v23 = vld [vmem:[%s2367_s1 + $0x340] ss:$8 sps:$4 sm:$0xff]  }
  0x1f   :  { %1005 = vmatpush1.bf16.msra.mxu1 %v1645_v30  ;;  %v1733_v24 = vld [vmem:[%s2367_s1 + $0x154] ss:$8 sps:$4 sm:$0xff]   ;;  %v1731_v26 = vld [vmem:[%s2367_s1 + $0x150] ss:$8 sps:$4 sm:$0xff]   ;;  %v1739_v28 = vld [vmem:[%s2367_s1 + $0x164] ss:$8 sps:$4 sm:$0xff]  }
  0x20   :  { %1111 = vmatpush1.bf16.msra.mxu0 %v1646_v31  ;;  %1006 = vmatprep.subr.bf16.mxu1 %v1647_v32  ;;  %v1736_v25 = vld [vmem:[%s2367_s1 + $0x354] ss:$8 sps:$4 sm:$0xff]   ;;  %v1734_v27 = vld [vmem:[%s2367_s1 + $0x350] ss:$8 sps:$4 sm:$0xff]   ;;  %v1789_v31 = vld [vmem:[%s2368_s0 + $0x48] ss:$36 sps:$4 sm:$0xff]  }
  0x21   :  { %1112 = vmatprep.subr.bf16.mxu0 %v1649_v33  ;;  %v1785_v29 = vld [vmem:[%s2368_s0 + $0x4c] ss:$36 sps:$4 sm:$0xff]   ;;  %v1787_v30 = vld [vmem:[%s2368_s0 + $0x5c] ss:$36 sps:$4 sm:$0xff]  }
  0x22   :  { %v1742_v32 = vld [vmem:[%s2367_s1 + $0x364] ss:$8 sps:$4 sm:$0xff]   ;;  %v1793_v33 = vld [vmem:[%s2368_s0 + $0x58] ss:$36 sps:$4 sm:$0xff]  }
  0x23   :  { %1007 = vmatpush1.bf16.msra.mxu1 %v1651_v34  ;;  %v1737_v34 = vld [vmem:[%s2367_s1 + $0x160] ss:$8 sps:$4 sm:$0xff]   ;;  %v1755_v48 = vld [vmem:[%s2367_s1 + $0x190] ss:$8 sps:$4 sm:$0xff]   ;;  %v1766_v51 = vld [vmem:[%s2367_s1 + $0x3a4] ss:$8 sps:$4 sm:$0xff]  }
  0x24   :  { %1113 = vmatpush1.bf16.msra.mxu0 %v1652_v35  ;;  %1008 = vmatprep.subr.bf16.mxu1 %v1653_v36  ;;  %v1740_v35 = vld [vmem:[%s2367_s1 + $0x360] ss:$8 sps:$4 sm:$0xff]   ;;  %v1745_v36 = vld [vmem:[%s2367_s1 + $0x174] ss:$8 sps:$4 sm:$0xff]  }
  0x25   :  { %1114 = vmatprep.subr.bf16.mxu0 %v1655_v37  ;;  %v1748_v37 = vld [vmem:[%s2367_s1 + $0x374] ss:$8 sps:$4 sm:$0xff]  }
  0x27   :  { %1009 = vmatpush1.bf16.msra.mxu1 %v1657_v38  ;;  %v1743_v38 = vld [vmem:[%s2367_s1 + $0x170] ss:$8 sps:$4 sm:$0xff]  }
  0x28   :  { %1115 = vmatpush1.bf16.msra.mxu0 %v1658_v39  ;;  %1010 = vmatprep.subr.bf16.mxu1 %v1659_v40  ;;  %v1746_v39 = vld [vmem:[%s2367_s1 + $0x370] ss:$8 sps:$4 sm:$0xff]   ;;  %v1751_v40 = vld [vmem:[%s2367_s1 + $0x184] ss:$8 sps:$4 sm:$0xff]  }
  0x29   :  { %1116 = vmatprep.subr.bf16.mxu0 %v1661_v41  ;;  %v1805_v41 = vld [vmem:[%s2368_s0 + $0xc] ss:$36 sps:$4 sm:$0xff]  }
  0x2b   :  { %1011 = vmatpush1.bf16.msra.mxu1 %v1663_v42  ;;  %v1754_v42 = vld [vmem:[%s2367_s1 + $0x384] ss:$8 sps:$4 sm:$0xff]  }
  0x2c   :  { %1117 = vmatpush1.bf16.msra.mxu0 %v1664_v43  ;;  %1012 = vmatprep.subr.bf16.mxu1 %v1665_v44  ;;  %v1808_v43 = vld [vmem:[%s2368_s0 + $0x1c] ss:$36 sps:$4 sm:$0xff]  }
  0x2d   :  { %1118 = vmatprep.subr.bf16.mxu0 %v1667_v45  ;;  %v1749_v44 = vld [vmem:[%s2367_s1 + $0x180] ss:$8 sps:$4 sm:$0xff]  }
  0x2e   :  { %v1752_v45 = vld [vmem:[%s2367_s1 + $0x380] ss:$8 sps:$4 sm:$0xff]  }
  0x2f   :  { %1013 = vmatpush1.bf16.msra.mxu1 %v1669_v46  ;;  %v1757_v46 = vld [vmem:[%s2367_s1 + $0x194] ss:$8 sps:$4 sm:$0xff]  }
  0x30   :  { %1119 = vmatpush1.bf16.msra.mxu0 %v1670_v47  ;;  %1014 = vmatprep.subr.bf16.mxu1 %v1671_v49  ;;  %v1760_v47 = vld [vmem:[%s2367_s1 + $0x394] ss:$8 sps:$4 sm:$0xff]   ;;  %v1758_v49 = vld [vmem:[%s2367_s1 + $0x390] ss:$8 sps:$4 sm:$0xff]  }
  0x31   :  { %1120 = vmatprep.subr.bf16.mxu0 %v1673_v50  ;;  %v1763_v50 = vld [vmem:[%s2367_s1 + $0x1a4] ss:$8 sps:$4 sm:$0xff]  }
  0x33   :  { %1015 = vmatpush1.bf16.msra.mxu1 %v1675_v52  ;;  %v1761_v52 = vld [vmem:[%s2367_s1 + $0x1a0] ss:$8 sps:$4 sm:$0xff]  }
  0x34   :  { %1121 = vmatpush1.bf16.msra.mxu0 %v1676_v53  ;;  %1016 = vmatprep.subr.bf16.mxu1 %v1677_v54  ;;  %v1764_v53 = vld [vmem:[%s2367_s1 + $0x3a0] ss:$8 sps:$4 sm:$0xff]   ;;  %v1769_v54 = vld [vmem:[%s2367_s1 + $0x1b4] ss:$8 sps:$4 sm:$0xff]  }
  0x35   :  { %1122 = vmatprep.subr.bf16.mxu0 %v1679_v55  ;;  %v1772_v55 = vld [vmem:[%s2367_s1 + $0x3b4] ss:$8 sps:$4 sm:$0xff]  }
  0x37   :  { %1017 = vmatpush1.bf16.msra.mxu1 %v1681_v56  ;;  %v1767_v56 = vld [vmem:[%s2367_s1 + $0x1b0] ss:$8 sps:$4 sm:$0xff]  }
  0x38   :  { %1123 = vmatpush1.bf16.msra.mxu0 %v1682_v57  ;;  %1018 = vmatprep.subr.bf16.mxu1 %v1683_v58  ;;  %v1770_v57 = vld [vmem:[%s2367_s1 + $0x3b0] ss:$8 sps:$4 sm:$0xff]   ;;  %v1775_v58 = vld [vmem:[%s2367_s1 + $0x1c4] ss:$8 sps:$4 sm:$0xff]  }
  0x39   :  { %1124 = vmatprep.subr.bf16.mxu0 %v1685_v59  ;;  %v1778_v59 = vld [vmem:[%s2367_s1 + $0x3c4] ss:$8 sps:$4 sm:$0xff]  }
  0x3b   :  { %1019 = vmatpush1.bf16.msra.mxu1 %v1687_v60  ;;  %v1773_v60 = vld [vmem:[%s2367_s1 + $0x1c0] ss:$8 sps:$4 sm:$0xff]  }
  0x3c   :  { %1125 = vmatpush1.bf16.msra.mxu0 %v1688_v61  ;;  %1020 = vmatprep.subr.bf16.mxu1 %v1689_v62  ;;  %v1776_v61 = vld [vmem:[%s2367_s1 + $0x3c0] ss:$8 sps:$4 sm:$0xff]   ;;  %v1781_v62 = vld [vmem:[%s2367_s1 + $0x1d4] ss:$8 sps:$4 sm:$0xff]  }
  0x3d   :  { %1126 = vmatprep.subr.bf16.mxu0 %v1691_v63  ;;  %v1784_v63 = vld [vmem:[%s2367_s1 + $0x3d4] ss:$8 sps:$4 sm:$0xff]  }
  0x3f   :  { %1021 = vmatpush1.bf16.msra.mxu1 %v1693_v0  ;;  %v1779_v0 = vld [vmem:[%s2367_s1 + $0x1d0] ss:$8 sps:$4 sm:$0xff]  }
  0x40   :  { %1127 = vmatpush1.bf16.msra.mxu0 %v1694_v1  ;;  %1043 = vmatprep.subr.bf16.mxu1 %v1700_v2  ;;  %v1782_v1 = vld [vmem:[%s2367_s1 + $0x3d0] ss:$8 sps:$4 sm:$0xff]   ;;  %v1792_v2 = vld [vmem:[%s2367_s1 + $0x1e4] ss:$8 sps:$4 sm:$0xff]  }
  0x41   :  { %1149 = vmatprep.subr.bf16.mxu0 %v1706_v3  ;;  %v1796_v3 = vld [vmem:[%s2367_s1 + $0x3e4] ss:$8 sps:$4 sm:$0xff]  }
  0x42   :  { %1023 = vmatmul.mubr.bf16.vlgmr.msra.gmra.mrb[0].mxu1 %v1695_v4  ;;  %v1790_v4 = vld [vmem:[%s2367_s1 + $0x1e0] ss:$8 sps:$4 sm:$0xff]  }
  0x43   :  { %1129 = vmatmul.mubr.bf16.vlgmr.msra.gmra.mrb[0].mxu0 %v1701_v6  ;;  %1044 = vmatpush1.bf16.msra.mxu1 %v1698_v5  ;;  %v1794_v5 = vld [vmem:[%s2367_s1 + $0x3e0] ss:$8 sps:$4 sm:$0xff]   ;;  %v1799_v6 = vld [vmem:[%s2367_s1 + $0x1f4] ss:$8 sps:$4 sm:$0xff]  }
  0x44   :  { %1150 = vmatpush1.bf16.msra.mxu0 %v1704_v7  ;;  %1045 = vmatprep.subr.bf16.mxu1 %v1709_v8  ;;  %v1802_v7 = vld [vmem:[%s2367_s1 + $0x3f4] ss:$8 sps:$4 sm:$0xff]   ;;  %v1797_v8 = vld [vmem:[%s2367_s1 + $0x1f0] ss:$8 sps:$4 sm:$0xff]  }
  0x45   :  { %1151 = vmatprep.subr.bf16.mxu0 %v1712_v9  ;;  %1032 = vmatprep.mubr.bf16.mxu1 %v1785_v29  ;;  %v1800_v9 = vld [vmem:[%s2367_s1 + $0x3f0] ss:$8 sps:$4 sm:$0xff]   ;;  %v1835_v29 = vld [vmem:[%s2367_s1 + $0x464] ss:$8 sps:$4 sm:$0xff]  }
  0x46   :  { %1138 = vmatprep.mubr.bf16.mxu0 %v1787_v30  ;;  %v1833_v30 = vld [vmem:[%s2367_s1 + $0x460] ss:$8 sps:$4 sm:$0xff]  }
  0x47   :  { %1046 = vmatpush1.bf16.msra.mxu1 %v1707_v10  ;;  %v1811_v10 = vld [vmem:[%s2367_s1 + $0x404] ss:$8 sps:$4 sm:$0xff]  }
  0x48   :  { %1152 = vmatpush1.bf16.msra.mxu0 %v1710_v11  ;;  %1047 = vmatprep.subr.bf16.mxu1 %v1715_v12  ;;  %v1803_v11 = vld [vmem:[%s2368_s0 + $0x8] ss:$36 sps:$4 sm:$0xff]   ;;  %v1806_v12 = vld [vmem:[%s2368_s0 + $0x18] ss:$36 sps:$4 sm:$0xff]  }
  0x49   :  { %1153 = vmatprep.subr.bf16.mxu0 %v1718_v13  ;;  %v1809_v13 = vld [vmem:[%s2367_s1 + $0x400] ss:$8 sps:$4 sm:$0xff]  }
  0x4a   :  { %1033 = vmatmul.mubr.bf16.gmra.mrb[4].mxu1 %v1789_v31  ;;  %v1838_v31 = vld [vmem:[%s2367_s1 + $0x474] ss:$8 sps:$4 sm:$0xff]  }
  0x4b   :  { %1048 = vmatpush1.bf16.msra.mxu1 %v1713_v14  ;;  %1139 = vmatmul.mubr.bf16.gmra.mrb[4].mxu0 %v1793_v33  ;;  %v1814_v14 = vld [vmem:[%s2367_s1 + $0x414] ss:$8 sps:$4 sm:$0xff]   ;;  %v1839_v33 = vld [vmem:[%s2368_s0 + $0x20] ss:$36 sps:$4 sm:$0xff]  }
  0x4c   :  { %1154 = vmatpush1.bf16.msra.mxu0 %v1716_v15  ;;  %1049 = vmatprep.subr.bf16.mxu1 %v1721_v16  ;;  %v1815_v15 = vld [vmem:[%s2368_s0 + $0x54] ss:$36 sps:$4 sm:$0xff]   ;;  %v1817_v16 = vld [vmem:[%s2368_s0 + $0x64] ss:$36 sps:$4 sm:$0xff]  }
  0x4d   :  { %1155 = vmatprep.subr.bf16.mxu0 %v1724_v17  ;;  %1075 = vmatprep.mubr.bf16.mxu1 %v1805_v41  ;;  %v1812_v17 = vld [vmem:[%s2367_s1 + $0x410] ss:$8 sps:$4 sm:$0xff]  }
  0x4e   :  { %1181 = vmatprep.mubr.bf16.mxu0 %v1808_v43 }
  0x4f   :  { %1050 = vmatpush1.bf16.msra.mxu1 %v1719_v18  ;;  %v1823_v18 = vld [vmem:[%s2367_s1 + $0x424] ss:$8 sps:$4 sm:$0xff]  }
  0x50   :  { %1156 = vmatpush1.bf16.msra.mxu0 %v1722_v19  ;;  %1051 = vmatprep.subr.bf16.mxu1 %v1727_v20  ;;  %v1819_v19 = vld [vmem:[%s2368_s0 + $0x50] ss:$36 sps:$4 sm:$0xff]   ;;  %v1820_v20 = vld [vmem:[%s2368_s0 + $0x60] ss:$36 sps:$4 sm:$0xff]  }
  0x51   :  { %1157 = vmatprep.subr.bf16.mxu0 %v1730_v21  ;;  %v1821_v21 = vld [vmem:[%s2367_s1 + $0x420] ss:$8 sps:$4 sm:$0xff]  }
  0x53   :  { %1052 = vmatpush1.bf16.msra.mxu1 %v1725_v22  ;;  %v1826_v22 = vld [vmem:[%s2367_s1 + $0x434] ss:$8 sps:$4 sm:$0xff]  }
  0x54   :  { %1158 = vmatpush1.bf16.msra.mxu0 %v1728_v23  ;;  %1053 = vmatprep.subr.bf16.mxu1 %v1733_v24  ;;  %v1824_v23 = vld [vmem:[%s2367_s1 + $0x430] ss:$8 sps:$4 sm:$0xff]   ;;  %v1829_v24 = vld [vmem:[%s2367_s1 + $0x444] ss:$8 sps:$4 sm:$0xff]  }
  0x55   :  { %1159 = vmatprep.subr.bf16.mxu0 %v1736_v25  ;;  %v1841_v25 = vmov 0  }
  0x57   :  { %1054 = vmatpush1.bf16.msra.mxu1 %v1731_v26  ;;  %v1827_v26 = vld [vmem:[%s2367_s1 + $0x440] ss:$8 sps:$4 sm:$0xff]  }
  0x58   :  { %1160 = vmatpush1.bf16.msra.mxu0 %v1734_v27  ;;  %1055 = vmatprep.subr.bf16.mxu1 %v1739_v28  ;;  %v1832_v27 = vld [vmem:[%s2367_s1 + $0x454] ss:$8 sps:$4 sm:$0xff]   ;;  %v1830_v28 = vld [vmem:[%s2367_s1 + $0x450] ss:$8 sps:$4 sm:$0xff]  }
  0x59   :  { %1161 = vmatprep.subr.bf16.mxu0 %v1742_v32  ;;  %v1836_v32 = vld [vmem:[%s2367_s1 + $0x470] ss:$8 sps:$4 sm:$0xff]  }
  0x5b   :  { %1056 = vmatpush1.bf16.msra.mxu1 %v1737_v34  ;;  %v1840_v34 = vld [vmem:[%s2368_s0 + $0x68] ss:$36 sps:$4 sm:$0xff]  }
  0x5c   :  { %1162 = vmatpush1.bf16.msra.mxu0 %v1740_v35  ;;  %1057 = vmatprep.subr.bf16.mxu1 %v1745_v36 }
  0x5d   :  { %1163 = vmatprep.subr.bf16.mxu0 %v1748_v37 }
  0x5f   :  { %1058 = vmatpush1.bf16.msra.mxu1 %v1743_v38 }
  0x60   :  { %1164 = vmatpush1.bf16.msra.mxu0 %v1746_v39  ;;  %1059 = vmatprep.subr.bf16.mxu1 %v1751_v40 }
  0x61   :  { %1165 = vmatprep.subr.bf16.mxu0 %v1754_v42 }
  0x63   :  { %1060 = vmatpush1.bf16.msra.mxu1 %v1749_v44 }
  0x64   :  { %1166 = vmatpush1.bf16.msra.mxu0 %v1752_v45  ;;  %1061 = vmatprep.subr.bf16.mxu1 %v1757_v46 }
  0x65   :  { %1167 = vmatprep.subr.bf16.mxu0 %v1760_v47 }
  0x67   :  { %1062 = vmatpush1.bf16.msra.mxu1 %v1755_v48 }
  0x68   :  { %1168 = vmatpush1.bf16.msra.mxu0 %v1758_v49  ;;  %1063 = vmatprep.subr.bf16.mxu1 %v1763_v50 }
  0x69   :  { %1169 = vmatprep.subr.bf16.mxu0 %v1766_v51 }
  0x6b   :  { %1064 = vmatpush1.bf16.msra.mxu1 %v1761_v52 }
  0x6c   :  { %1170 = vmatpush1.bf16.msra.mxu0 %v1764_v53  ;;  %1065 = vmatprep.subr.bf16.mxu1 %v1769_v54 }
  0x6d   :  { %1171 = vmatprep.subr.bf16.mxu0 %v1772_v55 }
  0x6f   :  { %1066 = vmatpush1.bf16.msra.mxu1 %v1767_v56 }
  0x70   :  { %1172 = vmatpush1.bf16.msra.mxu0 %v1770_v57  ;;  %1067 = vmatprep.subr.bf16.mxu1 %v1775_v58 }
  0x71   :  { %1173 = vmatprep.subr.bf16.mxu0 %v1778_v59 }
  0x73   :  { %1068 = vmatpush1.bf16.msra.mxu1 %v1773_v60 }
  0x74   :  { %1174 = vmatpush1.bf16.msra.mxu0 %v1776_v61  ;;  %1069 = vmatprep.subr.bf16.mxu1 %v1781_v62 }
  0x75   :  { %1175 = vmatprep.subr.bf16.mxu0 %v1784_v63 }
  0x77   :  { %1070 = vmatpush1.bf16.msra.mxu1 %v1779_v0 }
  0x78   :  { %1176 = vmatpush1.bf16.msra.mxu0 %v1782_v1  ;;  %1071 = vmatprep.subr.bf16.mxu1 %v1792_v2 }
  0x79   :  { %1177 = vmatprep.subr.bf16.mxu0 %v1796_v3 }
  0x7b   :  { %1072 = vmatpush1.bf16.msra.mxu1 %v1790_v4 }
  0x7c   :  { %1178 = vmatpush1.bf16.msra.mxu0 %v1794_v5  ;;  %1073 = vmatprep.subr.bf16.mxu1 %v1799_v6 }
  0x7d   :  { %1179 = vmatprep.subr.bf16.mxu0 %v1802_v7 }
  0x7f   :  { %1074 = vmatpush1.bf16.msra.mxu1 %v1797_v8 }
  0x80   :  { %1180 = vmatpush1.bf16.msra.mxu0 %v1800_v9  ;;  %1549 = vmatprep.subr.bf16.mxu1 %v1811_v10 }
  0x81   :  { %1202 = vmatprep.subr.bf16.mxu0 %v1811_v10 }
  0x82   :  { %1076 = vmatmul.mubr.bf16.vlgmr.msra.gmra.mrb[0].mxu1 %v1803_v11 }
  0x83   :  { %1182 = vmatmul.mubr.bf16.vlgmr.msra.gmra.mrb[0].mxu0 %v1806_v12  ;;  %1557 = vmatpush1.bf16.msra.mxu1 %v1809_v13 }
  0x84   :  { %1203 = vmatpush1.bf16.msra.mxu0 %v1809_v13  ;;  %1550 = vmatprep.subr.bf16.mxu1 %v1814_v14 }
  0x85   :  { %1204 = vmatprep.subr.bf16.mxu0 %v1814_v14  ;;  %1085 = vmatprep.mubr.bf16.mxu1 %v1815_v15 }
  0x86   :  { %1191 = vmatprep.mubr.bf16.mxu0 %v1817_v16 }
  0x87   :  { %1558 = vmatpush1.bf16.msra.mxu1 %v1812_v17 }
  0x88   :  { %1205 = vmatpush1.bf16.msra.mxu0 %v1812_v17  ;;  %1551 = vmatprep.subr.bf16.mxu1 %v1823_v18 }
  0x89   :  { %1206 = vmatprep.subr.bf16.mxu0 %v1823_v18 }
  0x8a   :  { %1086 = vmatmul.mubr.bf16.gmra.mrb[4].mxu1 %v1819_v19 }
  0x8b   :  { %1192 = vmatmul.mubr.bf16.gmra.mrb[4].mxu0 %v1820_v20  ;;  %1559 = vmatpush1.bf16.msra.mxu1 %v1821_v21 }
  0x8c   :  { %1207 = vmatpush1.bf16.msra.mxu0 %v1821_v21  ;;  %1552 = vmatprep.subr.bf16.mxu1 %v1826_v22 }
  0x8d   :  { %1208 = vmatprep.subr.bf16.mxu0 %v1826_v22  ;;  %1234 = vmatprep.mubr.bf16.mxu0 %v1841_v25 }
  0x8e   :  { %1244 = vmatprep.mubr.bf16.mxu1 %v1841_v25 }
  0x8f   :  { %1560 = vmatpush1.bf16.msra.mxu1 %v1824_v23 }
  0x90   :  { %1209 = vmatpush1.bf16.msra.mxu0 %v1824_v23  ;;  %1553 = vmatprep.subr.bf16.mxu1 %v1829_v24 }
  0x91   :  { %1210 = vmatprep.subr.bf16.mxu0 %v1829_v24 }
  0x93   :  { %1561 = vmatpush1.bf16.msra.mxu1 %v1827_v26 }
  0x94   :  { %1211 = vmatpush1.bf16.msra.mxu0 %v1827_v26  ;;  %1554 = vmatprep.subr.bf16.mxu1 %v1832_v27 }
  0x95   :  { %1212 = vmatprep.subr.bf16.mxu0 %v1832_v27 }
  0x97   :  { %1562 = vmatpush1.bf16.msra.mxu1 %v1830_v28 }
  0x98   :  { %1213 = vmatpush1.bf16.msra.mxu0 %v1830_v28  ;;  %1555 = vmatprep.subr.bf16.mxu1 %v1835_v29 }
  0x99   :  { %1214 = vmatprep.subr.bf16.mxu0 %v1835_v29 }
  0x9b   :  { %1563 = vmatpush1.bf16.msra.mxu1 %v1833_v30 }
  0x9c   :  { %1215 = vmatpush1.bf16.msra.mxu0 %v1833_v30  ;;  %1556 = vmatprep.subr.bf16.mxu1 %v1838_v31  ;;  %v1842_v30 = vmov 1966171168  }
  0x9d   :  { %1216 = vmatprep.subr.bf16.mxu0 %v1838_v31  ;;  %v1305_v31 = vunpack.c.l.s4 %v1842_v30 }
  0x9f   :  { %1564 = vmatpush1.bf16.msra.mxu1 %v1836_v32 }
  0xa0   :  { %1217 = vmatpush1.bf16.msra.mxu0 %v1836_v32 }
  0xa2   :  { %1245 = vmatmul.mubr.bf16.vlgmr.msra.gmra.mrb[8].mxu1 %v1840_v34 }
  0xa3   :  { %1235 = vmatmul.mubr.bf16.vlgmr.msra.gmra.mrb[0].mxu0 %v1839_v33 }
 0x155   :  { %v1077_v35 = vpop.f32.mrb[0].mxu1 }
 0x156   :  { %v1079_v36 = vpop.f32.mrb[1].mxu1 }
 0x157   :  { %v1081_v37 = vpop.f32.mrb[2].mxu1 }
 0x158   :  { %v1083_v38 = vpop.f32.mrb[3].mxu1 }
 0x15d   :  { %v1087_v39 = vpop.f32.mrb[4].mxu1 }
 0x15e   :  { %v1193_v40 = vpop.f32.mrb[4].mxu0  ;;  %v1089_v42 = vpop.f32.mrb[5].mxu1 }
 0x15f   :  { %v1569_v41 = vadd.f32 %v1193_v40, %v1087_v39  ;;  %v1195_v43 = vpop.f32.mrb[5].mxu0  ;;  %v1091_v45 = vpop.f32.mrb[6].mxu1 }
 0x160   :  { %v1571_v44 = vadd.f32 %v1195_v43, %v1089_v42  ;;  %v1197_v46 = vpop.f32.mrb[6].mxu0  ;;  %v1093_v48 = vpop.f32.mrb[7].mxu1 }
 0x161   :  { %v1573_v47 = vadd.f32 %v1197_v46, %v1091_v45  ;;  %v1199_v49 = vpop.f32.mrb[7].mxu0 }
 0x162   :  { %v1575_v50 = vadd.f32 %v1199_v49, %v1093_v48 }
 0x175   :  { %v1246_v52 = vpop.f32.mrb[8].mxu1 }
 0x176   :  { %v1236_v51 = vpop.f32.mrb[0].mxu0  ;;  %v1570_v54 = vadd.f32 %v1569_v41, %v1246_v52  ;;  %v1248_v56 = vpop.f32.mrb[9].mxu1  ;;  %v1306_v41 = vunpack.c.0.s8 %v1305_v31 }
 0x177   :  { %v1565_v53 = vadd.f32 %v1236_v51, %v1077_v35  ;;  %v1238_v55 = vpop.f32.mrb[1].mxu0  ;;  %v1572_v58 = vadd.f32 %v1571_v44, %v1248_v56  ;;  %v1250_v60 = vpop.f32.mrb[10].mxu1 }
 0x178   :  { %v1566_v57 = vadd.f32 %v1238_v55, %v1079_v36  ;;  %v1240_v59 = vpop.f32.mrb[2].mxu0  ;;  %v1574_v62 = vadd.f32 %v1573_v47, %v1250_v60  ;;  %v1252_v0 = vpop.f32.mrb[11].mxu1  ;;  %v1328_v7 = vmul.f32 %v1570_v54, %v1570_v54  ;;  %v1307_v36 = vlaneseq }
 0x179   :  { %v1567_v61 = vadd.f32 %v1240_v59, %v1081_v37  ;;  %v1242_v63 = vpop.f32.mrb[3].mxu0  ;;  %v1547_v2 = vpack.c.bf16 %v1572_v58, %v1570_v54  ;;  %v1324_v3 = vmul.f32 %v1565_v53, %v1565_v53  ;;  %v1576_v8 = vadd.f32 %v1575_v50, %v1252_v0 }
 0x17a   :  { %v1545_v1 = vpack.c.bf16 %v1566_v57, %v1565_v53  ;;  %v1568_v6 = vadd.f32 %v1242_v63, %v1083_v38  ;;  %v1325_v13 = vmul.f32 %v1566_v57, %v1566_v57  ;;  %v1330_v17 = vmul.f32 %v1574_v62, %v1574_v62 }
 0x17b   :  { %v1283_v4 = vadd.f32 %v1567_v61, %v1565_v53  ;;  %v1326_v5 = vmul.f32 %v1567_v61, %v1567_v61  ;;  %1281 = vst [vmem:[%s2369_s2 + $0x10] sm:$0xff] %v1547_v2  ;;  %v1548_v15 = vpack.c.bf16 %v1576_v8, %v1574_v62  ;;  %v1329_v20 = vmul.f32 %v1572_v58, %v1572_v58 }
 0x17c   :  { %1279 = vst [vmem:[%s2369_s2] sm:$0xff] %v1545_v1  ;;  %v1546_v11 = vpack.c.bf16 %v1568_v6, %v1567_v61  ;;  %v1292_v12 = vadd.f32 %v1568_v6, %v1566_v57  ;;  %v1327_v14 = vmul.f32 %v1568_v6, %v1568_v6  ;;  %v1331_v25 = vmul.f32 %v1576_v8, %v1576_v8 }
 0x17d   :  { %v1332_v9 = vadd.f32 %v1326_v5, %v1324_v3  ;;  %v1284_v10 = vadd.f32 %v1570_v54, %v1283_v4  ;;  %1282 = vst [vmem:[%s2369_s2 + $0x18] sm:$0xff] %v1548_v15  ;;  %v1308_v46 = vshrl.u32 %v1307_v36, 7  ;;  %vm1321_vm0 = vcmp.lt.s32.totalorder %v1307_v36, 256 }
 0x17e   :  { %1280 = vst [vmem:[%s2369_s2 + $0x8] sm:$0xff] %v1546_v11  ;;  %v1293_v19 = vadd.f32 %v1572_v58, %v1292_v12  ;;  %v1341_v21 = vadd.f32 %v1327_v14, %v1325_v13 }
 0x17f   :  { %v1285_v16 = vadd.f32 %v1574_v62, %v1284_v10  ;;  %v1333_v18 = vadd.f32 %v1332_v9, %v1328_v7  ;;  %v1309_v53 = vsub.s32 %v1306_v41, %v1308_v46 }
 0x180   :  { %v1294_v24 = vadd.f32 %v1576_v8, %v1293_v19  ;;  %v1342_v26 = vadd.f32 %v1341_v21, %v1329_v20 }
 0x181   :  { %v1286_v22 = vrot.slane %v1285_v16, 4  ;;  %v1334_v23 = vadd.f32 %v1333_v18, %v1330_v17 }
 0x182   :  { %v1295_v29 = vrot.slane %v1294_v24, 4  ;;  %v1343_v32 = vadd.f32 %v1342_v26, %v1331_v25 }
 0x183   :  { %v1287_v27 = vadd.f32 %v1286_v22, %v1285_v16  ;;  %v1335_v28 = vrot.slane %v1334_v23, 4 }
 0x184   :  { %v1296_v35 = vadd.f32 %v1295_v29, %v1294_v24  ;;  %v1344_v37 = vrot.slane %v1343_v32, 4 }
 0x185   :  { %v1288_v33 = vrot.slane %v1287_v27, 2  ;;  %v1336_v34 = vadd.f32 %v1335_v28, %v1334_v23 }
 0x186   :  { %v1297_v40 = vrot.slane %v1296_v35, 2  ;;  %v1345_v42 = vadd.f32 %v1344_v37, %v1343_v32 }
 0x187   :  { %v1289_v38 = vadd.f32 %v1288_v33, %v1287_v27  ;;  %v1337_v39 = vrot.slane %v1336_v34, 2 }
 0x188   :  { %v1298_v45 = vadd.f32 %v1297_v40, %v1296_v35  ;;  %v1346_v47 = vrot.slane %v1345_v42, 2 }
 0x189   :  { %v1290_v43 = vrot.slane %v1289_v38, 1  ;;  %v1338_v44 = vadd.f32 %v1337_v39, %v1336_v34 }
 0x18a   :  { %v1299_v50 = vrot.slane %v1298_v45, 1  ;;  %v1347_v51 = vadd.f32 %v1346_v47, %v1345_v42 }
 0x18b   :  { %v1291_v48 = vadd.f32 %v1290_v43, %v1289_v38  ;;  %v1339_v49 = vrot.slane %v1338_v44, 1 }
 0x18c   :  { %v1300_v52 = vadd.f32 %v1299_v50, %v1298_v45  ;;  %v1348_v55 = vrot.slane %v1347_v51, 1 }
 0x18d   :  { %v1340_v54 = vadd.f32 %v1339_v49, %v1338_v44 }
 0x18e   :  { %v1303_v56 = vcombine.low %v1291_v48, %v1300_v52  ;;  %v1349_v57 = vadd.f32 %v1348_v55, %v1347_v51 }
 0x190   :  { %v1310_v58 = vrot.slane %v1303_v56, %v1309_v53  ;;  %v1352_v59 = vcombine.low %v1340_v54, %v1349_v57 }
 0x192   :  { %v1317_v60 = vrot.slane %v1310_v58, %v1309_v53  ;;  %v1359_v61 = vrot.slane %v1352_v59, %v1309_v53 }
 0x194   :  { %1323 = vst.msk [vmem:[%s2370_s3] ss:$2 sm:$0x3] %vm1321_vm0, %v1317_v60  ;;  %v1366_v62 = vrot.slane %v1359_v61, %v1309_v53 }
 0x196   :  { %1544 = vst.msk [vmem:[%s2370_s3 + $0x1] ss:$2 sm:$0x3] %vm1321_vm0, %v1366_v62 }

// kernel: patch_encoder_forward.9
= control target key start
LH: loop header
LB: loop body
LE: loop exit
PB: predicated region body
PF: predicated region fallthrough
CT: control target
= control target key end

     0   :  { %v43_v32 = vlaneseq  ;;  %s1204_s0 = inlined_call_operand.vmem [shape: bf16[8,1,512], index: 0, kind: input, shape index: {}]   ;;  %s1205_s1 = inlined_call_operand.vmem [shape: f32[1,1,512], index: 1, kind: input, shape index: {}]   ;;  %s1206_s2 = inlined_call_operand.vmem [shape: f32[1,1,512], index: 2, kind: input, shape index: {}]   ;;  %s1207_s3 = inlined_call_operand.vmem [shape: bf16[512,128], index: 3, kind: input, shape index: {}]   ;;  %s1208_s4 = inlined_call_operand.vmem [shape: f32[1,128], index: 4, kind: input, shape index: {}]   ;;  %s1209_s5 = inlined_call_operand.hbm [shape: f32[8,128], index: 5, kind: output, shape index: {}]  }
   0x1   :  { %v881_v0 = vld [vmem:[%s1207_s3 + $0x40] sm:$0xff]   ;;  %v885_v4 = vld [vmem:[%s1207_s3 + $0x48] sm:$0xff]   ;;  %v889_v8 = vld [vmem:[%s1207_s3 + $0x50] sm:$0xff]  }
   0x2   :  { %v882_v1 = vld [vmem:[%s1207_s3 + $0xc0] sm:$0xff]   ;;  %835 = vmatprep.subr.bf16.mxu0 %v881_v0  ;;  %v886_v5 = vld [vmem:[%s1207_s3 + $0xc8] sm:$0xff]   ;;  %v890_v9 = vld [vmem:[%s1207_s3 + $0xd0] sm:$0xff]  }
   0x3   :  { %v883_v2 = vld [vmem:[%s1207_s3] sm:$0xff]   ;;  %857 = vmatprep.subr.bf16.mxu1 %v882_v1  ;;  %v887_v6 = vld [vmem:[%s1207_s3 + $0x8] sm:$0xff]   ;;  %v891_v10 = vld [vmem:[%s1207_s3 + $0x10] sm:$0xff]  }
   0x4   :  { %v884_v3 = vld [vmem:[%s1207_s3 + $0x80] sm:$0xff]   ;;  %836 = vmatpush3.bf16.msra.mxu0 %v883_v2  ;;  %v888_v7 = vld [vmem:[%s1207_s3 + $0x88] sm:$0xff]   ;;  %v892_v11 = vld [vmem:[%s1207_s3 + $0x90] sm:$0xff]  }
   0x5   :  { %858 = vmatpush3.bf16.msra.mxu1 %v884_v3  ;;  %837 = vmatprep.subr.bf16.mxu0 %v885_v4  ;;  %v893_v12 = vld [vmem:[%s1207_s3 + $0x58] sm:$0xff]   ;;  %v897_v16 = vld [vmem:[%s1207_s3 + $0x60] sm:$0xff]   ;;  %v901_v20 = vld [vmem:[%s1207_s3 + $0x68] sm:$0xff]  }
   0x6   :  { %859 = vmatprep.subr.bf16.mxu1 %v886_v5  ;;  %v894_v13 = vld [vmem:[%s1207_s3 + $0xd8] sm:$0xff]   ;;  %v898_v17 = vld [vmem:[%s1207_s3 + $0xe0] sm:$0xff]   ;;  %v902_v21 = vld [vmem:[%s1207_s3 + $0xe8] sm:$0xff]  }
   0x7   :  { %v895_v14 = vld [vmem:[%s1207_s3 + $0x18] sm:$0xff]   ;;  %v899_v18 = vld [vmem:[%s1207_s3 + $0x20] sm:$0xff]   ;;  %v903_v22 = vld [vmem:[%s1207_s3 + $0x28] sm:$0xff]  }
   0x8   :  { %838 = vmatpush3.bf16.msra.mxu0 %v887_v6  ;;  %v896_v15 = vld [vmem:[%s1207_s3 + $0x98] sm:$0xff]   ;;  %v900_v19 = vld [vmem:[%s1207_s3 + $0xa0] sm:$0xff]   ;;  %v904_v23 = vld [vmem:[%s1207_s3 + $0xa8] sm:$0xff]  }
   0x9   :  { %860 = vmatpush3.bf16.msra.mxu1 %v888_v7  ;;  %839 = vmatprep.subr.bf16.mxu0 %v889_v8  ;;  %v905_v24 = vld [vmem:[%s1207_s3 + $0x70] sm:$0xff]   ;;  %v909_v28 = vld [vmem:[%s1207_s3 + $0x78] sm:$0xff]  }
   0xa   :  { %861 = vmatprep.subr.bf16.mxu1 %v890_v9  ;;  %v906_v25 = vld [vmem:[%s1207_s3 + $0xf0] sm:$0xff]   ;;  %v910_v29 = vld [vmem:[%s1207_s3 + $0xf8] sm:$0xff]  }
   0xb   :  { %v907_v26 = vld [vmem:[%s1207_s3 + $0x30] sm:$0xff]   ;;  %v911_v30 = vld [vmem:[%s1207_s3 + $0x38] sm:$0xff]  }
   0xc   :  { %840 = vmatpush3.bf16.msra.mxu0 %v891_v10  ;;  %v908_v27 = vld [vmem:[%s1207_s3 + $0xb0] sm:$0xff]   ;;  %v912_v31 = vld [vmem:[%s1207_s3 + $0xb8] sm:$0xff]  }
   0xd   :  { %862 = vmatpush3.bf16.msra.mxu1 %v892_v11  ;;  %841 = vmatprep.subr.bf16.mxu0 %v893_v12 }
   0xe   :  { %863 = vmatprep.subr.bf16.mxu1 %v894_v13 }
  0x10   :  { %842 = vmatpush3.bf16.msra.mxu0 %v895_v14 }
  0x11   :  { %864 = vmatpush3.bf16.msra.mxu1 %v896_v15  ;;  %843 = vmatprep.subr.bf16.mxu0 %v897_v16 }
  0x12   :  { %865 = vmatprep.subr.bf16.mxu1 %v898_v17 }
  0x14   :  { %844 = vmatpush3.bf16.msra.mxu0 %v899_v18 }
  0x15   :  { %866 = vmatpush3.bf16.msra.mxu1 %v900_v19  ;;  %845 = vmatprep.subr.bf16.mxu0 %v901_v20 }
  0x16   :  { %867 = vmatprep.subr.bf16.mxu1 %v902_v21 }
  0x18   :  { %846 = vmatpush3.bf16.msra.mxu0 %v903_v22 }
  0x19   :  { %868 = vmatpush3.bf16.msra.mxu1 %v904_v23  ;;  %847 = vmatprep.subr.bf16.mxu0 %v905_v24 }
  0x1a   :  { %869 = vmatprep.subr.bf16.mxu1 %v906_v25 }
  0x1c   :  { %848 = vmatpush3.bf16.msra.mxu0 %v907_v26 }
  0x1d   :  { %870 = vmatpush3.bf16.msra.mxu1 %v908_v27  ;;  %849 = vmatprep.subr.bf16.mxu0 %v909_v28 }
  0x1e   :  { %871 = vmatprep.subr.bf16.mxu1 %v910_v29 }
  0x20   :  { %850 = vmatpush3.bf16.msra.mxu0 %v911_v30 }
  0x21   :  { %872 = vmatpush3.bf16.msra.mxu1 %v912_v31 }
  0x22   :  { %10 = vsyncpa [#allocation3], 0  ;;  %v937_v33 = vmov 857870592   ;;  %v44_v35 = vshrl.u32 %v43_v32, 7  ;;  %v817_v36 = vld [vmem:[%s1204_s0] sm:$0xff]  }
  0x23   :  { %v41_v34 = vunpack.c.l.s4 %v937_v33  ;;  %v832_v37 = vld [vmem:[%s1204_s0 + $0x8] sm:$0xff]   ;;  %v833_v38 = vld [vmem:[%s1204_s0 + $0x10] sm:$0xff]   ;;  %v834_v39 = vld [vmem:[%s1204_s0 + $0x18] sm:$0xff]   ;;  %v818_v41 = vunpack.c.l.bf16 %v817_v36  ;;  %v819_v44 = vunpack.c.h.bf16 %v817_v36  ;;  %vm426_vm0 = vcmask 1041409  }
  0x24   :  { %v38_v42 = vld [vmem:[%s1205_s1] sm:$0xf]  ;;  %v822_v45 = vunpack.c.l.bf16 %v832_v37  ;;  %v823_v46 = vunpack.c.h.bf16 %v832_v37  ;;  %v826_v48 = vunpack.c.l.bf16 %v833_v38  ;;  %v827_v49 = vunpack.c.h.bf16 %v833_v38 }
  0x25   :  { %v42_v40 = vunpack.c.0.s8 %v41_v34  ;;  %v56_v43 = vld [vmem:[%s1206_s2] sm:$0xf]  ;;  %v830_v50 = vunpack.c.l.bf16 %v834_v39  ;;  %v831_v51 = vunpack.c.h.bf16 %v834_v39  ;;  %v104_v54 = vsub.s32 2, %v44_v35  ;;  %s938_s2 = smov [#allocation2]  }
  0x26   :  { %v1083_v55 = vsub.s32 6, %v44_v35  ;;  %v1085_v56 = vsub.s32 0, %v44_v35  ;;  %v1087_v57 = vsub.s32 4, %v44_v35  ;;  %vm429_vm1 = vcmask 1042434   ;;  %s775_s18 = sshll.u32 %s938_s2, 4  ;;  %s776_s18 = int_to_ptr.vmem [resolvable:$true] %s775_s18 }
  0x27   :  { %v45_v47 = vsub.s32 %v42_v40, %v44_v35  ;;  %vm432_vm2 = vcmask 1043459   ;;  %vm435_vm3 = vcmask 1044484   ;;  %vm438_vm4 = vcmask 1045509   ;;  %s913_s19 = scalar_lea.vmem %s776_s18, 128  ;;  %p918_p1 = scmp.lt.s32.totalorder %s776_s18, %s776_s18 }
  0x28   :  { %vm441_vm5 = vcmask 1046534   ;;  %vm444_vm6 = vcmask 1047559   ;;  %p914_p0 = scmp.ne.s32.totalorder %s776_s18, %s913_s19  ;;  %p919_p2 = scmp.lt.s32.totalorder %s913_s19, %s913_s19 }
  0x29   :  { %v46_v52 = vrot.slane %v38_v42, %v45_v47  ;;  %v64_v53 = vrot.slane %v56_v43, %v45_v47 }
  0x2a   :  { %p920_p3 = por %p919_p2, %p918_p1 }
  0x2b   :  { %v48_v58 = vmul.f32 %v818_v41, %v46_v52  ;;  %v49_v59 = vmul.f32 %v819_v44, %v46_v52  ;;  %v50_v60 = vmul.f32 %v822_v45, %v46_v52  ;;  %v51_v61 = vmul.f32 %v823_v46, %v46_v52 }
  0x2c   :  { %v52_v62 = vmul.f32 %v826_v48, %v46_v52  ;;  %v53_v63 = vmul.f32 %v827_v49, %v46_v52  ;;  %v54_v0 = vmul.f32 %v830_v50, %v46_v52  ;;  %v55_v1 = vmul.f32 %v831_v51, %v46_v52  ;;  %p921_p4 = pnand %p920_p3, %p914_p0 }
  0x2d   :  { %v66_v2 = vadd.f32 %v64_v53, %v48_v58  ;;  %v67_v3 = vadd.f32 %v64_v53, %v49_v59  ;;  %v68_v4 = vadd.f32 %v64_v53, %v50_v60  ;;  %v69_v5 = vadd.f32 %v64_v53, %v51_v61 }
  0x2e   :  { %v70_v6 = vadd.f32 %v64_v53, %v52_v62  ;;  %v71_v7 = vadd.f32 %v64_v53, %v53_v63  ;;  %v72_v8 = vadd.f32 %v64_v53, %v54_v0  ;;  %v73_v9 = vadd.f32 %v64_v53, %v55_v1 }
  0x2f   :  { %v1089_v10 = vmax.f32 %v66_v2, 0.0  ;;  %v1091_v11 = vmax.f32 %v67_v3, 0.0  ;;  %v1093_v12 = vmax.f32 %v68_v4, 0.0  ;;  %v1095_v13 = vmax.f32 %v69_v5, 0.0 }
  0x30   :  { %v1097_v14 = vmax.f32 %v70_v6, 0.0  ;;  %v1099_v15 = vmax.f32 %v71_v7, 0.0  ;;  %v1101_v16 = vmax.f32 %v72_v8, 0.0  ;;  %v1103_v17 = vmax.f32 %v73_v9, 0.0 }
  0x31   :  { %v105_v18 = vrot.slane %v1089_v10, %v104_v54  ;;  %v121_v19 = vrot.slane %v1091_v11, %v104_v54  ;;  %v137_v20 = vrot.slane %v1093_v12, %v104_v54  ;;  %v153_v21 = vrot.slane %v1095_v13, %v104_v54 }
  0x32   :  { %v169_v22 = vrot.slane %v1097_v14, %v104_v54  ;;  %v185_v23 = vrot.slane %v1099_v15, %v104_v54  ;;  %v201_v24 = vrot.slane %v1101_v16, %v104_v54  ;;  %v217_v25 = vrot.slane %v1103_v17, %v104_v54 }
  0x33   :  { %v259_v26 = vpack.c.bf16 %v105_v18, %v105_v18  ;;  %v263_v27 = vpack.c.bf16 %v121_v19, %v121_v19  ;;  %v267_v28 = vpack.c.bf16 %v137_v20, %v137_v20  ;;  %v271_v29 = vpack.c.bf16 %v153_v21, %v153_v21 }
  0x34   :  { %v275_v30 = vpack.c.bf16 %v169_v22, %v169_v22  ;;  %v279_v31 = vpack.c.bf16 %v185_v23, %v185_v23  ;;  %v283_v32 = vpack.c.bf16 %v201_v24, %v201_v24  ;;  %v287_v33 = vpack.c.bf16 %v217_v25, %v217_v25 }
  0x35   :  { %v394_v34 = vunpack.c.l.b16 %v259_v26  ;;  %v398_v35 = vunpack.c.l.b16 %v263_v27  ;;  %v402_v36 = vunpack.c.l.b16 %v267_v28  ;;  %v406_v37 = vunpack.c.l.b16 %v271_v29 }
  0x36   :  { %v410_v38 = vunpack.c.l.b16 %v275_v30  ;;  %v414_v39 = vunpack.c.l.b16 %v279_v31  ;;  %v418_v40 = vunpack.c.l.b16 %v283_v32  ;;  %v422_v41 = vunpack.c.l.b16 %v287_v33 }
  0x37   :  { %v446_v42 = vrot.slane %v398_v35, 7  ;;  %v448_v43 = vrot.slane %v402_v36, 6  ;;  %v450_v44 = vrot.slane %v406_v37, 5  ;;  %v113_v45 = vrot.slane %v1089_v10, %v1083_v55 }
  0x38   :  { %v452_v46 = vrot.slane %v410_v38, 4  ;;  %v454_v47 = vrot.slane %v414_v39, 3  ;;  %v456_v48 = vrot.slane %v418_v40, 2  ;;  %v458_v49 = vrot.slane %v422_v41, 1 }
  0x39   :  { %v447_v50 = vsel %vm426_vm0, %v446_v42, %v394_v34  ;;  %v129_v51 = vrot.slane %v1091_v11, %v1083_v55  ;;  %v145_v52 = vrot.slane %v1093_v12, %v1083_v55  ;;  %v161_v53 = vrot.slane %v1095_v13, %v1083_v55 }
  0x3a   :  { %v449_v54 = vsel %vm429_vm1, %v448_v43, %v447_v50  ;;  %v177_v58 = vrot.slane %v1097_v14, %v1083_v55  ;;  %v193_v59 = vrot.slane %v1099_v15, %v1083_v55  ;;  %v209_v60 = vrot.slane %v1101_v16, %v1083_v55 }
  0x3b   :  { %v451_v61 = vsel %vm432_vm2, %v450_v44, %v449_v54  ;;  %v225_v62 = vrot.slane %v1103_v17, %v1083_v55  ;;  %v261_v63 = vpack.c.bf16 %v113_v45, %v113_v45  ;;  %v265_v0 = vpack.c.bf16 %v129_v51, %v129_v51 }
  0x3c   :  { %v453_v1 = vsel %vm435_vm3, %v452_v46, %v451_v61  ;;  %v269_v2 = vpack.c.bf16 %v145_v52, %v145_v52  ;;  %v273_v3 = vpack.c.bf16 %v161_v53, %v161_v53  ;;  %v277_v4 = vpack.c.bf16 %v177_v58, %v177_v58 }
  0x3d   :  { %v455_v5 = vsel %vm438_vm4, %v454_v47, %v453_v1  ;;  %v281_v6 = vpack.c.bf16 %v193_v59, %v193_v59  ;;  %v285_v7 = vpack.c.bf16 %v209_v60, %v209_v60  ;;  %v289_v8 = vpack.c.bf16 %v225_v62, %v225_v62 }
  0x3e   :  { %v457_v9 = vsel %vm441_vm5, %v456_v48, %v455_v5  ;;  %v396_v18 = vunpack.c.l.b16 %v261_v63  ;;  %v400_v19 = vunpack.c.l.b16 %v265_v0  ;;  %v404_v20 = vunpack.c.l.b16 %v269_v2 }
  0x3f   :  { %v459_v21 = vsel %vm444_vm6, %v458_v49, %v457_v9  ;;  %v408_v55 = vunpack.c.l.b16 %v273_v3  ;;  %v412_v22 = vunpack.c.l.b16 %v277_v4  ;;  %v416_v23 = vunpack.c.l.b16 %v281_v6 }
  0x40   :  { %v489_v24 = vpack.c.b16 %v459_v21, %v459_v21  ;;  %v420_v25 = vunpack.c.l.b16 %v285_v7  ;;  %v424_v26 = vunpack.c.l.b16 %v289_v8  ;;  %v474_v27 = vrot.slane %v400_v19, 7 }
  0x41   :  { %v476_v28 = vrot.slane %v404_v20, 6  ;;  %v478_v29 = vrot.slane %v408_v55, 5  ;;  %v480_v30 = vrot.slane %v412_v22, 4  ;;  %v482_v31 = vrot.slane %v416_v23, 3 }
  0x42   :  { %720 = vmatprep.mubr.bf16.mxu0 %v489_v24  ;;  %v475_v32 = vsel %vm426_vm0, %v474_v27, %v396_v18  ;;  %v484_v33 = vrot.slane %v420_v25, 2  ;;  %v486_v34 = vrot.slane %v424_v26, 1  ;;  %v101_v35 = vrot.slane %v1089_v10, %v1085_v56 }
  0x43   :  { %v477_v36 = vsel %vm429_vm1, %v476_v28, %v475_v32  ;;  %v117_v37 = vrot.slane %v1091_v11, %v1085_v56  ;;  %v133_v38 = vrot.slane %v1093_v12, %v1085_v56  ;;  %v149_v39 = vrot.slane %v1095_v13, %v1085_v56 }
  0x44   :  { %v479_v40 = vsel %vm432_vm2, %v478_v29, %v477_v36  ;;  %v165_v41 = vrot.slane %v1097_v14, %v1085_v56  ;;  %v181_v42 = vrot.slane %v1099_v15, %v1085_v56  ;;  %v197_v43 = vrot.slane %v1101_v16, %v1085_v56 }
  0x45   :  { %v481_v44 = vsel %vm435_vm3, %v480_v30, %v479_v40  ;;  %v213_v45 = vrot.slane %v1103_v17, %v1085_v56  ;;  %v258_v46 = vpack.c.bf16 %v101_v35, %v101_v35  ;;  %v262_v47 = vpack.c.bf16 %v117_v37, %v117_v37 }
  0x46   :  { %v483_v48 = vsel %vm438_vm4, %v482_v31, %v481_v44  ;;  %v266_v49 = vpack.c.bf16 %v133_v38, %v133_v38  ;;  %v270_v50 = vpack.c.bf16 %v149_v39, %v149_v39  ;;  %v274_v51 = vpack.c.bf16 %v165_v41, %v165_v41 }
  0x47   :  { %v485_v52 = vsel %vm441_vm5, %v484_v33, %v483_v48  ;;  %v278_v53 = vpack.c.bf16 %v181_v42, %v181_v42  ;;  %v282_v54 = vpack.c.bf16 %v197_v43, %v197_v43  ;;  %v286_v58 = vpack.c.bf16 %v213_v45, %v213_v45 }
  0x48   :  { %v487_v59 = vsel %vm444_vm6, %v486_v34, %v485_v52  ;;  %v393_v60 = vunpack.c.l.b16 %v258_v46  ;;  %v397_v61 = vunpack.c.l.b16 %v262_v47  ;;  %v401_v62 = vunpack.c.l.b16 %v266_v49 }
  0x49   :  { %v491_v63 = vpack.c.b16 %v487_v59, %v487_v59  ;;  %v405_v0 = vunpack.c.l.b16 %v270_v50  ;;  %v409_v56 = vunpack.c.l.b16 %v274_v51  ;;  %v413_v1 = vunpack.c.l.b16 %v278_v53 }
  0x4a   :  { %v417_v2 = vunpack.c.l.b16 %v282_v54  ;;  %v421_v3 = vunpack.c.l.b16 %v286_v58  ;;  %v425_v4 = vrot.slane %v397_v61, 7  ;;  %v428_v5 = vrot.slane %v401_v62, 6 }
  0x4b   :  { %760 = vmatprep.mubr.bf16.mxu1 %v491_v63  ;;  %v431_v6 = vrot.slane %v405_v0, 5  ;;  %v434_v7 = vrot.slane %v409_v56, 4  ;;  %v437_v8 = vrot.slane %v413_v1, 3  ;;  %v109_v9 = vrot.slane %v1089_v10, %v1087_v57  ;;  %v783_v0 = vld [vmem:[%s1208_s4] ss:$0 sm:$0xff] }
  0x4c   :  { %v427_v18 = vsel %vm426_vm0, %v425_v4, %v393_v60  ;;  %v440_v19 = vrot.slane %v417_v2, 2  ;;  %v443_v20 = vrot.slane %v421_v3, 1  ;;  %v125_v21 = vrot.slane %v1091_v11, %v1087_v57 }
  0x4d   :  { %v430_v55 = vsel %vm429_vm1, %v428_v5, %v427_v18  ;;  %v141_v22 = vrot.slane %v1093_v12, %v1087_v57  ;;  %v157_v23 = vrot.slane %v1095_v13, %v1087_v57  ;;  %v173_v24 = vrot.slane %v1097_v14, %v1087_v57 }
  0x4e   :  { %v433_v10 = vsel %vm432_vm2, %v431_v6, %v430_v55  ;;  %v189_v25 = vrot.slane %v1099_v15, %v1087_v57  ;;  %v205_v26 = vrot.slane %v1101_v16, %v1087_v57  ;;  %v221_v11 = vrot.slane %v1103_v17, %v1087_v57 }
  0x4f   :  { %v436_v27 = vsel %vm435_vm3, %v434_v7, %v433_v10  ;;  %v260_v12 = vpack.c.bf16 %v109_v9, %v109_v9  ;;  %v264_v28 = vpack.c.bf16 %v125_v21, %v125_v21  ;;  %v268_v29 = vpack.c.bf16 %v141_v22, %v141_v22 }
  0x50   :  { %v439_v13 = vsel %vm438_vm4, %v437_v8, %v436_v27  ;;  %v272_v30 = vpack.c.bf16 %v157_v23, %v157_v23  ;;  %v276_v14 = vpack.c.bf16 %v173_v24, %v173_v24  ;;  %v280_v31 = vpack.c.bf16 %v189_v25, %v189_v25 }
  0x51   :  { %v442_v32 = vsel %vm441_vm5, %v440_v19, %v439_v13  ;;  %v284_v33 = vpack.c.bf16 %v205_v26, %v205_v26  ;;  %v288_v15 = vpack.c.bf16 %v221_v11, %v221_v11  ;;  %v395_v34 = vunpack.c.l.b16 %v260_v12 }
  0x52   :  { %v445_v16 = vsel %vm444_vm6, %v443_v20, %v442_v32  ;;  %v399_v35 = vunpack.c.l.b16 %v264_v28  ;;  %v403_v36 = vunpack.c.l.b16 %v268_v29  ;;  %v407_v57 = vunpack.c.l.b16 %v272_v30 }
  0x53   :  { %v488_v17 = vpack.c.b16 %v445_v16, %v445_v16  ;;  %v411_v37 = vunpack.c.l.b16 %v276_v14  ;;  %v415_v38 = vunpack.c.l.b16 %v280_v31  ;;  %v419_v39 = vunpack.c.l.b16 %v284_v33 }
  0x54   :  { %v423_v40 = vunpack.c.l.b16 %v288_v15  ;;  %v460_v41 = vrot.slane %v399_v35, 7  ;;  %v462_v42 = vrot.slane %v403_v36, 6  ;;  %v464_v43 = vrot.slane %v407_v57, 5 }
  0x55   :  { %721 = vmatmul.mubr.bf16.vlgmr.msra.gmra.mrb[0].mxu0 %v488_v17  ;;  %v466_v44 = vrot.slane %v411_v37, 4  ;;  %v468_v46 = vrot.slane %v415_v38, 3  ;;  %v470_v48 = vrot.slane %v419_v39, 2 }
  0x56   :  { %v461_v45 = vsel %vm426_vm0, %v460_v41, %v395_v34  ;;  %v472_v50 = vrot.slane %v423_v40, 1 }
  0x57   :  { %v463_v47 = vsel %vm429_vm1, %v462_v42, %v461_v45 }
  0x58   :  { %v465_v49 = vsel %vm432_vm2, %v464_v43, %v463_v47 }
  0x59   :  { %v467_v51 = vsel %vm435_vm3, %v466_v44, %v465_v49 }
  0x5a   :  { %v469_v52 = vsel %vm438_vm4, %v468_v46, %v467_v51 }
  0x5b   :  { %v471_v53 = vsel %vm441_vm5, %v470_v48, %v469_v52 }
  0x5c   :  { %v473_v54 = vsel %vm444_vm6, %v472_v50, %v471_v53 }
  0x5d   :  { %v490_v58 = vpack.c.b16 %v473_v54, %v473_v54 }
  0x5f   :  { %761 = vmatmul.mubr.bf16.vlgmr.msra.gmra.mrb[0].mxu1 %v490_v58 }
 0x128   :  { %v851_v59 = vpop.f32.mrb[0].mxu0 }
 0x129   :  { %v852_v60 = vpop.f32.mrb[1].mxu0 }
 0x12a   :  { %v853_v61 = vadd.f32 %v852_v60, %v851_v59  ;;  %v854_v62 = vpop.f32.mrb[2].mxu0 }
 0x12b   :  { %v855_v63 = vpop.f32.mrb[3].mxu0 }
 0x12c   :  { %v723_v1 = vadd.f32 %v853_v61, %v783_v0 }
 0x132   :  { %v873_v56 = vpop.f32.mrb[0].mxu1 }
 0x133   :  { %v874_v2 = vpop.f32.mrb[1].mxu1 }
 0x134   :  { %v875_v3 = vadd.f32 %v874_v2, %v873_v56  ;;  %v876_v4 = vpop.f32.mrb[2].mxu1 }
 0x135   :  { %v877_v5 = vpop.f32.mrb[3].mxu1 }
 0x136   :  { %v763_v6 = vadd.f32 %v875_v3, %v723_v1 }
 0x138   :  { %768 = vst [vmem:[#allocation2] sm:$0xff] %v763_v6 }
 0x139   :  { %924 = shalt.err (!%p921_p4)
}
 0x13a   :  { %s925_s21 = scalar_lea.hbm %s1209_s5, 128 }
 0x13b   :  { %p926_p5 = scmp.ne.s32.totalorder %s1209_s5, %s925_s21  ;;  %p929_p6 = scmp.lt.u32.totalorder %s925_s21, %s1209_s5 }
 0x13d   :  { %p931_p7 = pnand %p929_p6, %p926_p5 }
 0x13f   :  { %934 = shalt.err (!%p931_p7)
}
 0x140   :  { %778 = dma.vmem_to_hbm [thread:$0]  %s776_s18, 128, %s1209_s5, [#allocation3]  }
 0x141   :  { %935 = dma.done.wait [#allocation3], 128  }
 0x142   :  { %936 = vsyncadd [#allocation3], 4294967168 }
 0x143   :  { %782 = vsyncpa [#allocation3], 1 }

// kernel: patch_encoder_forward.8
= control target key start
LH: loop header
LB: loop body
LE: loop exit
PB: predicated region body
PF: predicated region fallthrough
CT: control target
= control target key end

     0   :  { %s7814_s1 = inlined_call_operand.vmem [shape: bf16[2304,512], index: 1, kind: input, shape index: {}]   ;;  %s7815_s0 = inlined_call_operand.vmem [shape: bf16[8,2304], index: 0, kind: input, shape index: {}]   ;;  %s7816_s2 = inlined_call_operand.vmem [shape: bf16[8,512], index: 2, kind: output, shape index: {0}]   ;;  %s7817_s3 = inlined_call_operand.vmem [shape: f32[1,2,512], index: 3, kind: output, shape index: {1}]  }
   0x1   :  { %v5086_v0 = vld [vmem:[%s7814_s1 + $0x4] ss:$16 sps:$4 sm:$0xff]   ;;  %v5088_v1 = vld [vmem:[%s7814_s1 + $0xc] ss:$16 sps:$4 sm:$0xff]   ;;  %v5090_v2 = vld [vmem:[%s7814_s1] ss:$16 sps:$4 sm:$0xff]  }
   0x2   :  { %3541 = vmatprep.subr.bf16.mxu0 %v5086_v0  ;;  %v5091_v3 = vld [vmem:[%s7814_s1 + $0x8] ss:$16 sps:$4 sm:$0xff]   ;;  %3910 = vmatprep.subr.bf16.mxu1 %v5088_v1  ;;  %v5092_v4 = vld [vmem:[%s7814_s1 + $0x24] ss:$16 sps:$4 sm:$0xff]   ;;  %v5094_v5 = vld [vmem:[%s7814_s1 + $0x2c] ss:$16 sps:$4 sm:$0xff]  }
   0x3   :  { %3542 = vmatpush1.bf16.msra.mxu0 %v5090_v2  ;;  %3911 = vmatpush1.bf16.msra.mxu1 %v5091_v3  ;;  %v5096_v6 = vld [vmem:[%s7814_s1 + $0x20] ss:$16 sps:$4 sm:$0xff]   ;;  %v5097_v7 = vld [vmem:[%s7814_s1 + $0x28] ss:$16 sps:$4 sm:$0xff]   ;;  %v5098_v8 = vld [vmem:[%s7814_s1 + $0x44] ss:$16 sps:$4 sm:$0xff]  }
   0x4   :  { %3543 = vmatprep.subr.bf16.mxu0 %v5092_v4  ;;  %3912 = vmatprep.subr.bf16.mxu1 %v5094_v5  ;;  %v5100_v9 = vld [vmem:[%s7814_s1 + $0x4c] ss:$16 sps:$4 sm:$0xff]   ;;  %v5102_v10 = vld [vmem:[%s7814_s1 + $0x40] ss:$16 sps:$4 sm:$0xff]   ;;  %v5103_v11 = vld [vmem:[%s7814_s1 + $0x48] ss:$16 sps:$4 sm:$0xff]  }
   0x5   :  { %v5104_v12 = vld [vmem:[%s7814_s1 + $0x64] ss:$16 sps:$4 sm:$0xff]   ;;  %v5106_v13 = vld [vmem:[%s7814_s1 + $0x6c] ss:$16 sps:$4 sm:$0xff]   ;;  %v5108_v14 = vld [vmem:[%s7814_s1 + $0x60] ss:$16 sps:$4 sm:$0xff]  }
   0x6   :  { %v5109_v15 = vld [vmem:[%s7814_s1 + $0x68] ss:$16 sps:$4 sm:$0xff]   ;;  %v5110_v16 = vld [vmem:[%s7814_s1 + $0x84] ss:$16 sps:$4 sm:$0xff]   ;;  %v5112_v17 = vld [vmem:[%s7814_s1 + $0x8c] ss:$16 sps:$4 sm:$0xff]  }
   0x7   :  { %3544 = vmatpush1.bf16.msra.mxu0 %v5096_v6  ;;  %3913 = vmatpush1.bf16.msra.mxu1 %v5097_v7  ;;  %v5114_v18 = vld [vmem:[%s7814_s1 + $0x80] ss:$16 sps:$4 sm:$0xff]   ;;  %v5115_v19 = vld [vmem:[%s7814_s1 + $0x88] ss:$16 sps:$4 sm:$0xff]   ;;  %v5116_v20 = vld [vmem:[%s7814_s1 + $0xa4] ss:$16 sps:$4 sm:$0xff]  }
   0x8   :  { %3545 = vmatprep.subr.bf16.mxu0 %v5098_v8  ;;  %3914 = vmatprep.subr.bf16.mxu1 %v5100_v9  ;;  %v5118_v21 = vld [vmem:[%s7814_s1 + $0xac] ss:$16 sps:$4 sm:$0xff]   ;;  %v5120_v22 = vld [vmem:[%s7814_s1 + $0xa0] ss:$16 sps:$4 sm:$0xff]   ;;  %v5121_v23 = vld [vmem:[%s7814_s1 + $0xa8] ss:$16 sps:$4 sm:$0xff]  }
   0x9   :  { %v5122_v24 = vld [vmem:[%s7814_s1 + $0xc4] ss:$16 sps:$4 sm:$0xff]   ;;  %v5124_v25 = vld [vmem:[%s7814_s1 + $0xcc] ss:$16 sps:$4 sm:$0xff]   ;;  %v5126_v26 = vld [vmem:[%s7814_s1 + $0xc0] ss:$16 sps:$4 sm:$0xff]  }
   0xa   :  { %v5127_v27 = vld [vmem:[%s7814_s1 + $0xc8] ss:$16 sps:$4 sm:$0xff]   ;;  %v5128_v28 = vld [vmem:[%s7814_s1 + $0xe4] ss:$16 sps:$4 sm:$0xff]   ;;  %v5130_v29 = vld [vmem:[%s7814_s1 + $0xec] ss:$16 sps:$4 sm:$0xff]  }
   0xb   :  { %3546 = vmatpush1.bf16.msra.mxu0 %v5102_v10  ;;  %3915 = vmatpush1.bf16.msra.mxu1 %v5103_v11  ;;  %v5132_v30 = vld [vmem:[%s7814_s1 + $0xe0] ss:$16 sps:$4 sm:$0xff]   ;;  %v5133_v31 = vld [vmem:[%s7814_s1 + $0xe8] ss:$16 sps:$4 sm:$0xff]   ;;  %v5134_v32 = vld [vmem:[%s7814_s1 + $0x104] ss:$16 sps:$4 sm:$0xff]  }
   0xc   :  { %3547 = vmatprep.subr.bf16.mxu0 %v5104_v12  ;;  %3916 = vmatprep.subr.bf16.mxu1 %v5106_v13  ;;  %v5136_v33 = vld [vmem:[%s7814_s1 + $0x10c] ss:$16 sps:$4 sm:$0xff]   ;;  %v5138_v34 = vld [vmem:[%s7814_s1 + $0x100] ss:$16 sps:$4 sm:$0xff]   ;;  %v5139_v35 = vld [vmem:[%s7814_s1 + $0x108] ss:$16 sps:$4 sm:$0xff]  }
   0xd   :  { %v5140_v36 = vld [vmem:[%s7814_s1 + $0x124] ss:$16 sps:$4 sm:$0xff]   ;;  %v5142_v37 = vld [vmem:[%s7814_s1 + $0x12c] ss:$16 sps:$4 sm:$0xff]   ;;  %v5144_v38 = vld [vmem:[%s7814_s1 + $0x120] ss:$16 sps:$4 sm:$0xff]  }
   0xe   :  { %v5145_v39 = vld [vmem:[%s7814_s1 + $0x128] ss:$16 sps:$4 sm:$0xff]   ;;  %v5146_v40 = vld [vmem:[%s7814_s1 + $0x144] ss:$16 sps:$4 sm:$0xff]   ;;  %v5148_v41 = vld [vmem:[%s7814_s1 + $0x14c] ss:$16 sps:$4 sm:$0xff]  }
   0xf   :  { %3548 = vmatpush1.bf16.msra.mxu0 %v5108_v14  ;;  %3917 = vmatpush1.bf16.msra.mxu1 %v5109_v15  ;;  %v5150_v42 = vld [vmem:[%s7814_s1 + $0x140] ss:$16 sps:$4 sm:$0xff]   ;;  %v5151_v43 = vld [vmem:[%s7814_s1 + $0x148] ss:$16 sps:$4 sm:$0xff]   ;;  %v5152_v44 = vld [vmem:[%s7814_s1 + $0x164] ss:$16 sps:$4 sm:$0xff]  }
  0x10   :  { %3549 = vmatprep.subr.bf16.mxu0 %v5110_v16  ;;  %3918 = vmatprep.subr.bf16.mxu1 %v5112_v17  ;;  %v5154_v45 = vld [vmem:[%s7814_s1 + $0x16c] ss:$16 sps:$4 sm:$0xff]   ;;  %v13_v46 = vld [vmem:[%s7815_s0] sm:$0xff]  ;;  %v5157_v49 = vld [vmem:[%s7814_s1 + $0x168] ss:$16 sps:$4 sm:$0xff]  }
  0x11   :  { %v5156_v47 = vld [vmem:[%s7814_s1 + $0x160] ss:$16 sps:$4 sm:$0xff]   ;;  %v4423_v48 = vcombine.high %v13_v46, %v13_v46  ;;  %v5158_v50 = vld [vmem:[%s7814_s1 + $0x184] ss:$16 sps:$4 sm:$0xff]   ;;  %v5160_v51 = vld [vmem:[%s7814_s1 + $0x18c] ss:$16 sps:$4 sm:$0xff]   ;;  %v4422_v4 = vcombine.low %v13_v46, %v13_v46 }
  0x12   :  { %v5162_v52 = vld [vmem:[%s7814_s1 + $0x180] ss:$16 sps:$4 sm:$0xff]   ;;  %v5163_v53 = vld [vmem:[%s7814_s1 + $0x188] ss:$16 sps:$4 sm:$0xff]   ;;  %v5164_v54 = vld [vmem:[%s7814_s1 + $0x1a4] ss:$16 sps:$4 sm:$0xff]  }
  0x13   :  { %3550 = vmatpush1.bf16.msra.mxu0 %v5114_v18  ;;  %3919 = vmatpush1.bf16.msra.mxu1 %v5115_v19  ;;  %v5166_v55 = vld [vmem:[%s7814_s1 + $0x1ac] ss:$16 sps:$4 sm:$0xff]   ;;  %v5168_v56 = vld [vmem:[%s7814_s1 + $0x1a0] ss:$16 sps:$4 sm:$0xff]   ;;  %v5169_v57 = vld [vmem:[%s7814_s1 + $0x1a8] ss:$16 sps:$4 sm:$0xff]  }
  0x14   :  { %3551 = vmatprep.subr.bf16.mxu0 %v5116_v20  ;;  %3920 = vmatprep.subr.bf16.mxu1 %v5118_v21  ;;  %v5170_v58 = vld [vmem:[%s7814_s1 + $0x1c4] ss:$16 sps:$4 sm:$0xff]   ;;  %v5172_v59 = vld [vmem:[%s7814_s1 + $0x1cc] ss:$16 sps:$4 sm:$0xff]   ;;  %v5174_v60 = vld [vmem:[%s7814_s1 + $0x1c0] ss:$16 sps:$4 sm:$0xff]  }
  0x15   :  { %3573 = vmatprep.mubr.bf16.mxu0 %v4423_v48  ;;  %3942 = vmatprep.mubr.bf16.mxu1 %v4423_v48  ;;  %v5175_v61 = vld [vmem:[%s7814_s1 + $0x1c8] ss:$16 sps:$4 sm:$0xff]   ;;  %v5176_v62 = vld [vmem:[%s7814_s1 + $0x1e4] ss:$16 sps:$4 sm:$0xff]   ;;  %v5178_v63 = vld [vmem:[%s7814_s1 + $0x1ec] ss:$16 sps:$4 sm:$0xff]  }
  0x16   :  { %v5180_v0 = vld [vmem:[%s7814_s1 + $0x1e0] ss:$16 sps:$4 sm:$0xff]   ;;  %v5181_v1 = vld [vmem:[%s7814_s1 + $0x1e8] ss:$16 sps:$4 sm:$0xff]   ;;  %v5186_v2 = vld [vmem:[%s7814_s1 + $0x204] ss:$16 sps:$4 sm:$0xff]  }
  0x17   :  { %3552 = vmatpush1.bf16.msra.mxu0 %v5120_v22  ;;  %3921 = vmatpush1.bf16.msra.mxu1 %v5121_v23  ;;  %v5189_v3 = vld [vmem:[%s7814_s1 + $0x20c] ss:$16 sps:$4 sm:$0xff]   ;;  %v5184_v5 = vld [vmem:[%s7814_s1 + $0x200] ss:$16 sps:$4 sm:$0xff]   ;;  %v5187_v6 = vld [vmem:[%s7814_s1 + $0x208] ss:$16 sps:$4 sm:$0xff]  }
  0x18   :  { %3553 = vmatprep.subr.bf16.mxu0 %v5122_v24  ;;  %3922 = vmatprep.subr.bf16.mxu1 %v5124_v25  ;;  %v5192_v7 = vld [vmem:[%s7814_s1 + $0x224] ss:$16 sps:$4 sm:$0xff]   ;;  %v5195_v8 = vld [vmem:[%s7814_s1 + $0x22c] ss:$16 sps:$4 sm:$0xff]   ;;  %v5190_v9 = vld [vmem:[%s7814_s1 + $0x220] ss:$16 sps:$4 sm:$0xff]  }
  0x19   :  { %v5193_v10 = vld [vmem:[%s7814_s1 + $0x228] ss:$16 sps:$4 sm:$0xff]   ;;  %v5198_v11 = vld [vmem:[%s7814_s1 + $0x244] ss:$16 sps:$4 sm:$0xff]   ;;  %v5201_v12 = vld [vmem:[%s7814_s1 + $0x24c] ss:$16 sps:$4 sm:$0xff]  }
  0x1a   :  { %v5196_v13 = vld [vmem:[%s7814_s1 + $0x240] ss:$16 sps:$4 sm:$0xff]   ;;  %v5199_v14 = vld [vmem:[%s7814_s1 + $0x248] ss:$16 sps:$4 sm:$0xff]   ;;  %v5204_v15 = vld [vmem:[%s7814_s1 + $0x264] ss:$16 sps:$4 sm:$0xff]  }
  0x1b   :  { %3554 = vmatpush1.bf16.msra.mxu0 %v5126_v26  ;;  %3923 = vmatpush1.bf16.msra.mxu1 %v5127_v27  ;;  %v5207_v16 = vld [vmem:[%s7814_s1 + $0x26c] ss:$16 sps:$4 sm:$0xff]   ;;  %v5202_v17 = vld [vmem:[%s7814_s1 + $0x260] ss:$16 sps:$4 sm:$0xff]   ;;  %v5205_v18 = vld [vmem:[%s7814_s1 + $0x268] ss:$16 sps:$4 sm:$0xff]  }
  0x1c   :  { %3555 = vmatprep.subr.bf16.mxu0 %v5128_v28  ;;  %3924 = vmatprep.subr.bf16.mxu1 %v5130_v29  ;;  %v5210_v19 = vld [vmem:[%s7814_s1 + $0x284] ss:$16 sps:$4 sm:$0xff]   ;;  %v5213_v20 = vld [vmem:[%s7814_s1 + $0x28c] ss:$16 sps:$4 sm:$0xff]   ;;  %v5208_v21 = vld [vmem:[%s7814_s1 + $0x280] ss:$16 sps:$4 sm:$0xff]  }
  0x1d   :  { %v5211_v22 = vld [vmem:[%s7814_s1 + $0x288] ss:$16 sps:$4 sm:$0xff]   ;;  %v5216_v23 = vld [vmem:[%s7814_s1 + $0x2a4] ss:$16 sps:$4 sm:$0xff]   ;;  %v5219_v24 = vld [vmem:[%s7814_s1 + $0x2ac] ss:$16 sps:$4 sm:$0xff]  }
  0x1e   :  { %v5214_v25 = vld [vmem:[%s7814_s1 + $0x2a0] ss:$16 sps:$4 sm:$0xff]   ;;  %v5217_v26 = vld [vmem:[%s7814_s1 + $0x2a8] ss:$16 sps:$4 sm:$0xff]   ;;  %v5222_v27 = vld [vmem:[%s7814_s1 + $0x2c4] ss:$16 sps:$4 sm:$0xff]  }
  0x1f   :  { %3556 = vmatpush1.bf16.msra.mxu0 %v5132_v30  ;;  %3925 = vmatpush1.bf16.msra.mxu1 %v5133_v31  ;;  %v5225_v28 = vld [vmem:[%s7814_s1 + $0x2cc] ss:$16 sps:$4 sm:$0xff]   ;;  %v5220_v31 = vld [vmem:[%s7814_s1 + $0x2c0] ss:$16 sps:$4 sm:$0xff]   ;;  %v5247_v48 = vld [vmem:[%s7814_s1 + $0x348] ss:$16 sps:$4 sm:$0xff]  }
  0x20   :  { %3557 = vmatprep.subr.bf16.mxu0 %v5134_v32  ;;  %3926 = vmatprep.subr.bf16.mxu1 %v5136_v33  ;;  %v6265_v29 = vld [vmem:[%s7815_s0 + $0x8] sm:$0xff]  ;;  %v5228_v33 = vld [vmem:[%s7814_s1 + $0x2e4] ss:$16 sps:$4 sm:$0xff]  }
  0x21   :  { %v4425_v30 = vcombine.high %v6265_v29, %v6265_v29  ;;  %v5223_v32 = vld [vmem:[%s7814_s1 + $0x2c8] ss:$16 sps:$4 sm:$0xff]   ;;  %v5249_v46 = vld [vmem:[%s7814_s1 + $0x34c] ss:$16 sps:$4 sm:$0xff]  }
  0x23   :  { %3558 = vmatpush1.bf16.msra.mxu0 %v5138_v34  ;;  %3927 = vmatpush1.bf16.msra.mxu1 %v5139_v35  ;;  %v5231_v34 = vld [vmem:[%s7814_s1 + $0x2ec] ss:$16 sps:$4 sm:$0xff]   ;;  %v5226_v35 = vld [vmem:[%s7814_s1 + $0x2e0] ss:$16 sps:$4 sm:$0xff]  }
  0x24   :  { %3559 = vmatprep.subr.bf16.mxu0 %v5140_v36  ;;  %3928 = vmatprep.subr.bf16.mxu1 %v5142_v37  ;;  %v5229_v36 = vld [vmem:[%s7814_s1 + $0x2e8] ss:$16 sps:$4 sm:$0xff]   ;;  %v5234_v37 = vld [vmem:[%s7814_s1 + $0x304] ss:$16 sps:$4 sm:$0xff]  }
  0x27   :  { %3560 = vmatpush1.bf16.msra.mxu0 %v5144_v38  ;;  %3929 = vmatpush1.bf16.msra.mxu1 %v5145_v39  ;;  %v5237_v38 = vld [vmem:[%s7814_s1 + $0x30c] ss:$16 sps:$4 sm:$0xff]   ;;  %v5232_v39 = vld [vmem:[%s7814_s1 + $0x300] ss:$16 sps:$4 sm:$0xff]  }
  0x28   :  { %3561 = vmatprep.subr.bf16.mxu0 %v5146_v40  ;;  %3930 = vmatprep.subr.bf16.mxu1 %v5148_v41  ;;  %v5235_v40 = vld [vmem:[%s7814_s1 + $0x308] ss:$16 sps:$4 sm:$0xff]   ;;  %v5240_v41 = vld [vmem:[%s7814_s1 + $0x324] ss:$16 sps:$4 sm:$0xff]  }
  0x2b   :  { %3562 = vmatpush1.bf16.msra.mxu0 %v5150_v42  ;;  %3931 = vmatpush1.bf16.msra.mxu1 %v5151_v43  ;;  %v5243_v42 = vld [vmem:[%s7814_s1 + $0x32c] ss:$16 sps:$4 sm:$0xff]   ;;  %v5238_v43 = vld [vmem:[%s7814_s1 + $0x320] ss:$16 sps:$4 sm:$0xff]  }
  0x2c   :  { %3563 = vmatprep.subr.bf16.mxu0 %v5152_v44  ;;  %3932 = vmatprep.subr.bf16.mxu1 %v5154_v45  ;;  %v5241_v44 = vld [vmem:[%s7814_s1 + $0x328] ss:$16 sps:$4 sm:$0xff]   ;;  %v5246_v45 = vld [vmem:[%s7814_s1 + $0x344] ss:$16 sps:$4 sm:$0xff]  }
  0x2f   :  { %3564 = vmatpush1.bf16.msra.mxu0 %v5156_v47  ;;  %3933 = vmatpush1.bf16.msra.mxu1 %v5157_v49  ;;  %v5244_v47 = vld [vmem:[%s7814_s1 + $0x340] ss:$16 sps:$4 sm:$0xff]   ;;  %v5252_v49 = vld [vmem:[%s7814_s1 + $0x364] ss:$16 sps:$4 sm:$0xff]  }
  0x30   :  { %3565 = vmatprep.subr.bf16.mxu0 %v5158_v50  ;;  %3934 = vmatprep.subr.bf16.mxu1 %v5160_v51  ;;  %v5255_v50 = vld [vmem:[%s7814_s1 + $0x36c] ss:$16 sps:$4 sm:$0xff]   ;;  %v5250_v51 = vld [vmem:[%s7814_s1 + $0x360] ss:$16 sps:$4 sm:$0xff]  }
  0x33   :  { %3566 = vmatpush1.bf16.msra.mxu0 %v5162_v52  ;;  %3935 = vmatpush1.bf16.msra.mxu1 %v5163_v53  ;;  %v5253_v52 = vld [vmem:[%s7814_s1 + $0x368] ss:$16 sps:$4 sm:$0xff]   ;;  %v5258_v53 = vld [vmem:[%s7814_s1 + $0x384] ss:$16 sps:$4 sm:$0xff]  }
  0x34   :  { %3567 = vmatprep.subr.bf16.mxu0 %v5164_v54  ;;  %3936 = vmatprep.subr.bf16.mxu1 %v5166_v55  ;;  %v5261_v54 = vld [vmem:[%s7814_s1 + $0x38c] ss:$16 sps:$4 sm:$0xff]   ;;  %v5256_v55 = vld [vmem:[%s7814_s1 + $0x380] ss:$16 sps:$4 sm:$0xff]  }
  0x37   :  { %3568 = vmatpush1.bf16.msra.mxu0 %v5168_v56  ;;  %3937 = vmatpush1.bf16.msra.mxu1 %v5169_v57  ;;  %v5259_v56 = vld [vmem:[%s7814_s1 + $0x388] ss:$16 sps:$4 sm:$0xff]   ;;  %v5264_v57 = vld [vmem:[%s7814_s1 + $0x3a4] ss:$16 sps:$4 sm:$0xff]  }
  0x38   :  { %3569 = vmatprep.subr.bf16.mxu0 %v5170_v58  ;;  %3938 = vmatprep.subr.bf16.mxu1 %v5172_v59  ;;  %v5267_v58 = vld [vmem:[%s7814_s1 + $0x3ac] ss:$16 sps:$4 sm:$0xff]   ;;  %v5262_v59 = vld [vmem:[%s7814_s1 + $0x3a0] ss:$16 sps:$4 sm:$0xff]  }
  0x3b   :  { %3570 = vmatpush1.bf16.msra.mxu0 %v5174_v60  ;;  %3939 = vmatpush1.bf16.msra.mxu1 %v5175_v61  ;;  %v5265_v60 = vld [vmem:[%s7814_s1 + $0x3a8] ss:$16 sps:$4 sm:$0xff]   ;;  %v5270_v61 = vld [vmem:[%s7814_s1 + $0x3c4] ss:$16 sps:$4 sm:$0xff]  }
  0x3c   :  { %3571 = vmatprep.subr.bf16.mxu0 %v5176_v62  ;;  %3940 = vmatprep.subr.bf16.mxu1 %v5178_v63  ;;  %v5273_v62 = vld [vmem:[%s7814_s1 + $0x3cc] ss:$16 sps:$4 sm:$0xff]   ;;  %v5268_v63 = vld [vmem:[%s7814_s1 + $0x3c0] ss:$16 sps:$4 sm:$0xff]  }
  0x3f   :  { %3572 = vmatpush1.bf16.msra.mxu0 %v5180_v0  ;;  %3941 = vmatpush1.bf16.msra.mxu1 %v5181_v1  ;;  %v5271_v0 = vld [vmem:[%s7814_s1 + $0x3c8] ss:$16 sps:$4 sm:$0xff]   ;;  %v5276_v1 = vld [vmem:[%s7814_s1 + $0x3e4] ss:$16 sps:$4 sm:$0xff]  }
  0x40   :  { %3582 = vmatprep.subr.bf16.mxu0 %v5186_v2  ;;  %3951 = vmatprep.subr.bf16.mxu1 %v5189_v3  ;;  %v5279_v2 = vld [vmem:[%s7814_s1 + $0x3ec] ss:$16 sps:$4 sm:$0xff]   ;;  %v5274_v3 = vld [vmem:[%s7814_s1 + $0x3e0] ss:$16 sps:$4 sm:$0xff]  }
  0x42   :  { %3574 = vmatmul.mubr.bf16.vlgmr.msra.gmra.mrb[0].mxu0 %v4422_v4  ;;  %3943 = vmatmul.mubr.bf16.vlgmr.msra.gmra.mrb[0].mxu1 %v4422_v4  ;;  %v5277_v4 = vld [vmem:[%s7814_s1 + $0x3e8] ss:$16 sps:$4 sm:$0xff]  }
  0x43   :  { %3583 = vmatpush1.bf16.msra.mxu0 %v5184_v5  ;;  %3952 = vmatpush1.bf16.msra.mxu1 %v5187_v6  ;;  %v5284_v5 = vld [vmem:[%s7814_s1 + $0x404] ss:$16 sps:$4 sm:$0xff]   ;;  %v5287_v6 = vld [vmem:[%s7814_s1 + $0x40c] ss:$16 sps:$4 sm:$0xff]  }
  0x44   :  { %3584 = vmatprep.subr.bf16.mxu0 %v5192_v7  ;;  %3953 = vmatprep.subr.bf16.mxu1 %v5195_v8  ;;  %v4424_v7 = vcombine.low %v6265_v29, %v6265_v29  ;;  %v5282_v8 = vld [vmem:[%s7814_s1 + $0x400] ss:$16 sps:$4 sm:$0xff]   ;;  %v5317_v29 = vld [vmem:[%s7814_s1 + $0x4ac] ss:$16 sps:$4 sm:$0xff]  }
  0x45   :  { %3614 = vmatprep.mubr.bf16.mxu0 %v4425_v30  ;;  %3983 = vmatprep.mubr.bf16.mxu1 %v4425_v30  ;;  %v5312_v30 = vld [vmem:[%s7814_s1 + $0x4a0] ss:$16 sps:$4 sm:$0xff]  }
  0x47   :  { %3585 = vmatpush1.bf16.msra.mxu0 %v5190_v9  ;;  %3954 = vmatpush1.bf16.msra.mxu1 %v5193_v10  ;;  %v5285_v9 = vld [vmem:[%s7814_s1 + $0x408] ss:$16 sps:$4 sm:$0xff]   ;;  %v5290_v10 = vld [vmem:[%s7814_s1 + $0x424] ss:$16 sps:$4 sm:$0xff]  }
  0x48   :  { %3586 = vmatprep.subr.bf16.mxu0 %v5198_v11  ;;  %3955 = vmatprep.subr.bf16.mxu1 %v5201_v12  ;;  %v6403_v11 = vld [vmem:[%s7815_s0 + $0x10] sm:$0xff]  ;;  %v5293_v12 = vld [vmem:[%s7814_s1 + $0x42c] ss:$16 sps:$4 sm:$0xff]  }
  0x4b   :  { %3587 = vmatpush1.bf16.msra.mxu0 %v5196_v13  ;;  %3956 = vmatpush1.bf16.msra.mxu1 %v5199_v14  ;;  %v4427_v13 = vcombine.high %v6403_v11, %v6403_v11  ;;  %v5288_v14 = vld [vmem:[%s7814_s1 + $0x420] ss:$16 sps:$4 sm:$0xff]  }
  0x4c   :  { %3588 = vmatprep.subr.bf16.mxu0 %v5204_v15  ;;  %3957 = vmatprep.subr.bf16.mxu1 %v5207_v16  ;;  %v5291_v15 = vld [vmem:[%s7814_s1 + $0x428] ss:$16 sps:$4 sm:$0xff]   ;;  %v5296_v16 = vld [vmem:[%s7814_s1 + $0x444] ss:$16 sps:$4 sm:$0xff]  }
  0x4f   :  { %3589 = vmatpush1.bf16.msra.mxu0 %v5202_v17  ;;  %3958 = vmatpush1.bf16.msra.mxu1 %v5205_v18  ;;  %v5299_v17 = vld [vmem:[%s7814_s1 + $0x44c] ss:$16 sps:$4 sm:$0xff]   ;;  %v5294_v18 = vld [vmem:[%s7814_s1 + $0x440] ss:$16 sps:$4 sm:$0xff]  }
  0x50   :  { %3590 = vmatprep.subr.bf16.mxu0 %v5210_v19  ;;  %3959 = vmatprep.subr.bf16.mxu1 %v5213_v20  ;;  %v5297_v19 = vld [vmem:[%s7814_s1 + $0x448] ss:$16 sps:$4 sm:$0xff]   ;;  %v5302_v20 = vld [vmem:[%s7814_s1 + $0x464] ss:$16 sps:$4 sm:$0xff]  }
  0x53   :  { %3591 = vmatpush1.bf16.msra.mxu0 %v5208_v21  ;;  %3960 = vmatpush1.bf16.msra.mxu1 %v5211_v22  ;;  %v5305_v21 = vld [vmem:[%s7814_s1 + $0x46c] ss:$16 sps:$4 sm:$0xff]   ;;  %v5300_v22 = vld [vmem:[%s7814_s1 + $0x460] ss:$16 sps:$4 sm:$0xff]  }
  0x54   :  { %3592 = vmatprep.subr.bf16.mxu0 %v5216_v23  ;;  %3961 = vmatprep.subr.bf16.mxu1 %v5219_v24  ;;  %v5303_v23 = vld [vmem:[%s7814_s1 + $0x468] ss:$16 sps:$4 sm:$0xff]   ;;  %v5308_v24 = vld [vmem:[%s7814_s1 + $0x484] ss:$16 sps:$4 sm:$0xff]  }
  0x57   :  { %3593 = vmatpush1.bf16.msra.mxu0 %v5214_v25  ;;  %3962 = vmatpush1.bf16.msra.mxu1 %v5217_v26  ;;  %v5311_v25 = vld [vmem:[%s7814_s1 + $0x48c] ss:$16 sps:$4 sm:$0xff]   ;;  %v5306_v26 = vld [vmem:[%s7814_s1 + $0x480] ss:$16 sps:$4 sm:$0xff]  }
  0x58   :  { %3594 = vmatprep.subr.bf16.mxu0 %v5222_v27  ;;  %3963 = vmatprep.subr.bf16.mxu1 %v5225_v28  ;;  %v5309_v27 = vld [vmem:[%s7814_s1 + $0x488] ss:$16 sps:$4 sm:$0xff]   ;;  %v5314_v28 = vld [vmem:[%s7814_s1 + $0x4a4] ss:$16 sps:$4 sm:$0xff]  }
  0x5b   :  { %3595 = vmatpush1.bf16.msra.mxu0 %v5220_v31  ;;  %3964 = vmatpush1.bf16.msra.mxu1 %v5223_v32  ;;  %v5315_v31 = vld [vmem:[%s7814_s1 + $0x4a8] ss:$16 sps:$4 sm:$0xff]   ;;  %v5320_v32 = vld [vmem:[%s7814_s1 + $0x4c4] ss:$16 sps:$4 sm:$0xff]  }
  0x5c   :  { %3596 = vmatprep.subr.bf16.mxu0 %v5228_v33  ;;  %3965 = vmatprep.subr.bf16.mxu1 %v5231_v34  ;;  %v5323_v33 = vld [vmem:[%s7814_s1 + $0x4cc] ss:$16 sps:$4 sm:$0xff]   ;;  %v5318_v34 = vld [vmem:[%s7814_s1 + $0x4c0] ss:$16 sps:$4 sm:$0xff]  }
  0x5f   :  { %3597 = vmatpush1.bf16.msra.mxu0 %v5226_v35  ;;  %3966 = vmatpush1.bf16.msra.mxu1 %v5229_v36  ;;  %v5321_v35 = vld [vmem:[%s7814_s1 + $0x4c8] ss:$16 sps:$4 sm:$0xff]   ;;  %v5326_v36 = vld [vmem:[%s7814_s1 + $0x4e4] ss:$16 sps:$4 sm:$0xff]  }
  0x60   :  { %3598 = vmatprep.subr.bf16.mxu0 %v5234_v37  ;;  %3967 = vmatprep.subr.bf16.mxu1 %v5237_v38  ;;  %v5329_v37 = vld [vmem:[%s7814_s1 + $0x4ec] ss:$16 sps:$4 sm:$0xff]   ;;  %v5324_v38 = vld [vmem:[%s7814_s1 + $0x4e0] ss:$16 sps:$4 sm:$0xff]  }
  0x63   :  { %3599 = vmatpush1.bf16.msra.mxu0 %v5232_v39  ;;  %3968 = vmatpush1.bf16.msra.mxu1 %v5235_v40  ;;  %v5327_v39 = vld [vmem:[%s7814_s1 + $0x4e8] ss:$16 sps:$4 sm:$0xff]   ;;  %v5332_v40 = vld [vmem:[%s7814_s1 + $0x504] ss:$16 sps:$4 sm:$0xff]  }
  0x64   :  { %3600 = vmatprep.subr.bf16.mxu0 %v5240_v41  ;;  %3969 = vmatprep.subr.bf16.mxu1 %v5243_v42  ;;  %v5335_v41 = vld [vmem:[%s7814_s1 + $0x50c] ss:$16 sps:$4 sm:$0xff]   ;;  %v5330_v42 = vld [vmem:[%s7814_s1 + $0x500] ss:$16 sps:$4 sm:$0xff]  }
  0x67   :  { %3601 = vmatpush1.bf16.msra.mxu0 %v5238_v43  ;;  %3970 = vmatpush1.bf16.msra.mxu1 %v5241_v44  ;;  %v5333_v43 = vld [vmem:[%s7814_s1 + $0x508] ss:$16 sps:$4 sm:$0xff]   ;;  %v5338_v44 = vld [vmem:[%s7814_s1 + $0x524] ss:$16 sps:$4 sm:$0xff]  }
  0x68   :  { %3602 = vmatprep.subr.bf16.mxu0 %v5246_v45  ;;  %3971 = vmatprep.subr.bf16.mxu1 %v5249_v46  ;;  %v5341_v45 = vld [vmem:[%s7814_s1 + $0x52c] ss:$16 sps:$4 sm:$0xff]   ;;  %v5336_v46 = vld [vmem:[%s7814_s1 + $0x520] ss:$16 sps:$4 sm:$0xff]  }
  0x6b   :  { %3603 = vmatpush1.bf16.msra.mxu0 %v5244_v47  ;;  %3972 = vmatpush1.bf16.msra.mxu1 %v5247_v48  ;;  %v5339_v47 = vld [vmem:[%s7814_s1 + $0x528] ss:$16 sps:$4 sm:$0xff]   ;;  %v5344_v48 = vld [vmem:[%s7814_s1 + $0x544] ss:$16 sps:$4 sm:$0xff]  }
  0x6c   :  { %3604 = vmatprep.subr.bf16.mxu0 %v5252_v49  ;;  %3973 = vmatprep.subr.bf16.mxu1 %v5255_v50  ;;  %v5347_v49 = vld [vmem:[%s7814_s1 + $0x54c] ss:$16 sps:$4 sm:$0xff]   ;;  %v5342_v50 = vld [vmem:[%s7814_s1 + $0x540] ss:$16 sps:$4 sm:$0xff]  }
  0x6f   :  { %3605 = vmatpush1.bf16.msra.mxu0 %v5250_v51  ;;  %3974 = vmatpush1.bf16.msra.mxu1 %v5253_v52  ;;  %v5345_v51 = vld [vmem:[%s7814_s1 + $0x548] ss:$16 sps:$4 sm:$0xff]   ;;  %v5350_v52 = vld [vmem:[%s7814_s1 + $0x564] ss:$16 sps:$4 sm:$0xff]  }
  0x70   :  { %3606 = vmatprep.subr.bf16.mxu0 %v5258_v53  ;;  %3975 = vmatprep.subr.bf16.mxu1 %v5261_v54  ;;  %v5353_v53 = vld [vmem:[%s7814_s1 + $0x56c] ss:$16 sps:$4 sm:$0xff]   ;;  %v5348_v54 = vld [vmem:[%s7814_s1 + $0x560] ss:$16 sps:$4 sm:$0xff]  }
  0x73   :  { %3607 = vmatpush1.bf16.msra.mxu0 %v5256_v55  ;;  %3976 = vmatpush1.bf16.msra.mxu1 %v5259_v56  ;;  %v5351_v55 = vld [vmem:[%s7814_s1 + $0x568] ss:$16 sps:$4 sm:$0xff]   ;;  %v5356_v56 = vld [vmem:[%s7814_s1 + $0x584] ss:$16 sps:$4 sm:$0xff]  }
  0x74   :  { %3608 = vmatprep.subr.bf16.mxu0 %v5264_v57  ;;  %3977 = vmatprep.subr.bf16.mxu1 %v5267_v58  ;;  %v5359_v57 = vld [vmem:[%s7814_s1 + $0x58c] ss:$16 sps:$4 sm:$0xff]   ;;  %v5354_v58 = vld [vmem:[%s7814_s1 + $0x580] ss:$16 sps:$4 sm:$0xff]  }
  0x77   :  { %3609 = vmatpush1.bf16.msra.mxu0 %v5262_v59  ;;  %3978 = vmatpush1.bf16.msra.mxu1 %v5265_v60  ;;  %v5357_v59 = vld [vmem:[%s7814_s1 + $0x588] ss:$16 sps:$4 sm:$0xff]   ;;  %v5362_v60 = vld [vmem:[%s7814_s1 + $0x5a4] ss:$16 sps:$4 sm:$0xff]  }
  0x78   :  { %3610 = vmatprep.subr.bf16.mxu0 %v5270_v61  ;;  %3979 = vmatprep.subr.bf16.mxu1 %v5273_v62  ;;  %v5365_v61 = vld [vmem:[%s7814_s1 + $0x5ac] ss:$16 sps:$4 sm:$0xff]   ;;  %v5360_v62 = vld [vmem:[%s7814_s1 + $0x5a0] ss:$16 sps:$4 sm:$0xff]  }
  0x7b   :  { %3611 = vmatpush1.bf16.msra.mxu0 %v5268_v63  ;;  %3980 = vmatpush1.bf16.msra.mxu1 %v5271_v0  ;;  %v5363_v63 = vld [vmem:[%s7814_s1 + $0x5a8] ss:$16 sps:$4 sm:$0xff]   ;;  %v5368_v0 = vld [vmem:[%s7814_s1 + $0x5c4] ss:$16 sps:$4 sm:$0xff]  }
  0x7c   :  { %3612 = vmatprep.subr.bf16.mxu0 %v5276_v1  ;;  %3981 = vmatprep.subr.bf16.mxu1 %v5279_v2  ;;  %v5371_v1 = vld [vmem:[%s7814_s1 + $0x5cc] ss:$16 sps:$4 sm:$0xff]   ;;  %v5366_v2 = vld [vmem:[%s7814_s1 + $0x5c0] ss:$16 sps:$4 sm:$0xff]  }
  0x7f   :  { %3613 = vmatpush1.bf16.msra.mxu0 %v5274_v3  ;;  %3982 = vmatpush1.bf16.msra.mxu1 %v5277_v4  ;;  %v5369_v3 = vld [vmem:[%s7814_s1 + $0x5c8] ss:$16 sps:$4 sm:$0xff]   ;;  %v5374_v4 = vld [vmem:[%s7814_s1 + $0x5e4] ss:$16 sps:$4 sm:$0xff]  }
  0x80   :  { %3623 = vmatprep.subr.bf16.mxu0 %v5284_v5  ;;  %3992 = vmatprep.subr.bf16.mxu1 %v5287_v6  ;;  %v5377_v5 = vld [vmem:[%s7814_s1 + $0x5ec] ss:$16 sps:$4 sm:$0xff]   ;;  %v5372_v6 = vld [vmem:[%s7814_s1 + $0x5e0] ss:$16 sps:$4 sm:$0xff]  }
  0x82   :  { %3615 = vmatmul.mubr.bf16.vlgmr.msra.gmra.mrb[0].mxu0 %v4424_v7  ;;  %3984 = vmatmul.mubr.bf16.vlgmr.msra.gmra.mrb[0].mxu1 %v4424_v7  ;;  %v5375_v7 = vld [vmem:[%s7814_s1 + $0x5e8] ss:$16 sps:$4 sm:$0xff]  }
  0x83   :  { %3624 = vmatpush1.bf16.msra.mxu0 %v5282_v8  ;;  %3993 = vmatpush1.bf16.msra.mxu1 %v5285_v9  ;;  %v5382_v8 = vld [vmem:[%s7814_s1 + $0x604] ss:$16 sps:$4 sm:$0xff]   ;;  %v5385_v9 = vld [vmem:[%s7814_s1 + $0x60c] ss:$16 sps:$4 sm:$0xff]  }
  0x84   :  { %3625 = vmatprep.subr.bf16.mxu0 %v5290_v10  ;;  %3994 = vmatprep.subr.bf16.mxu1 %v5293_v12  ;;  %v5380_v10 = vld [vmem:[%s7814_s1 + $0x600] ss:$16 sps:$4 sm:$0xff]   ;;  %v4426_v12 = vcombine.low %v6403_v11, %v6403_v11  ;;  %v5391_v11 = vld [vmem:[%s7814_s1 + $0x62c] ss:$16 sps:$4 sm:$0xff]  }
  0x85   :  { %3655 = vmatprep.mubr.bf16.mxu0 %v4427_v13  ;;  %4024 = vmatprep.mubr.bf16.mxu1 %v4427_v13  ;;  %v5383_v13 = vld [vmem:[%s7814_s1 + $0x608] ss:$16 sps:$4 sm:$0xff]  }
  0x87   :  { %3626 = vmatpush1.bf16.msra.mxu0 %v5288_v14  ;;  %3995 = vmatpush1.bf16.msra.mxu1 %v5291_v15  ;;  %v6601_v14 = vld [vmem:[%s7815_s0 + $0x18] sm:$0xff]  ;;  %v5388_v15 = vld [vmem:[%s7814_s1 + $0x624] ss:$16 sps:$4 sm:$0xff]  }
  0x88   :  { %3627 = vmatprep.subr.bf16.mxu0 %v5296_v16  ;;  %3996 = vmatprep.subr.bf16.mxu1 %v5299_v17  ;;  %v4429_v16 = vcombine.high %v6601_v14, %v6601_v14  ;;  %v5386_v17 = vld [vmem:[%s7814_s1 + $0x620] ss:$16 sps:$4 sm:$0xff]  }
  0x8b   :  { %3628 = vmatpush1.bf16.msra.mxu0 %v5294_v18  ;;  %3997 = vmatpush1.bf16.msra.mxu1 %v5297_v19  ;;  %v5389_v18 = vld [vmem:[%s7814_s1 + $0x628] ss:$16 sps:$4 sm:$0xff]   ;;  %v5394_v19 = vld [vmem:[%s7814_s1 + $0x644] ss:$16 sps:$4 sm:$0xff]  }
  0x8c   :  { %3629 = vmatprep.subr.bf16.mxu0 %v5302_v20  ;;  %3998 = vmatprep.subr.bf16.mxu1 %v5305_v21  ;;  %v5397_v20 = vld [vmem:[%s7814_s1 + $0x64c] ss:$16 sps:$4 sm:$0xff]   ;;  %v5392_v21 = vld [vmem:[%s7814_s1 + $0x640] ss:$16 sps:$4 sm:$0xff]  }
  0x8f   :  { %3630 = vmatpush1.bf16.msra.mxu0 %v5300_v22  ;;  %3999 = vmatpush1.bf16.msra.mxu1 %v5303_v23  ;;  %v5395_v22 = vld [vmem:[%s7814_s1 + $0x648] ss:$16 sps:$4 sm:$0xff]   ;;  %v5400_v23 = vld [vmem:[%s7814_s1 + $0x664] ss:$16 sps:$4 sm:$0xff]  }
  0x90   :  { %3631 = vmatprep.subr.bf16.mxu0 %v5308_v24  ;;  %4000 = vmatprep.subr.bf16.mxu1 %v5311_v25  ;;  %v5403_v24 = vld [vmem:[%s7814_s1 + $0x66c] ss:$16 sps:$4 sm:$0xff]   ;;  %v5398_v25 = vld [vmem:[%s7814_s1 + $0x660] ss:$16 sps:$4 sm:$0xff]  }
  0x93   :  { %3632 = vmatpush1.bf16.msra.mxu0 %v5306_v26  ;;  %4001 = vmatpush1.bf16.msra.mxu1 %v5309_v27  ;;  %v5401_v26 = vld [vmem:[%s7814_s1 + $0x668] ss:$16 sps:$4 sm:$0xff]   ;;  %v5406_v27 = vld [vmem:[%s7814_s1 + $0x684] ss:$16 sps:$4 sm:$0xff]  }
  0x94   :  { %3633 = vmatprep.subr.bf16.mxu0 %v5314_v28  ;;  %4002 = vmatprep.subr.bf16.mxu1 %v5317_v29  ;;  %v5409_v28 = vld [vmem:[%s7814_s1 + $0x68c] ss:$16 sps:$4 sm:$0xff]   ;;  %v5404_v29 = vld [vmem:[%s7814_s1 + $0x680] ss:$16 sps:$4 sm:$0xff]  }
  0x97   :  { %3634 = vmatpush1.bf16.msra.mxu0 %v5312_v30  ;;  %4003 = vmatpush1.bf16.msra.mxu1 %v5315_v31  ;;  %v5407_v30 = vld [vmem:[%s7814_s1 + $0x688] ss:$16 sps:$4 sm:$0xff]   ;;  %v5412_v31 = vld [vmem:[%s7814_s1 + $0x6a4] ss:$16 sps:$4 sm:$0xff]  }
  0x98   :  { %3635 = vmatprep.subr.bf16.mxu0 %v5320_v32  ;;  %4004 = vmatprep.subr.bf16.mxu1 %v5323_v33  ;;  %v5415_v32 = vld [vmem:[%s7814_s1 + $0x6ac] ss:$16 sps:$4 sm:$0xff]   ;;  %v5410_v33 = vld [vmem:[%s7814_s1 + $0x6a0] ss:$16 sps:$4 sm:$0xff]  }
  0x9b   :  { %3636 = vmatpush1.bf16.msra.mxu0 %v5318_v34  ;;  %4005 = vmatpush1.bf16.msra.mxu1 %v5321_v35  ;;  %v5413_v34 = vld [vmem:[%s7814_s1 + $0x6a8] ss:$16 sps:$4 sm:$0xff]   ;;  %v5418_v35 = vld [vmem:[%s7814_s1 + $0x6c4] ss:$16 sps:$4 sm:$0xff]  }
  0x9c   :  { %3637 = vmatprep.subr.bf16.mxu0 %v5326_v36  ;;  %4006 = vmatprep.subr.bf16.mxu1 %v5329_v37  ;;  %v5421_v36 = vld [vmem:[%s7814_s1 + $0x6cc] ss:$16 sps:$4 sm:$0xff]   ;;  %v5416_v37 = vld [vmem:[%s7814_s1 + $0x6c0] ss:$16 sps:$4 sm:$0xff]  }
  0x9f   :  { %3638 = vmatpush1.bf16.msra.mxu0 %v5324_v38  ;;  %4007 = vmatpush1.bf16.msra.mxu1 %v5327_v39  ;;  %v5419_v38 = vld [vmem:[%s7814_s1 + $0x6c8] ss:$16 sps:$4 sm:$0xff]   ;;  %v5424_v39 = vld [vmem:[%s7814_s1 + $0x6e4] ss:$16 sps:$4 sm:$0xff]  }
  0xa0   :  { %3639 = vmatprep.subr.bf16.mxu0 %v5332_v40  ;;  %4008 = vmatprep.subr.bf16.mxu1 %v5335_v41  ;;  %v5427_v40 = vld [vmem:[%s7814_s1 + $0x6ec] ss:$16 sps:$4 sm:$0xff]   ;;  %v5422_v41 = vld [vmem:[%s7814_s1 + $0x6e0] ss:$16 sps:$4 sm:$0xff]  }
  0xa3   :  { %3640 = vmatpush1.bf16.msra.mxu0 %v5330_v42  ;;  %4009 = vmatpush1.bf16.msra.mxu1 %v5333_v43  ;;  %v5425_v42 = vld [vmem:[%s7814_s1 + $0x6e8] ss:$16 sps:$4 sm:$0xff]   ;;  %v5430_v43 = vld [vmem:[%s7814_s1 + $0x704] ss:$16 sps:$4 sm:$0xff]  }
  0xa4   :  { %3641 = vmatprep.subr.bf16.mxu0 %v5338_v44  ;;  %4010 = vmatprep.subr.bf16.mxu1 %v5341_v45  ;;  %v5433_v44 = vld [vmem:[%s7814_s1 + $0x70c] ss:$16 sps:$4 sm:$0xff]   ;;  %v5428_v45 = vld [vmem:[%s7814_s1 + $0x700] ss:$16 sps:$4 sm:$0xff]  }
  0xa7   :  { %3642 = vmatpush1.bf16.msra.mxu0 %v5336_v46  ;;  %4011 = vmatpush1.bf16.msra.mxu1 %v5339_v47  ;;  %v5431_v46 = vld [vmem:[%s7814_s1 + $0x708] ss:$16 sps:$4 sm:$0xff]   ;;  %v5436_v47 = vld [vmem:[%s7814_s1 + $0x724] ss:$16 sps:$4 sm:$0xff]  }
  0xa8   :  { %3643 = vmatprep.subr.bf16.mxu0 %v5344_v48  ;;  %4012 = vmatprep.subr.bf16.mxu1 %v5347_v49  ;;  %v5439_v48 = vld [vmem:[%s7814_s1 + $0x72c] ss:$16 sps:$4 sm:$0xff]   ;;  %v5434_v49 = vld [vmem:[%s7814_s1 + $0x720] ss:$16 sps:$4 sm:$0xff]  }
  0xab   :  { %3644 = vmatpush1.bf16.msra.mxu0 %v5342_v50  ;;  %4013 = vmatpush1.bf16.msra.mxu1 %v5345_v51  ;;  %v5437_v50 = vld [vmem:[%s7814_s1 + $0x728] ss:$16 sps:$4 sm:$0xff]   ;;  %v5442_v51 = vld [vmem:[%s7814_s1 + $0x744] ss:$16 sps:$4 sm:$0xff]  }
  0xac   :  { %3645 = vmatprep.subr.bf16.mxu0 %v5350_v52  ;;  %4014 = vmatprep.subr.bf16.mxu1 %v5353_v53  ;;  %v5445_v52 = vld [vmem:[%s7814_s1 + $0x74c] ss:$16 sps:$4 sm:$0xff]   ;;  %v5440_v53 = vld [vmem:[%s7814_s1 + $0x740] ss:$16 sps:$4 sm:$0xff]  }
  0xaf   :  { %3646 = vmatpush1.bf16.msra.mxu0 %v5348_v54  ;;  %4015 = vmatpush1.bf16.msra.mxu1 %v5351_v55  ;;  %v5443_v54 = vld [vmem:[%s7814_s1 + $0x748] ss:$16 sps:$4 sm:$0xff]   ;;  %v5448_v55 = vld [vmem:[%s7814_s1 + $0x764] ss:$16 sps:$4 sm:$0xff]  }
  0xb0   :  { %3647 = vmatprep.subr.bf16.mxu0 %v5356_v56  ;;  %4016 = vmatprep.subr.bf16.mxu1 %v5359_v57  ;;  %v5451_v56 = vld [vmem:[%s7814_s1 + $0x76c] ss:$16 sps:$4 sm:$0xff]   ;;  %v5446_v57 = vld [vmem:[%s7814_s1 + $0x760] ss:$16 sps:$4 sm:$0xff]  }
  0xb3   :  { %3648 = vmatpush1.bf16.msra.mxu0 %v5354_v58  ;;  %4017 = vmatpush1.bf16.msra.mxu1 %v5357_v59  ;;  %v5449_v58 = vld [vmem:[%s7814_s1 + $0x768] ss:$16 sps:$4 sm:$0xff]   ;;  %v5454_v59 = vld [vmem:[%s7814_s1 + $0x784] ss:$16 sps:$4 sm:$0xff]  }
  0xb4   :  { %3649 = vmatprep.subr.bf16.mxu0 %v5362_v60  ;;  %4018 = vmatprep.subr.bf16.mxu1 %v5365_v61  ;;  %v5457_v60 = vld [vmem:[%s7814_s1 + $0x78c] ss:$16 sps:$4 sm:$0xff]   ;;  %v5452_v61 = vld [vmem:[%s7814_s1 + $0x780] ss:$16 sps:$4 sm:$0xff]  }
  0xb7   :  { %3650 = vmatpush1.bf16.msra.mxu0 %v5360_v62  ;;  %4019 = vmatpush1.bf16.msra.mxu1 %v5363_v63  ;;  %v5455_v62 = vld [vmem:[%s7814_s1 + $0x788] ss:$16 sps:$4 sm:$0xff]   ;;  %v5460_v63 = vld [vmem:[%s7814_s1 + $0x7a4] ss:$16 sps:$4 sm:$0xff]  }
  0xb8   :  { %3651 = vmatprep.subr.bf16.mxu0 %v5368_v0  ;;  %4020 = vmatprep.subr.bf16.mxu1 %v5371_v1  ;;  %v5463_v0 = vld [vmem:[%s7814_s1 + $0x7ac] ss:$16 sps:$4 sm:$0xff]   ;;  %v5458_v1 = vld [vmem:[%s7814_s1 + $0x7a0] ss:$16 sps:$4 sm:$0xff]  }
  0xbb   :  { %3652 = vmatpush1.bf16.msra.mxu0 %v5366_v2  ;;  %4021 = vmatpush1.bf16.msra.mxu1 %v5369_v3  ;;  %v5461_v2 = vld [vmem:[%s7814_s1 + $0x7a8] ss:$16 sps:$4 sm:$0xff]   ;;  %v5466_v3 = vld [vmem:[%s7814_s1 + $0x7c4] ss:$16 sps:$4 sm:$0xff]  }
  0xbc   :  { %3653 = vmatprep.subr.bf16.mxu0 %v5374_v4  ;;  %4022 = vmatprep.subr.bf16.mxu1 %v5377_v5  ;;  %v5469_v4 = vld [vmem:[%s7814_s1 + $0x7cc] ss:$16 sps:$4 sm:$0xff]   ;;  %v5464_v5 = vld [vmem:[%s7814_s1 + $0x7c0] ss:$16 sps:$4 sm:$0xff]  }
  0xbf   :  { %3654 = vmatpush1.bf16.msra.mxu0 %v5372_v6  ;;  %4023 = vmatpush1.bf16.msra.mxu1 %v5375_v7  ;;  %v5467_v6 = vld [vmem:[%s7814_s1 + $0x7c8] ss:$16 sps:$4 sm:$0xff]   ;;  %v5472_v7 = vld [vmem:[%s7814_s1 + $0x7e4] ss:$16 sps:$4 sm:$0xff]  }
  0xc0   :  { %3664 = vmatprep.subr.bf16.mxu0 %v5382_v8  ;;  %4033 = vmatprep.subr.bf16.mxu1 %v5385_v9  ;;  %v5475_v8 = vld [vmem:[%s7814_s1 + $0x7ec] ss:$16 sps:$4 sm:$0xff]   ;;  %v5470_v9 = vld [vmem:[%s7814_s1 + $0x7e0] ss:$16 sps:$4 sm:$0xff]  }
  0xc2   :  { %3656 = vmatmul.mubr.bf16.vlgmr.msra.gmra.mrb[0].mxu0 %v4426_v12  ;;  %4025 = vmatmul.mubr.bf16.vlgmr.msra.gmra.mrb[0].mxu1 %v4426_v12  ;;  %v5480_v12 = vld [vmem:[%s7814_s1 + $0x804] ss:$16 sps:$4 sm:$0xff]  }
  0xc3   :  { %3665 = vmatpush1.bf16.msra.mxu0 %v5380_v10  ;;  %4034 = vmatpush1.bf16.msra.mxu1 %v5383_v13  ;;  %v5473_v10 = vld [vmem:[%s7814_s1 + $0x7e8] ss:$16 sps:$4 sm:$0xff]   ;;  %v5483_v13 = vld [vmem:[%s7814_s1 + $0x80c] ss:$16 sps:$4 sm:$0xff]  }
  0xc4   :  { %3666 = vmatprep.subr.bf16.mxu0 %v5388_v15  ;;  %4035 = vmatprep.subr.bf16.mxu1 %v5391_v11  ;;  %v5478_v15 = vld [vmem:[%s7814_s1 + $0x800] ss:$16 sps:$4 sm:$0xff]   ;;  %v4428_v11 = vcombine.low %v6601_v14, %v6601_v14  ;;  %v5489_v14 = vld [vmem:[%s7814_s1 + $0x82c] ss:$16 sps:$4 sm:$0xff]  }
  0xc5   :  { %3696 = vmatprep.mubr.bf16.mxu0 %v4429_v16  ;;  %4065 = vmatprep.mubr.bf16.mxu1 %v4429_v16  ;;  %v6799_v16 = vld [vmem:[%s7815_s0 + $0x20] sm:$0xff] }
  0xc7   :  { %3667 = vmatpush1.bf16.msra.mxu0 %v5386_v17  ;;  %4036 = vmatpush1.bf16.msra.mxu1 %v5389_v18  ;;  %v5481_v17 = vld [vmem:[%s7814_s1 + $0x808] ss:$16 sps:$4 sm:$0xff]   ;;  %v5486_v18 = vld [vmem:[%s7814_s1 + $0x824] ss:$16 sps:$4 sm:$0xff]  }
  0xc8   :  { %3668 = vmatprep.subr.bf16.mxu0 %v5394_v19  ;;  %4037 = vmatprep.subr.bf16.mxu1 %v5397_v20  ;;  %v4431_v19 = vcombine.high %v6799_v16, %v6799_v16  ;;  %v5484_v20 = vld [vmem:[%s7814_s1 + $0x820] ss:$16 sps:$4 sm:$0xff]  }
  0xcb   :  { %3669 = vmatpush1.bf16.msra.mxu0 %v5392_v21  ;;  %4038 = vmatpush1.bf16.msra.mxu1 %v5395_v22  ;;  %v5487_v21 = vld [vmem:[%s7814_s1 + $0x828] ss:$16 sps:$4 sm:$0xff]   ;;  %v5492_v22 = vld [vmem:[%s7814_s1 + $0x844] ss:$16 sps:$4 sm:$0xff]  }
  0xcc   :  { %3670 = vmatprep.subr.bf16.mxu0 %v5400_v23  ;;  %4039 = vmatprep.subr.bf16.mxu1 %v5403_v24  ;;  %v5495_v23 = vld [vmem:[%s7814_s1 + $0x84c] ss:$16 sps:$4 sm:$0xff]   ;;  %v5490_v24 = vld [vmem:[%s7814_s1 + $0x840] ss:$16 sps:$4 sm:$0xff]  }
  0xcf   :  { %3671 = vmatpush1.bf16.msra.mxu0 %v5398_v25  ;;  %4040 = vmatpush1.bf16.msra.mxu1 %v5401_v26  ;;  %v5493_v25 = vld [vmem:[%s7814_s1 + $0x848] ss:$16 sps:$4 sm:$0xff]   ;;  %v5498_v26 = vld [vmem:[%s7814_s1 + $0x864] ss:$16 sps:$4 sm:$0xff]  }
  0xd0   :  { %3672 = vmatprep.subr.bf16.mxu0 %v5406_v27  ;;  %4041 = vmatprep.subr.bf16.mxu1 %v5409_v28  ;;  %v5501_v27 = vld [vmem:[%s7814_s1 + $0x86c] ss:$16 sps:$4 sm:$0xff]   ;;  %v5496_v28 = vld [vmem:[%s7814_s1 + $0x860] ss:$16 sps:$4 sm:$0xff]  }
  0xd3   :  { %3673 = vmatpush1.bf16.msra.mxu0 %v5404_v29  ;;  %4042 = vmatpush1.bf16.msra.mxu1 %v5407_v30  ;;  %v5499_v29 = vld [vmem:[%s7814_s1 + $0x868] ss:$16 sps:$4 sm:$0xff]   ;;  %v5504_v30 = vld [vmem:[%s7814_s1 + $0x884] ss:$16 sps:$4 sm:$0xff]  }
  0xd4   :  { %3674 = vmatprep.subr.bf16.mxu0 %v5412_v31  ;;  %4043 = vmatprep.subr.bf16.mxu1 %v5415_v32  ;;  %v5507_v31 = vld [vmem:[%s7814_s1 + $0x88c] ss:$16 sps:$4 sm:$0xff]   ;;  %v5502_v32 = vld [vmem:[%s7814_s1 + $0x880] ss:$16 sps:$4 sm:$0xff]  }
  0xd7   :  { %3675 = vmatpush1.bf16.msra.mxu0 %v5410_v33  ;;  %4044 = vmatpush1.bf16.msra.mxu1 %v5413_v34  ;;  %v5505_v33 = vld [vmem:[%s7814_s1 + $0x888] ss:$16 sps:$4 sm:$0xff]   ;;  %v5510_v34 = vld [vmem:[%s7814_s1 + $0x8a4] ss:$16 sps:$4 sm:$0xff]  }
  0xd8   :  { %3676 = vmatprep.subr.bf16.mxu0 %v5418_v35  ;;  %4045 = vmatprep.subr.bf16.mxu1 %v5421_v36  ;;  %v5513_v35 = vld [vmem:[%s7814_s1 + $0x8ac] ss:$16 sps:$4 sm:$0xff]   ;;  %v5508_v36 = vld [vmem:[%s7814_s1 + $0x8a0] ss:$16 sps:$4 sm:$0xff]  }
  0xdb   :  { %3677 = vmatpush1.bf16.msra.mxu0 %v5416_v37  ;;  %4046 = vmatpush1.bf16.msra.mxu1 %v5419_v38  ;;  %v5511_v37 = vld [vmem:[%s7814_s1 + $0x8a8] ss:$16 sps:$4 sm:$0xff]   ;;  %v5516_v38 = vld [vmem:[%s7814_s1 + $0x8c4] ss:$16 sps:$4 sm:$0xff]  }
  0xdc   :  { %3678 = vmatprep.subr.bf16.mxu0 %v5424_v39  ;;  %4047 = vmatprep.subr.bf16.mxu1 %v5427_v40  ;;  %v5519_v39 = vld [vmem:[%s7814_s1 + $0x8cc] ss:$16 sps:$4 sm:$0xff]   ;;  %v5514_v40 = vld [vmem:[%s7814_s1 + $0x8c0] ss:$16 sps:$4 sm:$0xff]  }
  0xdf   :  { %3679 = vmatpush1.bf16.msra.mxu0 %v5422_v41  ;;  %4048 = vmatpush1.bf16.msra.mxu1 %v5425_v42  ;;  %v5517_v41 = vld [vmem:[%s7814_s1 + $0x8c8] ss:$16 sps:$4 sm:$0xff]   ;;  %v5522_v42 = vld [vmem:[%s7814_s1 + $0x8e4] ss:$16 sps:$4 sm:$0xff]  }
  0xe0   :  { %3680 = vmatprep.subr.bf16.mxu0 %v5430_v43  ;;  %4049 = vmatprep.subr.bf16.mxu1 %v5433_v44  ;;  %v5525_v43 = vld [vmem:[%s7814_s1 + $0x8ec] ss:$16 sps:$4 sm:$0xff]   ;;  %v5520_v44 = vld [vmem:[%s7814_s1 + $0x8e0] ss:$16 sps:$4 sm:$0xff]  }
  0xe3   :  { %3681 = vmatpush1.bf16.msra.mxu0 %v5428_v45  ;;  %4050 = vmatpush1.bf16.msra.mxu1 %v5431_v46  ;;  %v5523_v45 = vld [vmem:[%s7814_s1 + $0x8e8] ss:$16 sps:$4 sm:$0xff]   ;;  %v5528_v46 = vld [vmem:[%s7814_s1 + $0x904] ss:$16 sps:$4 sm:$0xff]  }
  0xe4   :  { %3682 = vmatprep.subr.bf16.mxu0 %v5436_v47  ;;  %4051 = vmatprep.subr.bf16.mxu1 %v5439_v48  ;;  %v5531_v47 = vld [vmem:[%s7814_s1 + $0x90c] ss:$16 sps:$4 sm:$0xff]   ;;  %v5526_v48 = vld [vmem:[%s7814_s1 + $0x900] ss:$16 sps:$4 sm:$0xff]  }
  0xe7   :  { %3683 = vmatpush1.bf16.msra.mxu0 %v5434_v49  ;;  %4052 = vmatpush1.bf16.msra.mxu1 %v5437_v50  ;;  %v5529_v49 = vld [vmem:[%s7814_s1 + $0x908] ss:$16 sps:$4 sm:$0xff]   ;;  %v5534_v50 = vld [vmem:[%s7814_s1 + $0x924] ss:$16 sps:$4 sm:$0xff]  }
  0xe8   :  { %3684 = vmatprep.subr.bf16.mxu0 %v5442_v51  ;;  %4053 = vmatprep.subr.bf16.mxu1 %v5445_v52  ;;  %v5537_v51 = vld [vmem:[%s7814_s1 + $0x92c] ss:$16 sps:$4 sm:$0xff]   ;;  %v5532_v52 = vld [vmem:[%s7814_s1 + $0x920] ss:$16 sps:$4 sm:$0xff]  }
  0xeb   :  { %3685 = vmatpush1.bf16.msra.mxu0 %v5440_v53  ;;  %4054 = vmatpush1.bf16.msra.mxu1 %v5443_v54  ;;  %v5535_v53 = vld [vmem:[%s7814_s1 + $0x928] ss:$16 sps:$4 sm:$0xff]   ;;  %v5540_v54 = vld [vmem:[%s7814_s1 + $0x944] ss:$16 sps:$4 sm:$0xff]  }
  0xec   :  { %3686 = vmatprep.subr.bf16.mxu0 %v5448_v55  ;;  %4055 = vmatprep.subr.bf16.mxu1 %v5451_v56  ;;  %v5543_v55 = vld [vmem:[%s7814_s1 + $0x94c] ss:$16 sps:$4 sm:$0xff]   ;;  %v5538_v56 = vld [vmem:[%s7814_s1 + $0x940] ss:$16 sps:$4 sm:$0xff]  }
  0xef   :  { %3687 = vmatpush1.bf16.msra.mxu0 %v5446_v57  ;;  %4056 = vmatpush1.bf16.msra.mxu1 %v5449_v58  ;;  %v5541_v57 = vld [vmem:[%s7814_s1 + $0x948] ss:$16 sps:$4 sm:$0xff]   ;;  %v5546_v58 = vld [vmem:[%s7814_s1 + $0x964] ss:$16 sps:$4 sm:$0xff]  }
  0xf0   :  { %3688 = vmatprep.subr.bf16.mxu0 %v5454_v59  ;;  %4057 = vmatprep.subr.bf16.mxu1 %v5457_v60  ;;  %v5549_v59 = vld [vmem:[%s7814_s1 + $0x96c] ss:$16 sps:$4 sm:$0xff]   ;;  %v5544_v60 = vld [vmem:[%s7814_s1 + $0x960] ss:$16 sps:$4 sm:$0xff]  }
  0xf3   :  { %3689 = vmatpush1.bf16.msra.mxu0 %v5452_v61  ;;  %4058 = vmatpush1.bf16.msra.mxu1 %v5455_v62  ;;  %v5547_v61 = vld [vmem:[%s7814_s1 + $0x968] ss:$16 sps:$4 sm:$0xff]   ;;  %v5552_v62 = vld [vmem:[%s7814_s1 + $0x984] ss:$16 sps:$4 sm:$0xff]  }
  0xf4   :  { %3690 = vmatprep.subr.bf16.mxu0 %v5460_v63  ;;  %4059 = vmatprep.subr.bf16.mxu1 %v5463_v0  ;;  %v5555_v63 = vld [vmem:[%s7814_s1 + $0x98c] ss:$16 sps:$4 sm:$0xff]   ;;  %v5550_v0 = vld [vmem:[%s7814_s1 + $0x980] ss:$16 sps:$4 sm:$0xff]  }
  0xf7   :  { %3691 = vmatpush1.bf16.msra.mxu0 %v5458_v1  ;;  %4060 = vmatpush1.bf16.msra.mxu1 %v5461_v2  ;;  %v5553_v1 = vld [vmem:[%s7814_s1 + $0x988] ss:$16 sps:$4 sm:$0xff]   ;;  %v5558_v2 = vld [vmem:[%s7814_s1 + $0x9a4] ss:$16 sps:$4 sm:$0xff]  }
  0xf8   :  { %3692 = vmatprep.subr.bf16.mxu0 %v5466_v3  ;;  %4061 = vmatprep.subr.bf16.mxu1 %v5469_v4  ;;  %v5561_v3 = vld [vmem:[%s7814_s1 + $0x9ac] ss:$16 sps:$4 sm:$0xff]   ;;  %v5556_v4 = vld [vmem:[%s7814_s1 + $0x9a0] ss:$16 sps:$4 sm:$0xff]  }
  0xfb   :  { %3693 = vmatpush1.bf16.msra.mxu0 %v5464_v5  ;;  %4062 = vmatpush1.bf16.msra.mxu1 %v5467_v6  ;;  %v5559_v5 = vld [vmem:[%s7814_s1 + $0x9a8] ss:$16 sps:$4 sm:$0xff]   ;;  %v5564_v6 = vld [vmem:[%s7814_s1 + $0x9c4] ss:$16 sps:$4 sm:$0xff]  }
  0xfc   :  { %3694 = vmatprep.subr.bf16.mxu0 %v5472_v7  ;;  %4063 = vmatprep.subr.bf16.mxu1 %v5475_v8  ;;  %v5567_v7 = vld [vmem:[%s7814_s1 + $0x9cc] ss:$16 sps:$4 sm:$0xff]   ;;  %v5562_v8 = vld [vmem:[%s7814_s1 + $0x9c0] ss:$16 sps:$4 sm:$0xff]  }
  0xff   :  { %3695 = vmatpush1.bf16.msra.mxu0 %v5470_v9  ;;  %4064 = vmatpush1.bf16.msra.mxu1 %v5473_v10  ;;  %v5565_v9 = vld [vmem:[%s7814_s1 + $0x9c8] ss:$16 sps:$4 sm:$0xff]   ;;  %v5570_v10 = vld [vmem:[%s7814_s1 + $0x9e4] ss:$16 sps:$4 sm:$0xff]  }
 0x100   :  { %3705 = vmatprep.subr.bf16.mxu0 %v5480_v12  ;;  %4074 = vmatprep.subr.bf16.mxu1 %v5483_v13  ;;  %v5573_v12 = vld [vmem:[%s7814_s1 + $0x9ec] ss:$16 sps:$4 sm:$0xff]   ;;  %v5568_v13 = vld [vmem:[%s7814_s1 + $0x9e0] ss:$16 sps:$4 sm:$0xff]  }
 0x102   :  { %3697 = vmatmul.mubr.bf16.vlgmr.msra.gmra.mrb[0].mxu0 %v4428_v11  ;;  %4066 = vmatmul.mubr.bf16.vlgmr.msra.gmra.mrb[0].mxu1 %v4428_v11  ;;  %v5578_v11 = vld [vmem:[%s7814_s1 + $0xa04] ss:$16 sps:$4 sm:$0xff]  }
 0x103   :  { %3706 = vmatpush1.bf16.msra.mxu0 %v5478_v15  ;;  %4075 = vmatpush1.bf16.msra.mxu1 %v5481_v17  ;;  %v5571_v15 = vld [vmem:[%s7814_s1 + $0x9e8] ss:$16 sps:$4 sm:$0xff]   ;;  %v5581_v17 = vld [vmem:[%s7814_s1 + $0xa0c] ss:$16 sps:$4 sm:$0xff]  }
 0x104   :  { %3707 = vmatprep.subr.bf16.mxu0 %v5486_v18  ;;  %4076 = vmatprep.subr.bf16.mxu1 %v5489_v14  ;;  %v6995_v18 = vld [vmem:[%s7815_s0 + $0x28] sm:$0xff]  ;;  %v4430_v14 = vcombine.low %v6799_v16, %v6799_v16 }
 0x105   :  { %3737 = vmatprep.mubr.bf16.mxu0 %v4431_v19  ;;  %4106 = vmatprep.mubr.bf16.mxu1 %v4431_v19  ;;  %v5576_v19 = vld [vmem:[%s7814_s1 + $0xa00] ss:$16 sps:$4 sm:$0xff]   ;;  %v5587_v16 = vld [vmem:[%s7814_s1 + $0xa2c] ss:$16 sps:$4 sm:$0xff]  }
 0x107   :  { %3708 = vmatpush1.bf16.msra.mxu0 %v5484_v20  ;;  %4077 = vmatpush1.bf16.msra.mxu1 %v5487_v21  ;;  %v5579_v20 = vld [vmem:[%s7814_s1 + $0xa08] ss:$16 sps:$4 sm:$0xff]   ;;  %v5584_v21 = vld [vmem:[%s7814_s1 + $0xa24] ss:$16 sps:$4 sm:$0xff]  }
 0x108   :  { %3709 = vmatprep.subr.bf16.mxu0 %v5492_v22  ;;  %4078 = vmatprep.subr.bf16.mxu1 %v5495_v23  ;;  %v4433_v22 = vcombine.high %v6995_v18, %v6995_v18  ;;  %v5582_v23 = vld [vmem:[%s7814_s1 + $0xa20] ss:$16 sps:$4 sm:$0xff]  }
 0x10b   :  { %3710 = vmatpush1.bf16.msra.mxu0 %v5490_v24  ;;  %4079 = vmatpush1.bf16.msra.mxu1 %v5493_v25  ;;  %v5585_v24 = vld [vmem:[%s7814_s1 + $0xa28] ss:$16 sps:$4 sm:$0xff]   ;;  %v5590_v25 = vld [vmem:[%s7814_s1 + $0xa44] ss:$16 sps:$4 sm:$0xff]  }
 0x10c   :  { %3711 = vmatprep.subr.bf16.mxu0 %v5498_v26  ;;  %4080 = vmatprep.subr.bf16.mxu1 %v5501_v27  ;;  %v5593_v26 = vld [vmem:[%s7814_s1 + $0xa4c] ss:$16 sps:$4 sm:$0xff]   ;;  %v5588_v27 = vld [vmem:[%s7814_s1 + $0xa40] ss:$16 sps:$4 sm:$0xff]  }
 0x10f   :  { %3712 = vmatpush1.bf16.msra.mxu0 %v5496_v28  ;;  %4081 = vmatpush1.bf16.msra.mxu1 %v5499_v29  ;;  %v5591_v28 = vld [vmem:[%s7814_s1 + $0xa48] ss:$16 sps:$4 sm:$0xff]   ;;  %v5596_v29 = vld [vmem:[%s7814_s1 + $0xa64] ss:$16 sps:$4 sm:$0xff]  }
 0x110   :  { %3713 = vmatprep.subr.bf16.mxu0 %v5504_v30  ;;  %4082 = vmatprep.subr.bf16.mxu1 %v5507_v31  ;;  %v5599_v30 = vld [vmem:[%s7814_s1 + $0xa6c] ss:$16 sps:$4 sm:$0xff]   ;;  %v5594_v31 = vld [vmem:[%s7814_s1 + $0xa60] ss:$16 sps:$4 sm:$0xff]  }
 0x113   :  { %3714 = vmatpush1.bf16.msra.mxu0 %v5502_v32  ;;  %4083 = vmatpush1.bf16.msra.mxu1 %v5505_v33  ;;  %v5597_v32 = vld [vmem:[%s7814_s1 + $0xa68] ss:$16 sps:$4 sm:$0xff]   ;;  %v5602_v33 = vld [vmem:[%s7814_s1 + $0xa84] ss:$16 sps:$4 sm:$0xff]  }
 0x114   :  { %3715 = vmatprep.subr.bf16.mxu0 %v5510_v34  ;;  %4084 = vmatprep.subr.bf16.mxu1 %v5513_v35  ;;  %v5605_v34 = vld [vmem:[%s7814_s1 + $0xa8c] ss:$16 sps:$4 sm:$0xff]   ;;  %v5600_v35 = vld [vmem:[%s7814_s1 + $0xa80] ss:$16 sps:$4 sm:$0xff]  }
 0x117   :  { %3716 = vmatpush1.bf16.msra.mxu0 %v5508_v36  ;;  %4085 = vmatpush1.bf16.msra.mxu1 %v5511_v37  ;;  %v5603_v36 = vld [vmem:[%s7814_s1 + $0xa88] ss:$16 sps:$4 sm:$0xff]   ;;  %v5608_v37 = vld [vmem:[%s7814_s1 + $0xaa4] ss:$16 sps:$4 sm:$0xff]  }
 0x118   :  { %3717 = vmatprep.subr.bf16.mxu0 %v5516_v38  ;;  %4086 = vmatprep.subr.bf16.mxu1 %v5519_v39  ;;  %v5611_v38 = vld [vmem:[%s7814_s1 + $0xaac] ss:$16 sps:$4 sm:$0xff]   ;;  %v5606_v39 = vld [vmem:[%s7814_s1 + $0xaa0] ss:$16 sps:$4 sm:$0xff]  }
 0x11b   :  { %3718 = vmatpush1.bf16.msra.mxu0 %v5514_v40  ;;  %4087 = vmatpush1.bf16.msra.mxu1 %v5517_v41  ;;  %v5609_v40 = vld [vmem:[%s7814_s1 + $0xaa8] ss:$16 sps:$4 sm:$0xff]   ;;  %v5614_v41 = vld [vmem:[%s7814_s1 + $0xac4] ss:$16 sps:$4 sm:$0xff]  }
 0x11c   :  { %3719 = vmatprep.subr.bf16.mxu0 %v5522_v42  ;;  %4088 = vmatprep.subr.bf16.mxu1 %v5525_v43  ;;  %v5617_v42 = vld [vmem:[%s7814_s1 + $0xacc] ss:$16 sps:$4 sm:$0xff]   ;;  %v5612_v43 = vld [vmem:[%s7814_s1 + $0xac0] ss:$16 sps:$4 sm:$0xff]  }
 0x11f   :  { %3720 = vmatpush1.bf16.msra.mxu0 %v5520_v44  ;;  %4089 = vmatpush1.bf16.msra.mxu1 %v5523_v45  ;;  %v5615_v44 = vld [vmem:[%s7814_s1 + $0xac8] ss:$16 sps:$4 sm:$0xff]   ;;  %v5620_v45 = vld [vmem:[%s7814_s1 + $0xae4] ss:$16 sps:$4 sm:$0xff]  }
 0x120   :  { %3721 = vmatprep.subr.bf16.mxu0 %v5528_v46  ;;  %4090 = vmatprep.subr.bf16.mxu1 %v5531_v47  ;;  %v5623_v46 = vld [vmem:[%s7814_s1 + $0xaec] ss:$16 sps:$4 sm:$0xff]   ;;  %v5618_v47 = vld [vmem:[%s7814_s1 + $0xae0] ss:$16 sps:$4 sm:$0xff]  }
 0x123   :  { %3722 = vmatpush1.bf16.msra.mxu0 %v5526_v48  ;;  %4091 = vmatpush1.bf16.msra.mxu1 %v5529_v49  ;;  %v5621_v48 = vld [vmem:[%s7814_s1 + $0xae8] ss:$16 sps:$4 sm:$0xff]   ;;  %v5626_v49 = vld [vmem:[%s7814_s1 + $0xb04] ss:$16 sps:$4 sm:$0xff]  }
 0x124   :  { %3723 = vmatprep.subr.bf16.mxu0 %v5534_v50  ;;  %4092 = vmatprep.subr.bf16.mxu1 %v5537_v51  ;;  %v5629_v50 = vld [vmem:[%s7814_s1 + $0xb0c] ss:$16 sps:$4 sm:$0xff]   ;;  %v5624_v51 = vld [vmem:[%s7814_s1 + $0xb00] ss:$16 sps:$4 sm:$0xff]  }
 0x127   :  { %3724 = vmatpush1.bf16.msra.mxu0 %v5532_v52  ;;  %4093 = vmatpush1.bf16.msra.mxu1 %v5535_v53  ;;  %v5627_v52 = vld [vmem:[%s7814_s1 + $0xb08] ss:$16 sps:$4 sm:$0xff]   ;;  %v5632_v53 = vld [vmem:[%s7814_s1 + $0xb24] ss:$16 sps:$4 sm:$0xff]  }
 0x128   :  { %3725 = vmatprep.subr.bf16.mxu0 %v5540_v54  ;;  %4094 = vmatprep.subr.bf16.mxu1 %v5543_v55  ;;  %v5635_v54 = vld [vmem:[%s7814_s1 + $0xb2c] ss:$16 sps:$4 sm:$0xff]   ;;  %v5630_v55 = vld [vmem:[%s7814_s1 + $0xb20] ss:$16 sps:$4 sm:$0xff]  }
 0x12b   :  { %3726 = vmatpush1.bf16.msra.mxu0 %v5538_v56  ;;  %4095 = vmatpush1.bf16.msra.mxu1 %v5541_v57  ;;  %v5633_v56 = vld [vmem:[%s7814_s1 + $0xb28] ss:$16 sps:$4 sm:$0xff]   ;;  %v5638_v57 = vld [vmem:[%s7814_s1 + $0xb44] ss:$16 sps:$4 sm:$0xff]  }
 0x12c   :  { %3727 = vmatprep.subr.bf16.mxu0 %v5546_v58  ;;  %4096 = vmatprep.subr.bf16.mxu1 %v5549_v59  ;;  %v5641_v58 = vld [vmem:[%s7814_s1 + $0xb4c] ss:$16 sps:$4 sm:$0xff]   ;;  %v5636_v59 = vld [vmem:[%s7814_s1 + $0xb40] ss:$16 sps:$4 sm:$0xff]  }
 0x12f   :  { %3728 = vmatpush1.bf16.msra.mxu0 %v5544_v60  ;;  %4097 = vmatpush1.bf16.msra.mxu1 %v5547_v61  ;;  %v5639_v60 = vld [vmem:[%s7814_s1 + $0xb48] ss:$16 sps:$4 sm:$0xff]   ;;  %v5644_v61 = vld [vmem:[%s7814_s1 + $0xb64] ss:$16 sps:$4 sm:$0xff]  }
 0x130   :  { %3729 = vmatprep.subr.bf16.mxu0 %v5552_v62  ;;  %4098 = vmatprep.subr.bf16.mxu1 %v5555_v63  ;;  %v5647_v62 = vld [vmem:[%s7814_s1 + $0xb6c] ss:$16 sps:$4 sm:$0xff]   ;;  %v5642_v63 = vld [vmem:[%s7814_s1 + $0xb60] ss:$16 sps:$4 sm:$0xff]  }
 0x133   :  { %3730 = vmatpush1.bf16.msra.mxu0 %v5550_v0  ;;  %4099 = vmatpush1.bf16.msra.mxu1 %v5553_v1  ;;  %v5645_v0 = vld [vmem:[%s7814_s1 + $0xb68] ss:$16 sps:$4 sm:$0xff]   ;;  %v5650_v1 = vld [vmem:[%s7814_s1 + $0xb84] ss:$16 sps:$4 sm:$0xff]  }
 0x134   :  { %3731 = vmatprep.subr.bf16.mxu0 %v5558_v2  ;;  %4100 = vmatprep.subr.bf16.mxu1 %v5561_v3  ;;  %v5653_v2 = vld [vmem:[%s7814_s1 + $0xb8c] ss:$16 sps:$4 sm:$0xff]   ;;  %v5648_v3 = vld [vmem:[%s7814_s1 + $0xb80] ss:$16 sps:$4 sm:$0xff]  }
 0x137   :  { %3732 = vmatpush1.bf16.msra.mxu0 %v5556_v4  ;;  %4101 = vmatpush1.bf16.msra.mxu1 %v5559_v5  ;;  %v5651_v4 = vld [vmem:[%s7814_s1 + $0xb88] ss:$16 sps:$4 sm:$0xff]   ;;  %v5656_v5 = vld [vmem:[%s7814_s1 + $0xba4] ss:$16 sps:$4 sm:$0xff]  }
 0x138   :  { %3733 = vmatprep.subr.bf16.mxu0 %v5564_v6  ;;  %4102 = vmatprep.subr.bf16.mxu1 %v5567_v7  ;;  %v5659_v6 = vld [vmem:[%s7814_s1 + $0xbac] ss:$16 sps:$4 sm:$0xff]   ;;  %v5654_v7 = vld [vmem:[%s7814_s1 + $0xba0] ss:$16 sps:$4 sm:$0xff]  }
 0x13b   :  { %3734 = vmatpush1.bf16.msra.mxu0 %v5562_v8  ;;  %4103 = vmatpush1.bf16.msra.mxu1 %v5565_v9  ;;  %v5657_v8 = vld [vmem:[%s7814_s1 + $0xba8] ss:$16 sps:$4 sm:$0xff]   ;;  %v5662_v9 = vld [vmem:[%s7814_s1 + $0xbc4] ss:$16 sps:$4 sm:$0xff]  }
 0x13c   :  { %3735 = vmatprep.subr.bf16.mxu0 %v5570_v10  ;;  %4104 = vmatprep.subr.bf16.mxu1 %v5573_v12  ;;  %v5665_v10 = vld [vmem:[%s7814_s1 + $0xbcc] ss:$16 sps:$4 sm:$0xff]   ;;  %v5660_v12 = vld [vmem:[%s7814_s1 + $0xbc0] ss:$16 sps:$4 sm:$0xff]  }
 0x13f   :  { %3736 = vmatpush1.bf16.msra.mxu0 %v5568_v13  ;;  %4105 = vmatpush1.bf16.msra.mxu1 %v5571_v15  ;;  %v5663_v13 = vld [vmem:[%s7814_s1 + $0xbc8] ss:$16 sps:$4 sm:$0xff]   ;;  %v5668_v15 = vld [vmem:[%s7814_s1 + $0xbe4] ss:$16 sps:$4 sm:$0xff]  }
 0x140   :  { %3746 = vmatprep.subr.bf16.mxu0 %v5578_v11  ;;  %4115 = vmatprep.subr.bf16.mxu1 %v5581_v17  ;;  %v5671_v11 = vld [vmem:[%s7814_s1 + $0xbec] ss:$16 sps:$4 sm:$0xff]   ;;  %v5666_v17 = vld [vmem:[%s7814_s1 + $0xbe0] ss:$16 sps:$4 sm:$0xff]  }
 0x142   :  { %3738 = vmatmul.mubr.bf16.vlgmr.msra.gmra.mrb[0].mxu0 %v4430_v14  ;;  %4107 = vmatmul.mubr.bf16.vlgmr.msra.gmra.mrb[0].mxu1 %v4430_v14  ;;  %v5669_v14 = vld [vmem:[%s7814_s1 + $0xbe8] ss:$16 sps:$4 sm:$0xff]  }
 0x143   :  { %3747 = vmatpush1.bf16.msra.mxu0 %v5576_v19  ;;  %4116 = vmatpush1.bf16.msra.mxu1 %v5579_v20  ;;  %v5676_v19 = vld [vmem:[%s7814_s1 + $0xc04] ss:$16 sps:$4 sm:$0xff]   ;;  %v5679_v20 = vld [vmem:[%s7814_s1 + $0xc0c] ss:$16 sps:$4 sm:$0xff]  }
 0x144   :  { %3748 = vmatprep.subr.bf16.mxu0 %v5584_v21  ;;  %4117 = vmatprep.subr.bf16.mxu1 %v5587_v16  ;;  %v4432_v21 = vcombine.low %v6995_v18, %v6995_v18  ;;  %v7198_v16 = vld [vmem:[%s7815_s0 + $0x30] sm:$0xff] }
 0x145   :  { %3778 = vmatprep.mubr.bf16.mxu0 %v4433_v22  ;;  %4147 = vmatprep.mubr.bf16.mxu1 %v4433_v22  ;;  %v5674_v22 = vld [vmem:[%s7814_s1 + $0xc00] ss:$16 sps:$4 sm:$0xff]   ;;  %v5682_v18 = vld [vmem:[%s7814_s1 + $0xc24] ss:$16 sps:$4 sm:$0xff]  }
 0x147   :  { %3749 = vmatpush1.bf16.msra.mxu0 %v5582_v23  ;;  %4118 = vmatpush1.bf16.msra.mxu1 %v5585_v24  ;;  %v5677_v23 = vld [vmem:[%s7814_s1 + $0xc08] ss:$16 sps:$4 sm:$0xff]   ;;  %v5685_v24 = vld [vmem:[%s7814_s1 + $0xc2c] ss:$16 sps:$4 sm:$0xff]  }
 0x148   :  { %3750 = vmatprep.subr.bf16.mxu0 %v5590_v25  ;;  %4119 = vmatprep.subr.bf16.mxu1 %v5593_v26  ;;  %v4435_v25 = vcombine.high %v7198_v16, %v7198_v16  ;;  %v5680_v26 = vld [vmem:[%s7814_s1 + $0xc20] ss:$16 sps:$4 sm:$0xff]  }
 0x14b   :  { %3751 = vmatpush1.bf16.msra.mxu0 %v5588_v27  ;;  %4120 = vmatpush1.bf16.msra.mxu1 %v5591_v28  ;;  %v5683_v27 = vld [vmem:[%s7814_s1 + $0xc28] ss:$16 sps:$4 sm:$0xff]   ;;  %v5688_v28 = vld [vmem:[%s7814_s1 + $0xc44] ss:$16 sps:$4 sm:$0xff]  }
 0x14c   :  { %3752 = vmatprep.subr.bf16.mxu0 %v5596_v29  ;;  %4121 = vmatprep.subr.bf16.mxu1 %v5599_v30  ;;  %v5691_v29 = vld [vmem:[%s7814_s1 + $0xc4c] ss:$16 sps:$4 sm:$0xff]   ;;  %v5686_v30 = vld [vmem:[%s7814_s1 + $0xc40] ss:$16 sps:$4 sm:$0xff]  }
 0x14f   :  { %3753 = vmatpush1.bf16.msra.mxu0 %v5594_v31  ;;  %4122 = vmatpush1.bf16.msra.mxu1 %v5597_v32  ;;  %v5689_v31 = vld [vmem:[%s7814_s1 + $0xc48] ss:$16 sps:$4 sm:$0xff]   ;;  %v5694_v32 = vld [vmem:[%s7814_s1 + $0xc64] ss:$16 sps:$4 sm:$0xff]  }
 0x150   :  { %3754 = vmatprep.subr.bf16.mxu0 %v5602_v33  ;;  %4123 = vmatprep.subr.bf16.mxu1 %v5605_v34  ;;  %v5697_v33 = vld [vmem:[%s7814_s1 + $0xc6c] ss:$16 sps:$4 sm:$0xff]   ;;  %v5692_v34 = vld [vmem:[%s7814_s1 + $0xc60] ss:$16 sps:$4 sm:$0xff]  }
 0x153   :  { %3755 = vmatpush1.bf16.msra.mxu0 %v5600_v35  ;;  %4124 = vmatpush1.bf16.msra.mxu1 %v5603_v36  ;;  %v5695_v35 = vld [vmem:[%s7814_s1 + $0xc68] ss:$16 sps:$4 sm:$0xff]   ;;  %v5700_v36 = vld [vmem:[%s7814_s1 + $0xc84] ss:$16 sps:$4 sm:$0xff]  }
 0x154   :  { %3756 = vmatprep.subr.bf16.mxu0 %v5608_v37  ;;  %4125 = vmatprep.subr.bf16.mxu1 %v5611_v38  ;;  %v5703_v37 = vld [vmem:[%s7814_s1 + $0xc8c] ss:$16 sps:$4 sm:$0xff]   ;;  %v5698_v38 = vld [vmem:[%s7814_s1 + $0xc80] ss:$16 sps:$4 sm:$0xff]  }
 0x157   :  { %3757 = vmatpush1.bf16.msra.mxu0 %v5606_v39  ;;  %4126 = vmatpush1.bf16.msra.mxu1 %v5609_v40  ;;  %v5701_v39 = vld [vmem:[%s7814_s1 + $0xc88] ss:$16 sps:$4 sm:$0xff]   ;;  %v5706_v40 = vld [vmem:[%s7814_s1 + $0xca4] ss:$16 sps:$4 sm:$0xff]  }
 0x158   :  { %3758 = vmatprep.subr.bf16.mxu0 %v5614_v41  ;;  %4127 = vmatprep.subr.bf16.mxu1 %v5617_v42  ;;  %v5709_v41 = vld [vmem:[%s7814_s1 + $0xcac] ss:$16 sps:$4 sm:$0xff]   ;;  %v5704_v42 = vld [vmem:[%s7814_s1 + $0xca0] ss:$16 sps:$4 sm:$0xff]  }
 0x15b   :  { %3759 = vmatpush1.bf16.msra.mxu0 %v5612_v43  ;;  %4128 = vmatpush1.bf16.msra.mxu1 %v5615_v44  ;;  %v5707_v43 = vld [vmem:[%s7814_s1 + $0xca8] ss:$16 sps:$4 sm:$0xff]   ;;  %v5712_v44 = vld [vmem:[%s7814_s1 + $0xcc4] ss:$16 sps:$4 sm:$0xff]  }
 0x15c   :  { %3760 = vmatprep.subr.bf16.mxu0 %v5620_v45  ;;  %4129 = vmatprep.subr.bf16.mxu1 %v5623_v46  ;;  %v5715_v45 = vld [vmem:[%s7814_s1 + $0xccc] ss:$16 sps:$4 sm:$0xff]   ;;  %v5710_v46 = vld [vmem:[%s7814_s1 + $0xcc0] ss:$16 sps:$4 sm:$0xff]  }
 0x15f   :  { %3761 = vmatpush1.bf16.msra.mxu0 %v5618_v47  ;;  %4130 = vmatpush1.bf16.msra.mxu1 %v5621_v48  ;;  %v5713_v47 = vld [vmem:[%s7814_s1 + $0xcc8] ss:$16 sps:$4 sm:$0xff]   ;;  %v5718_v48 = vld [vmem:[%s7814_s1 + $0xce4] ss:$16 sps:$4 sm:$0xff]  }
 0x160   :  { %3762 = vmatprep.subr.bf16.mxu0 %v5626_v49  ;;  %4131 = vmatprep.subr.bf16.mxu1 %v5629_v50  ;;  %v5721_v49 = vld [vmem:[%s7814_s1 + $0xcec] ss:$16 sps:$4 sm:$0xff]   ;;  %v5716_v50 = vld [vmem:[%s7814_s1 + $0xce0] ss:$16 sps:$4 sm:$0xff]  }
 0x163   :  { %3763 = vmatpush1.bf16.msra.mxu0 %v5624_v51  ;;  %4132 = vmatpush1.bf16.msra.mxu1 %v5627_v52  ;;  %v5719_v51 = vld [vmem:[%s7814_s1 + $0xce8] ss:$16 sps:$4 sm:$0xff]   ;;  %v5724_v52 = vld [vmem:[%s7814_s1 + $0xd04] ss:$16 sps:$4 sm:$0xff]  }
 0x164   :  { %3764 = vmatprep.subr.bf16.mxu0 %v5632_v53  ;;  %4133 = vmatprep.subr.bf16.mxu1 %v5635_v54  ;;  %v5727_v53 = vld [vmem:[%s7814_s1 + $0xd0c] ss:$16 sps:$4 sm:$0xff]   ;;  %v5722_v54 = vld [vmem:[%s7814_s1 + $0xd00] ss:$16 sps:$4 sm:$0xff]  }
 0x167   :  { %3765 = vmatpush1.bf16.msra.mxu0 %v5630_v55  ;;  %4134 = vmatpush1.bf16.msra.mxu1 %v5633_v56  ;;  %v5725_v55 = vld [vmem:[%s7814_s1 + $0xd08] ss:$16 sps:$4 sm:$0xff]   ;;  %v5730_v56 = vld [vmem:[%s7814_s1 + $0xd24] ss:$16 sps:$4 sm:$0xff]  }
 0x168   :  { %3766 = vmatprep.subr.bf16.mxu0 %v5638_v57  ;;  %4135 = vmatprep.subr.bf16.mxu1 %v5641_v58  ;;  %v5733_v57 = vld [vmem:[%s7814_s1 + $0xd2c] ss:$16 sps:$4 sm:$0xff]   ;;  %v5728_v58 = vld [vmem:[%s7814_s1 + $0xd20] ss:$16 sps:$4 sm:$0xff]  }
 0x16b   :  { %3767 = vmatpush1.bf16.msra.mxu0 %v5636_v59  ;;  %4136 = vmatpush1.bf16.msra.mxu1 %v5639_v60  ;;  %v5731_v59 = vld [vmem:[%s7814_s1 + $0xd28] ss:$16 sps:$4 sm:$0xff]   ;;  %v5736_v60 = vld [vmem:[%s7814_s1 + $0xd44] ss:$16 sps:$4 sm:$0xff]  }
 0x16c   :  { %3768 = vmatprep.subr.bf16.mxu0 %v5644_v61  ;;  %4137 = vmatprep.subr.bf16.mxu1 %v5647_v62  ;;  %v5739_v61 = vld [vmem:[%s7814_s1 + $0xd4c] ss:$16 sps:$4 sm:$0xff]   ;;  %v5734_v62 = vld [vmem:[%s7814_s1 + $0xd40] ss:$16 sps:$4 sm:$0xff]  }
 0x16f   :  { %3769 = vmatpush1.bf16.msra.mxu0 %v5642_v63  ;;  %4138 = vmatpush1.bf16.msra.mxu1 %v5645_v0  ;;  %v5737_v63 = vld [vmem:[%s7814_s1 + $0xd48] ss:$16 sps:$4 sm:$0xff]   ;;  %v5742_v0 = vld [vmem:[%s7814_s1 + $0xd64] ss:$16 sps:$4 sm:$0xff]  }
 0x170   :  { %3770 = vmatprep.subr.bf16.mxu0 %v5650_v1  ;;  %4139 = vmatprep.subr.bf16.mxu1 %v5653_v2  ;;  %v5745_v1 = vld [vmem:[%s7814_s1 + $0xd6c] ss:$16 sps:$4 sm:$0xff]   ;;  %v5740_v2 = vld [vmem:[%s7814_s1 + $0xd60] ss:$16 sps:$4 sm:$0xff]  }
 0x173   :  { %3771 = vmatpush1.bf16.msra.mxu0 %v5648_v3  ;;  %4140 = vmatpush1.bf16.msra.mxu1 %v5651_v4  ;;  %v5743_v3 = vld [vmem:[%s7814_s1 + $0xd68] ss:$16 sps:$4 sm:$0xff]   ;;  %v5748_v4 = vld [vmem:[%s7814_s1 + $0xd84] ss:$16 sps:$4 sm:$0xff]  }
 0x174   :  { %3772 = vmatprep.subr.bf16.mxu0 %v5656_v5  ;;  %4141 = vmatprep.subr.bf16.mxu1 %v5659_v6  ;;  %v5751_v5 = vld [vmem:[%s7814_s1 + $0xd8c] ss:$16 sps:$4 sm:$0xff]   ;;  %v5746_v6 = vld [vmem:[%s7814_s1 + $0xd80] ss:$16 sps:$4 sm:$0xff]  }
 0x177   :  { %3773 = vmatpush1.bf16.msra.mxu0 %v5654_v7  ;;  %4142 = vmatpush1.bf16.msra.mxu1 %v5657_v8  ;;  %v5749_v7 = vld [vmem:[%s7814_s1 + $0xd88] ss:$16 sps:$4 sm:$0xff]   ;;  %v5754_v8 = vld [vmem:[%s7814_s1 + $0xda4] ss:$16 sps:$4 sm:$0xff]  }
 0x178   :  { %3774 = vmatprep.subr.bf16.mxu0 %v5662_v9  ;;  %4143 = vmatprep.subr.bf16.mxu1 %v5665_v10  ;;  %v5757_v9 = vld [vmem:[%s7814_s1 + $0xdac] ss:$16 sps:$4 sm:$0xff]   ;;  %v5752_v10 = vld [vmem:[%s7814_s1 + $0xda0] ss:$16 sps:$4 sm:$0xff]  }
 0x17b   :  { %3775 = vmatpush1.bf16.msra.mxu0 %v5660_v12  ;;  %4144 = vmatpush1.bf16.msra.mxu1 %v5663_v13  ;;  %v5755_v12 = vld [vmem:[%s7814_s1 + $0xda8] ss:$16 sps:$4 sm:$0xff]   ;;  %v5760_v13 = vld [vmem:[%s7814_s1 + $0xdc4] ss:$16 sps:$4 sm:$0xff]  }
 0x17c   :  { %3776 = vmatprep.subr.bf16.mxu0 %v5668_v15  ;;  %4145 = vmatprep.subr.bf16.mxu1 %v5671_v11  ;;  %v5763_v15 = vld [vmem:[%s7814_s1 + $0xdcc] ss:$16 sps:$4 sm:$0xff]   ;;  %v5758_v11 = vld [vmem:[%s7814_s1 + $0xdc0] ss:$16 sps:$4 sm:$0xff]  }
 0x17f   :  { %3777 = vmatpush1.bf16.msra.mxu0 %v5666_v17  ;;  %4146 = vmatpush1.bf16.msra.mxu1 %v5669_v14  ;;  %v5761_v17 = vld [vmem:[%s7814_s1 + $0xdc8] ss:$16 sps:$4 sm:$0xff]   ;;  %v5766_v14 = vld [vmem:[%s7814_s1 + $0xde4] ss:$16 sps:$4 sm:$0xff]  }
 0x180   :  { %3787 = vmatprep.subr.bf16.mxu0 %v5676_v19  ;;  %4156 = vmatprep.subr.bf16.mxu1 %v5679_v20  ;;  %v5769_v19 = vld [vmem:[%s7814_s1 + $0xdec] ss:$16 sps:$4 sm:$0xff]   ;;  %v5764_v20 = vld [vmem:[%s7814_s1 + $0xde0] ss:$16 sps:$4 sm:$0xff]  }
 0x182   :  { %3779 = vmatmul.mubr.bf16.vlgmr.msra.gmra.mrb[0].mxu0 %v4432_v21  ;;  %4148 = vmatmul.mubr.bf16.vlgmr.msra.gmra.mrb[0].mxu1 %v4432_v21  ;;  %v5767_v21 = vld [vmem:[%s7814_s1 + $0xde8] ss:$16 sps:$4 sm:$0xff]  }
 0x183   :  { %3788 = vmatpush1.bf16.msra.mxu0 %v5674_v22  ;;  %4157 = vmatpush1.bf16.msra.mxu1 %v5677_v23  ;;  %v5774_v22 = vld [vmem:[%s7814_s1 + $0xe04] ss:$16 sps:$4 sm:$0xff]   ;;  %v5777_v23 = vld [vmem:[%s7814_s1 + $0xe0c] ss:$16 sps:$4 sm:$0xff]  }
 0x184   :  { %3789 = vmatprep.subr.bf16.mxu0 %v5682_v18  ;;  %4158 = vmatprep.subr.bf16.mxu1 %v5685_v24  ;;  %v4434_v18 = vcombine.low %v7198_v16, %v7198_v16  ;;  %v7399_v24 = vld [vmem:[%s7815_s0 + $0x38] sm:$0xff]  ;;  %v5780_v16 = vld [vmem:[%s7814_s1 + $0xe24] ss:$16 sps:$4 sm:$0xff]  }
 0x185   :  { %3819 = vmatprep.mubr.bf16.mxu0 %v4435_v25  ;;  %4188 = vmatprep.mubr.bf16.mxu1 %v4435_v25  ;;  %v5772_v25 = vld [vmem:[%s7814_s1 + $0xe00] ss:$16 sps:$4 sm:$0xff]  }
 0x187   :  { %3790 = vmatpush1.bf16.msra.mxu0 %v5680_v26  ;;  %4159 = vmatpush1.bf16.msra.mxu1 %v5683_v27  ;;  %v5775_v26 = vld [vmem:[%s7814_s1 + $0xe08] ss:$16 sps:$4 sm:$0xff]   ;;  %v5783_v27 = vld [vmem:[%s7814_s1 + $0xe2c] ss:$16 sps:$4 sm:$0xff]  }
 0x188   :  { %3791 = vmatprep.subr.bf16.mxu0 %v5688_v28  ;;  %4160 = vmatprep.subr.bf16.mxu1 %v5691_v29  ;;  %v4437_v28 = vcombine.high %v7399_v24, %v7399_v24  ;;  %v5778_v29 = vld [vmem:[%s7814_s1 + $0xe20] ss:$16 sps:$4 sm:$0xff]  }
 0x18b   :  { %3792 = vmatpush1.bf16.msra.mxu0 %v5686_v30  ;;  %4161 = vmatpush1.bf16.msra.mxu1 %v5689_v31  ;;  %v5781_v30 = vld [vmem:[%s7814_s1 + $0xe28] ss:$16 sps:$4 sm:$0xff]   ;;  %v5786_v31 = vld [vmem:[%s7814_s1 + $0xe44] ss:$16 sps:$4 sm:$0xff]  }
 0x18c   :  { %3793 = vmatprep.subr.bf16.mxu0 %v5694_v32  ;;  %4162 = vmatprep.subr.bf16.mxu1 %v5697_v33  ;;  %v5789_v32 = vld [vmem:[%s7814_s1 + $0xe4c] ss:$16 sps:$4 sm:$0xff]   ;;  %v5784_v33 = vld [vmem:[%s7814_s1 + $0xe40] ss:$16 sps:$4 sm:$0xff]  }
 0x18f   :  { %3794 = vmatpush1.bf16.msra.mxu0 %v5692_v34  ;;  %4163 = vmatpush1.bf16.msra.mxu1 %v5695_v35  ;;  %v5787_v34 = vld [vmem:[%s7814_s1 + $0xe48] ss:$16 sps:$4 sm:$0xff]   ;;  %v5792_v35 = vld [vmem:[%s7814_s1 + $0xe64] ss:$16 sps:$4 sm:$0xff]  }
 0x190   :  { %3795 = vmatprep.subr.bf16.mxu0 %v5700_v36  ;;  %4164 = vmatprep.subr.bf16.mxu1 %v5703_v37  ;;  %v5795_v36 = vld [vmem:[%s7814_s1 + $0xe6c] ss:$16 sps:$4 sm:$0xff]   ;;  %v5790_v37 = vld [vmem:[%s7814_s1 + $0xe60] ss:$16 sps:$4 sm:$0xff]  }
 0x193   :  { %3796 = vmatpush1.bf16.msra.mxu0 %v5698_v38  ;;  %4165 = vmatpush1.bf16.msra.mxu1 %v5701_v39  ;;  %v5793_v38 = vld [vmem:[%s7814_s1 + $0xe68] ss:$16 sps:$4 sm:$0xff]   ;;  %v5798_v39 = vld [vmem:[%s7814_s1 + $0xe84] ss:$16 sps:$4 sm:$0xff]  }
 0x194   :  { %3797 = vmatprep.subr.bf16.mxu0 %v5706_v40  ;;  %4166 = vmatprep.subr.bf16.mxu1 %v5709_v41  ;;  %v5801_v40 = vld [vmem:[%s7814_s1 + $0xe8c] ss:$16 sps:$4 sm:$0xff]   ;;  %v5796_v41 = vld [vmem:[%s7814_s1 + $0xe80] ss:$16 sps:$4 sm:$0xff]  }
 0x197   :  { %3798 = vmatpush1.bf16.msra.mxu0 %v5704_v42  ;;  %4167 = vmatpush1.bf16.msra.mxu1 %v5707_v43  ;;  %v5799_v42 = vld [vmem:[%s7814_s1 + $0xe88] ss:$16 sps:$4 sm:$0xff]   ;;  %v5804_v43 = vld [vmem:[%s7814_s1 + $0xea4] ss:$16 sps:$4 sm:$0xff]  }
 0x198   :  { %3799 = vmatprep.subr.bf16.mxu0 %v5712_v44  ;;  %4168 = vmatprep.subr.bf16.mxu1 %v5715_v45  ;;  %v5807_v44 = vld [vmem:[%s7814_s1 + $0xeac] ss:$16 sps:$4 sm:$0xff]   ;;  %v5802_v45 = vld [vmem:[%s7814_s1 + $0xea0] ss:$16 sps:$4 sm:$0xff]  }
 0x19b   :  { %3800 = vmatpush1.bf16.msra.mxu0 %v5710_v46  ;;  %4169 = vmatpush1.bf16.msra.mxu1 %v5713_v47  ;;  %v5805_v46 = vld [vmem:[%s7814_s1 + $0xea8] ss:$16 sps:$4 sm:$0xff]   ;;  %v5810_v47 = vld [vmem:[%s7814_s1 + $0xec4] ss:$16 sps:$4 sm:$0xff]  }
 0x19c   :  { %3801 = vmatprep.subr.bf16.mxu0 %v5718_v48  ;;  %4170 = vmatprep.subr.bf16.mxu1 %v5721_v49  ;;  %v5813_v48 = vld [vmem:[%s7814_s1 + $0xecc] ss:$16 sps:$4 sm:$0xff]   ;;  %v5808_v49 = vld [vmem:[%s7814_s1 + $0xec0] ss:$16 sps:$4 sm:$0xff]  }
 0x19f   :  { %3802 = vmatpush1.bf16.msra.mxu0 %v5716_v50  ;;  %4171 = vmatpush1.bf16.msra.mxu1 %v5719_v51  ;;  %v5811_v50 = vld [vmem:[%s7814_s1 + $0xec8] ss:$16 sps:$4 sm:$0xff]   ;;  %v5816_v51 = vld [vmem:[%s7814_s1 + $0xee4] ss:$16 sps:$4 sm:$0xff]  }
 0x1a0   :  { %3803 = vmatprep.subr.bf16.mxu0 %v5724_v52  ;;  %4172 = vmatprep.subr.bf16.mxu1 %v5727_v53  ;;  %v5819_v52 = vld [vmem:[%s7814_s1 + $0xeec] ss:$16 sps:$4 sm:$0xff]   ;;  %v5814_v53 = vld [vmem:[%s7814_s1 + $0xee0] ss:$16 sps:$4 sm:$0xff]  }
 0x1a3   :  { %3804 = vmatpush1.bf16.msra.mxu0 %v5722_v54  ;;  %4173 = vmatpush1.bf16.msra.mxu1 %v5725_v55  ;;  %v5817_v54 = vld [vmem:[%s7814_s1 + $0xee8] ss:$16 sps:$4 sm:$0xff]   ;;  %v5822_v55 = vld [vmem:[%s7814_s1 + $0xf04] ss:$16 sps:$4 sm:$0xff]  }
 0x1a4   :  { %3805 = vmatprep.subr.bf16.mxu0 %v5730_v56  ;;  %4174 = vmatprep.subr.bf16.mxu1 %v5733_v57  ;;  %v5825_v56 = vld [vmem:[%s7814_s1 + $0xf0c] ss:$16 sps:$4 sm:$0xff]   ;;  %v5820_v57 = vld [vmem:[%s7814_s1 + $0xf00] ss:$16 sps:$4 sm:$0xff]  }
 0x1a7   :  { %3806 = vmatpush1.bf16.msra.mxu0 %v5728_v58  ;;  %4175 = vmatpush1.bf16.msra.mxu1 %v5731_v59  ;;  %v5823_v58 = vld [vmem:[%s7814_s1 + $0xf08] ss:$16 sps:$4 sm:$0xff]   ;;  %v5828_v59 = vld [vmem:[%s7814_s1 + $0xf24] ss:$16 sps:$4 sm:$0xff]  }
 0x1a8   :  { %3807 = vmatprep.subr.bf16.mxu0 %v5736_v60  ;;  %4176 = vmatprep.subr.bf16.mxu1 %v5739_v61  ;;  %v5831_v60 = vld [vmem:[%s7814_s1 + $0xf2c] ss:$16 sps:$4 sm:$0xff]   ;;  %v5826_v61 = vld [vmem:[%s7814_s1 + $0xf20] ss:$16 sps:$4 sm:$0xff]  }
 0x1ab   :  { %3808 = vmatpush1.bf16.msra.mxu0 %v5734_v62  ;;  %4177 = vmatpush1.bf16.msra.mxu1 %v5737_v63  ;;  %v5829_v62 = vld [vmem:[%s7814_s1 + $0xf28] ss:$16 sps:$4 sm:$0xff]   ;;  %v5834_v63 = vld [vmem:[%s7814_s1 + $0xf44] ss:$16 sps:$4 sm:$0xff]  }
 0x1ac   :  { %3809 = vmatprep.subr.bf16.mxu0 %v5742_v0  ;;  %4178 = vmatprep.subr.bf16.mxu1 %v5745_v1  ;;  %v5837_v0 = vld [vmem:[%s7814_s1 + $0xf4c] ss:$16 sps:$4 sm:$0xff]   ;;  %v5832_v1 = vld [vmem:[%s7814_s1 + $0xf40] ss:$16 sps:$4 sm:$0xff]  }
 0x1af   :  { %3810 = vmatpush1.bf16.msra.mxu0 %v5740_v2  ;;  %4179 = vmatpush1.bf16.msra.mxu1 %v5743_v3  ;;  %v5835_v2 = vld [vmem:[%s7814_s1 + $0xf48] ss:$16 sps:$4 sm:$0xff]   ;;  %v5840_v3 = vld [vmem:[%s7814_s1 + $0xf64] ss:$16 sps:$4 sm:$0xff]  }
 0x1b0   :  { %3811 = vmatprep.subr.bf16.mxu0 %v5748_v4  ;;  %4180 = vmatprep.subr.bf16.mxu1 %v5751_v5  ;;  %v5843_v4 = vld [vmem:[%s7814_s1 + $0xf6c] ss:$16 sps:$4 sm:$0xff]   ;;  %v5838_v5 = vld [vmem:[%s7814_s1 + $0xf60] ss:$16 sps:$4 sm:$0xff]  }
 0x1b3   :  { %3812 = vmatpush1.bf16.msra.mxu0 %v5746_v6  ;;  %4181 = vmatpush1.bf16.msra.mxu1 %v5749_v7  ;;  %v5841_v6 = vld [vmem:[%s7814_s1 + $0xf68] ss:$16 sps:$4 sm:$0xff]   ;;  %v5846_v7 = vld [vmem:[%s7814_s1 + $0xf84] ss:$16 sps:$4 sm:$0xff]  }
 0x1b4   :  { %3813 = vmatprep.subr.bf16.mxu0 %v5754_v8  ;;  %4182 = vmatprep.subr.bf16.mxu1 %v5757_v9  ;;  %v5849_v8 = vld [vmem:[%s7814_s1 + $0xf8c] ss:$16 sps:$4 sm:$0xff]   ;;  %v5844_v9 = vld [vmem:[%s7814_s1 + $0xf80] ss:$16 sps:$4 sm:$0xff]  }
 0x1b7   :  { %3814 = vmatpush1.bf16.msra.mxu0 %v5752_v10  ;;  %4183 = vmatpush1.bf16.msra.mxu1 %v5755_v12  ;;  %v5847_v10 = vld [vmem:[%s7814_s1 + $0xf88] ss:$16 sps:$4 sm:$0xff]   ;;  %v5852_v12 = vld [vmem:[%s7814_s1 + $0xfa4] ss:$16 sps:$4 sm:$0xff]  }
 0x1b8   :  { %3815 = vmatprep.subr.bf16.mxu0 %v5760_v13  ;;  %4184 = vmatprep.subr.bf16.mxu1 %v5763_v15  ;;  %v5855_v13 = vld [vmem:[%s7814_s1 + $0xfac] ss:$16 sps:$4 sm:$0xff]   ;;  %v5850_v15 = vld [vmem:[%s7814_s1 + $0xfa0] ss:$16 sps:$4 sm:$0xff]  }
 0x1bb   :  { %3816 = vmatpush1.bf16.msra.mxu0 %v5758_v11  ;;  %4185 = vmatpush1.bf16.msra.mxu1 %v5761_v17  ;;  %v5853_v11 = vld [vmem:[%s7814_s1 + $0xfa8] ss:$16 sps:$4 sm:$0xff]   ;;  %v5858_v17 = vld [vmem:[%s7814_s1 + $0xfc4] ss:$16 sps:$4 sm:$0xff]  }
 0x1bc   :  { %3817 = vmatprep.subr.bf16.mxu0 %v5766_v14  ;;  %4186 = vmatprep.subr.bf16.mxu1 %v5769_v19  ;;  %v5861_v14 = vld [vmem:[%s7814_s1 + $0xfcc] ss:$16 sps:$4 sm:$0xff]   ;;  %v5856_v19 = vld [vmem:[%s7814_s1 + $0xfc0] ss:$16 sps:$4 sm:$0xff]  }
 0x1bf   :  { %3818 = vmatpush1.bf16.msra.mxu0 %v5764_v20  ;;  %4187 = vmatpush1.bf16.msra.mxu1 %v5767_v21  ;;  %v5859_v20 = vld [vmem:[%s7814_s1 + $0xfc8] ss:$16 sps:$4 sm:$0xff]   ;;  %v5864_v21 = vld [vmem:[%s7814_s1 + $0xfe4] ss:$16 sps:$4 sm:$0xff]  }
 0x1c0   :  { %3828 = vmatprep.subr.bf16.mxu0 %v5774_v22  ;;  %4197 = vmatprep.subr.bf16.mxu1 %v5777_v23  ;;  %v5867_v22 = vld [vmem:[%s7814_s1 + $0xfec] ss:$16 sps:$4 sm:$0xff]   ;;  %v5862_v23 = vld [vmem:[%s7814_s1 + $0xfe0] ss:$16 sps:$4 sm:$0xff]  }
 0x1c2   :  { %3820 = vmatmul.mubr.bf16.vlgmr.msra.gmra.mrb[0].mxu0 %v4434_v18  ;;  %4189 = vmatmul.mubr.bf16.vlgmr.msra.gmra.mrb[0].mxu1 %v4434_v18  ;;  %v5865_v18 = vld [vmem:[%s7814_s1 + $0xfe8] ss:$16 sps:$4 sm:$0xff]  }
 0x1c3   :  { %3829 = vmatpush1.bf16.msra.mxu0 %v5772_v25  ;;  %4198 = vmatpush1.bf16.msra.mxu1 %v5775_v26  ;;  %v5872_v25 = vld [vmem:[%s7814_s1 + $0x1004] ss:$16 sps:$4 sm:$0xff]   ;;  %v5875_v26 = vld [vmem:[%s7814_s1 + $0x100c] ss:$16 sps:$4 sm:$0xff]  }
 0x1c4   :  { %3830 = vmatprep.subr.bf16.mxu0 %v5780_v16  ;;  %4199 = vmatprep.subr.bf16.mxu1 %v5783_v27  ;;  %v4436_v16 = vcombine.low %v7399_v24, %v7399_v24  ;;  %v7600_v27 = vld [vmem:[%s7815_s0 + $0x40] sm:$0xff] }
 0x1c5   :  { %3860 = vmatprep.mubr.bf16.mxu0 %v4437_v28  ;;  %4229 = vmatprep.mubr.bf16.mxu1 %v4437_v28  ;;  %v5870_v28 = vld [vmem:[%s7814_s1 + $0x1000] ss:$16 sps:$4 sm:$0xff]   ;;  %v5878_v24 = vld [vmem:[%s7814_s1 + $0x1024] ss:$16 sps:$4 sm:$0xff]  }
 0x1c7   :  { %3831 = vmatpush1.bf16.msra.mxu0 %v5778_v29  ;;  %4200 = vmatpush1.bf16.msra.mxu1 %v5781_v30  ;;  %v5873_v29 = vld [vmem:[%s7814_s1 + $0x1008] ss:$16 sps:$4 sm:$0xff]   ;;  %v5881_v30 = vld [vmem:[%s7814_s1 + $0x102c] ss:$16 sps:$4 sm:$0xff]  }
 0x1c8   :  { %3832 = vmatprep.subr.bf16.mxu0 %v5786_v31  ;;  %4201 = vmatprep.subr.bf16.mxu1 %v5789_v32  ;;  %v4439_v31 = vcombine.high %v7600_v27, %v7600_v27  ;;  %v5876_v32 = vld [vmem:[%s7814_s1 + $0x1020] ss:$16 sps:$4 sm:$0xff]  }
 0x1cb   :  { %3833 = vmatpush1.bf16.msra.mxu0 %v5784_v33  ;;  %4202 = vmatpush1.bf16.msra.mxu1 %v5787_v34  ;;  %v5879_v33 = vld [vmem:[%s7814_s1 + $0x1028] ss:$16 sps:$4 sm:$0xff]   ;;  %v5884_v34 = vld [vmem:[%s7814_s1 + $0x1044] ss:$16 sps:$4 sm:$0xff]  }
 0x1cc   :  { %3834 = vmatprep.subr.bf16.mxu0 %v5792_v35  ;;  %4203 = vmatprep.subr.bf16.mxu1 %v5795_v36  ;;  %v5887_v35 = vld [vmem:[%s7814_s1 + $0x104c] ss:$16 sps:$4 sm:$0xff]   ;;  %v5882_v36 = vld [vmem:[%s7814_s1 + $0x1040] ss:$16 sps:$4 sm:$0xff]  }
 0x1cf   :  { %3835 = vmatpush1.bf16.msra.mxu0 %v5790_v37  ;;  %4204 = vmatpush1.bf16.msra.mxu1 %v5793_v38  ;;  %v5885_v37 = vld [vmem:[%s7814_s1 + $0x1048] ss:$16 sps:$4 sm:$0xff]   ;;  %v5890_v38 = vld [vmem:[%s7814_s1 + $0x1064] ss:$16 sps:$4 sm:$0xff]  }
 0x1d0   :  { %3836 = vmatprep.subr.bf16.mxu0 %v5798_v39  ;;  %4205 = vmatprep.subr.bf16.mxu1 %v5801_v40  ;;  %v5893_v39 = vld [vmem:[%s7814_s1 + $0x106c] ss:$16 sps:$4 sm:$0xff]   ;;  %v5888_v40 = vld [vmem:[%s7814_s1 + $0x1060] ss:$16 sps:$4 sm:$0xff]  }
 0x1d3   :  { %3837 = vmatpush1.bf16.msra.mxu0 %v5796_v41  ;;  %4206 = vmatpush1.bf16.msra.mxu1 %v5799_v42  ;;  %v5891_v41 = vld [vmem:[%s7814_s1 + $0x1068] ss:$16 sps:$4 sm:$0xff]   ;;  %v5896_v42 = vld [vmem:[%s7814_s1 + $0x1084] ss:$16 sps:$4 sm:$0xff]  }
 0x1d4   :  { %3838 = vmatprep.subr.bf16.mxu0 %v5804_v43  ;;  %4207 = vmatprep.subr.bf16.mxu1 %v5807_v44  ;;  %v5899_v43 = vld [vmem:[%s7814_s1 + $0x108c] ss:$16 sps:$4 sm:$0xff]   ;;  %v5894_v44 = vld [vmem:[%s7814_s1 + $0x1080] ss:$16 sps:$4 sm:$0xff]  }
 0x1d7   :  { %3839 = vmatpush1.bf16.msra.mxu0 %v5802_v45  ;;  %4208 = vmatpush1.bf16.msra.mxu1 %v5805_v46  ;;  %v5897_v45 = vld [vmem:[%s7814_s1 + $0x1088] ss:$16 sps:$4 sm:$0xff]   ;;  %v5902_v46 = vld [vmem:[%s7814_s1 + $0x10a4] ss:$16 sps:$4 sm:$0xff]  }
 0x1d8   :  { %3840 = vmatprep.subr.bf16.mxu0 %v5810_v47  ;;  %4209 = vmatprep.subr.bf16.mxu1 %v5813_v48  ;;  %v5905_v47 = vld [vmem:[%s7814_s1 + $0x10ac] ss:$16 sps:$4 sm:$0xff]   ;;  %v5900_v48 = vld [vmem:[%s7814_s1 + $0x10a0] ss:$16 sps:$4 sm:$0xff]  }
 0x1db   :  { %3841 = vmatpush1.bf16.msra.mxu0 %v5808_v49  ;;  %4210 = vmatpush1.bf16.msra.mxu1 %v5811_v50  ;;  %v5903_v49 = vld [vmem:[%s7814_s1 + $0x10a8] ss:$16 sps:$4 sm:$0xff]   ;;  %v5908_v50 = vld [vmem:[%s7814_s1 + $0x10c4] ss:$16 sps:$4 sm:$0xff]  }
 0x1dc   :  { %3842 = vmatprep.subr.bf16.mxu0 %v5816_v51  ;;  %4211 = vmatprep.subr.bf16.mxu1 %v5819_v52  ;;  %v5911_v51 = vld [vmem:[%s7814_s1 + $0x10cc] ss:$16 sps:$4 sm:$0xff]   ;;  %v5906_v52 = vld [vmem:[%s7814_s1 + $0x10c0] ss:$16 sps:$4 sm:$0xff]  }
 0x1df   :  { %3843 = vmatpush1.bf16.msra.mxu0 %v5814_v53  ;;  %4212 = vmatpush1.bf16.msra.mxu1 %v5817_v54  ;;  %v5909_v53 = vld [vmem:[%s7814_s1 + $0x10c8] ss:$16 sps:$4 sm:$0xff]   ;;  %v5914_v54 = vld [vmem:[%s7814_s1 + $0x10e4] ss:$16 sps:$4 sm:$0xff]  }
 0x1e0   :  { %3844 = vmatprep.subr.bf16.mxu0 %v5822_v55  ;;  %4213 = vmatprep.subr.bf16.mxu1 %v5825_v56  ;;  %v5917_v55 = vld [vmem:[%s7814_s1 + $0x10ec] ss:$16 sps:$4 sm:$0xff]   ;;  %v5912_v56 = vld [vmem:[%s7814_s1 + $0x10e0] ss:$16 sps:$4 sm:$0xff]  }
 0x1e3   :  { %3845 = vmatpush1.bf16.msra.mxu0 %v5820_v57  ;;  %4214 = vmatpush1.bf16.msra.mxu1 %v5823_v58  ;;  %v5915_v57 = vld [vmem:[%s7814_s1 + $0x10e8] ss:$16 sps:$4 sm:$0xff]   ;;  %v5920_v58 = vld [vmem:[%s7814_s1 + $0x1104] ss:$16 sps:$4 sm:$0xff]  }
 0x1e4   :  { %3846 = vmatprep.subr.bf16.mxu0 %v5828_v59  ;;  %4215 = vmatprep.subr.bf16.mxu1 %v5831_v60  ;;  %v5923_v59 = vld [vmem:[%s7814_s1 + $0x110c] ss:$16 sps:$4 sm:$0xff]   ;;  %v5918_v60 = vld [vmem:[%s7814_s1 + $0x1100] ss:$16 sps:$4 sm:$0xff]  }
 0x1e7   :  { %3847 = vmatpush1.bf16.msra.mxu0 %v5826_v61  ;;  %4216 = vmatpush1.bf16.msra.mxu1 %v5829_v62  ;;  %v5921_v61 = vld [vmem:[%s7814_s1 + $0x1108] ss:$16 sps:$4 sm:$0xff]   ;;  %v5926_v62 = vld [vmem:[%s7814_s1 + $0x1124] ss:$16 sps:$4 sm:$0xff]  }
 0x1e8   :  { %3848 = vmatprep.subr.bf16.mxu0 %v5834_v63  ;;  %4217 = vmatprep.subr.bf16.mxu1 %v5837_v0  ;;  %v5929_v63 = vld [vmem:[%s7814_s1 + $0x112c] ss:$16 sps:$4 sm:$0xff]   ;;  %v5924_v0 = vld [vmem:[%s7814_s1 + $0x1120] ss:$16 sps:$4 sm:$0xff]  }
 0x1eb   :  { %3849 = vmatpush1.bf16.msra.mxu0 %v5832_v1  ;;  %4218 = vmatpush1.bf16.msra.mxu1 %v5835_v2  ;;  %v5927_v1 = vld [vmem:[%s7814_s1 + $0x1128] ss:$16 sps:$4 sm:$0xff]   ;;  %v5932_v2 = vld [vmem:[%s7814_s1 + $0x1144] ss:$16 sps:$4 sm:$0xff]  }
 0x1ec   :  { %3850 = vmatprep.subr.bf16.mxu0 %v5840_v3  ;;  %4219 = vmatprep.subr.bf16.mxu1 %v5843_v4  ;;  %v5935_v3 = vld [vmem:[%s7814_s1 + $0x114c] ss:$16 sps:$4 sm:$0xff]   ;;  %v5930_v4 = vld [vmem:[%s7814_s1 + $0x1140] ss:$16 sps:$4 sm:$0xff]  }
 0x1ef   :  { %3851 = vmatpush1.bf16.msra.mxu0 %v5838_v5  ;;  %4220 = vmatpush1.bf16.msra.mxu1 %v5841_v6  ;;  %v5933_v5 = vld [vmem:[%s7814_s1 + $0x1148] ss:$16 sps:$4 sm:$0xff]   ;;  %v5938_v6 = vld [vmem:[%s7814_s1 + $0x1164] ss:$16 sps:$4 sm:$0xff]  }
 0x1f0   :  { %3852 = vmatprep.subr.bf16.mxu0 %v5846_v7  ;;  %4221 = vmatprep.subr.bf16.mxu1 %v5849_v8  ;;  %v5941_v7 = vld [vmem:[%s7814_s1 + $0x116c] ss:$16 sps:$4 sm:$0xff]   ;;  %v5936_v8 = vld [vmem:[%s7814_s1 + $0x1160] ss:$16 sps:$4 sm:$0xff]  }
 0x1f3   :  { %3853 = vmatpush1.bf16.msra.mxu0 %v5844_v9  ;;  %4222 = vmatpush1.bf16.msra.mxu1 %v5847_v10  ;;  %v5939_v9 = vld [vmem:[%s7814_s1 + $0x1168] ss:$16 sps:$4 sm:$0xff]   ;;  %v5944_v10 = vld [vmem:[%s7814_s1 + $0x1184] ss:$16 sps:$4 sm:$0xff]  }
 0x1f4   :  { %3854 = vmatprep.subr.bf16.mxu0 %v5852_v12  ;;  %4223 = vmatprep.subr.bf16.mxu1 %v5855_v13  ;;  %v5947_v12 = vld [vmem:[%s7814_s1 + $0x118c] ss:$16 sps:$4 sm:$0xff]   ;;  %v5942_v13 = vld [vmem:[%s7814_s1 + $0x1180] ss:$16 sps:$4 sm:$0xff]  }
 0x1f7   :  { %3855 = vmatpush1.bf16.msra.mxu0 %v5850_v15  ;;  %4224 = vmatpush1.bf16.msra.mxu1 %v5853_v11  ;;  %v5945_v15 = vld [vmem:[%s7814_s1 + $0x1188] ss:$16 sps:$4 sm:$0xff]   ;;  %v5950_v11 = vld [vmem:[%s7814_s1 + $0x11a4] ss:$16 sps:$4 sm:$0xff]  }
 0x1f8   :  { %3856 = vmatprep.subr.bf16.mxu0 %v5858_v17  ;;  %4225 = vmatprep.subr.bf16.mxu1 %v5861_v14  ;;  %v5953_v17 = vld [vmem:[%s7814_s1 + $0x11ac] ss:$16 sps:$4 sm:$0xff]   ;;  %v5948_v14 = vld [vmem:[%s7814_s1 + $0x11a0] ss:$16 sps:$4 sm:$0xff]  }
 0x1fb   :  { %3857 = vmatpush1.bf16.msra.mxu0 %v5856_v19  ;;  %4226 = vmatpush1.bf16.msra.mxu1 %v5859_v20  ;;  %v5951_v19 = vld [vmem:[%s7814_s1 + $0x11a8] ss:$16 sps:$4 sm:$0xff]   ;;  %v5956_v20 = vld [vmem:[%s7814_s1 + $0x11c4] ss:$16 sps:$4 sm:$0xff]  }
 0x1fc   :  { %3858 = vmatprep.subr.bf16.mxu0 %v5864_v21  ;;  %4227 = vmatprep.subr.bf16.mxu1 %v5867_v22  ;;  %v5959_v21 = vld [vmem:[%s7814_s1 + $0x11cc] ss:$16 sps:$4 sm:$0xff]   ;;  %v5954_v22 = vld [vmem:[%s7814_s1 + $0x11c0] ss:$16 sps:$4 sm:$0xff]  }
 0x1ff   :  { %3859 = vmatpush1.bf16.msra.mxu0 %v5862_v23  ;;  %4228 = vmatpush1.bf16.msra.mxu1 %v5865_v18  ;;  %v5957_v23 = vld [vmem:[%s7814_s1 + $0x11c8] ss:$16 sps:$4 sm:$0xff]   ;;  %v5962_v18 = vld [vmem:[%s7814_s1 + $0x11e4] ss:$16 sps:$4 sm:$0xff]  }
 0x200   :  { %3869 = vmatprep.subr.bf16.mxu0 %v5872_v25  ;;  %4238 = vmatprep.subr.bf16.mxu1 %v5875_v26  ;;  %v5965_v25 = vld [vmem:[%s7814_s1 + $0x11ec] ss:$16 sps:$4 sm:$0xff]   ;;  %v5960_v26 = vld [vmem:[%s7814_s1 + $0x11e0] ss:$16 sps:$4 sm:$0xff]  }
 0x202   :  { %3861 = vmatmul.mubr.bf16.vlgmr.msra.gmra.mrb[0].mxu0 %v4436_v16  ;;  %4230 = vmatmul.mubr.bf16.vlgmr.msra.gmra.mrb[0].mxu1 %v4436_v16  ;;  %v5963_v16 = vld [vmem:[%s7814_s1 + $0x11e8] ss:$16 sps:$4 sm:$0xff]  }
 0x203   :  { %3870 = vmatpush1.bf16.msra.mxu0 %v5870_v28  ;;  %4239 = vmatpush1.bf16.msra.mxu1 %v5873_v29  ;;  %v4438_v28 = vcombine.low %v7600_v27, %v7600_v27  ;;  %v5968_v29 = vmov 1966171168  }
 0x204   :  { %3871 = vmatprep.subr.bf16.mxu0 %v5878_v24  ;;  %4240 = vmatprep.subr.bf16.mxu1 %v5881_v30  ;;  %v4328_v24 = vunpack.c.l.s4 %v5968_v29  ;;  %v4330_v30 = vlaneseq }
 0x205   :  { %3901 = vmatprep.mubr.bf16.mxu0 %v4439_v31  ;;  %4270 = vmatprep.mubr.bf16.mxu1 %v4439_v31 }
 0x206   :  { %v4329_v31 = vunpack.c.0.s8 %v4328_v24  ;;  %vm4352_vm0 = vcmp.lt.s32.totalorder %v4330_v30, 512 }
 0x207   :  { %3872 = vmatpush1.bf16.msra.mxu0 %v5876_v32  ;;  %4241 = vmatpush1.bf16.msra.mxu1 %v5879_v33  ;;  %v4331_v32 = vshrl.u32 %v4330_v30, 7 }
 0x208   :  { %3873 = vmatprep.subr.bf16.mxu0 %v5884_v34  ;;  %4242 = vmatprep.subr.bf16.mxu1 %v5887_v35 }
 0x209   :  { %v7793_v35 = vsub.s32 %v4329_v31, %v4331_v32 }
 0x20b   :  { %3874 = vmatpush1.bf16.msra.mxu0 %v5882_v36  ;;  %4243 = vmatpush1.bf16.msra.mxu1 %v5885_v37 }
 0x20c   :  { %3875 = vmatprep.subr.bf16.mxu0 %v5890_v38  ;;  %4244 = vmatprep.subr.bf16.mxu1 %v5893_v39 }
 0x20f   :  { %3876 = vmatpush1.bf16.msra.mxu0 %v5888_v40  ;;  %4245 = vmatpush1.bf16.msra.mxu1 %v5891_v41 }
 0x210   :  { %3877 = vmatprep.subr.bf16.mxu0 %v5896_v42  ;;  %4246 = vmatprep.subr.bf16.mxu1 %v5899_v43 }
 0x213   :  { %3878 = vmatpush1.bf16.msra.mxu0 %v5894_v44  ;;  %4247 = vmatpush1.bf16.msra.mxu1 %v5897_v45 }
 0x214   :  { %3879 = vmatprep.subr.bf16.mxu0 %v5902_v46  ;;  %4248 = vmatprep.subr.bf16.mxu1 %v5905_v47 }
 0x217   :  { %3880 = vmatpush1.bf16.msra.mxu0 %v5900_v48  ;;  %4249 = vmatpush1.bf16.msra.mxu1 %v5903_v49 }
 0x218   :  { %3881 = vmatprep.subr.bf16.mxu0 %v5908_v50  ;;  %4250 = vmatprep.subr.bf16.mxu1 %v5911_v51 }
 0x21b   :  { %3882 = vmatpush1.bf16.msra.mxu0 %v5906_v52  ;;  %4251 = vmatpush1.bf16.msra.mxu1 %v5909_v53 }
 0x21c   :  { %3883 = vmatprep.subr.bf16.mxu0 %v5914_v54  ;;  %4252 = vmatprep.subr.bf16.mxu1 %v5917_v55 }
 0x21f   :  { %3884 = vmatpush1.bf16.msra.mxu0 %v5912_v56  ;;  %4253 = vmatpush1.bf16.msra.mxu1 %v5915_v57 }
 0x220   :  { %3885 = vmatprep.subr.bf16.mxu0 %v5920_v58  ;;  %4254 = vmatprep.subr.bf16.mxu1 %v5923_v59 }
 0x223   :  { %3886 = vmatpush1.bf16.msra.mxu0 %v5918_v60  ;;  %4255 = vmatpush1.bf16.msra.mxu1 %v5921_v61 }
 0x224   :  { %3887 = vmatprep.subr.bf16.mxu0 %v5926_v62  ;;  %4256 = vmatprep.subr.bf16.mxu1 %v5929_v63 }
 0x227   :  { %3888 = vmatpush1.bf16.msra.mxu0 %v5924_v0  ;;  %4257 = vmatpush1.bf16.msra.mxu1 %v5927_v1 }
 0x228   :  { %3889 = vmatprep.subr.bf16.mxu0 %v5932_v2  ;;  %4258 = vmatprep.subr.bf16.mxu1 %v5935_v3 }
 0x22b   :  { %3890 = vmatpush1.bf16.msra.mxu0 %v5930_v4  ;;  %4259 = vmatpush1.bf16.msra.mxu1 %v5933_v5 }
 0x22c   :  { %3891 = vmatprep.subr.bf16.mxu0 %v5938_v6  ;;  %4260 = vmatprep.subr.bf16.mxu1 %v5941_v7 }
 0x22f   :  { %3892 = vmatpush1.bf16.msra.mxu0 %v5936_v8  ;;  %4261 = vmatpush1.bf16.msra.mxu1 %v5939_v9 }
 0x230   :  { %3893 = vmatprep.subr.bf16.mxu0 %v5944_v10  ;;  %4262 = vmatprep.subr.bf16.mxu1 %v5947_v12 }
 0x233   :  { %3894 = vmatpush1.bf16.msra.mxu0 %v5942_v13  ;;  %4263 = vmatpush1.bf16.msra.mxu1 %v5945_v15 }
 0x234   :  { %3895 = vmatprep.subr.bf16.mxu0 %v5950_v11  ;;  %4264 = vmatprep.subr.bf16.mxu1 %v5953_v17 }
 0x237   :  { %3896 = vmatpush1.bf16.msra.mxu0 %v5948_v14  ;;  %4265 = vmatpush1.bf16.msra.mxu1 %v5951_v19 }
 0x238   :  { %3897 = vmatprep.subr.bf16.mxu0 %v5956_v20  ;;  %4266 = vmatprep.subr.bf16.mxu1 %v5959_v21 }
 0x23b   :  { %3898 = vmatpush1.bf16.msra.mxu0 %v5954_v22  ;;  %4267 = vmatpush1.bf16.msra.mxu1 %v5957_v23 }
 0x23c   :  { %3899 = vmatprep.subr.bf16.mxu0 %v5962_v18  ;;  %4268 = vmatprep.subr.bf16.mxu1 %v5965_v25 }
 0x23f   :  { %3900 = vmatpush1.bf16.msra.mxu0 %v5960_v26  ;;  %4269 = vmatpush1.bf16.msra.mxu1 %v5963_v16 }
 0x242   :  { %3902 = vmatmul.mubr.bf16.vlgmr.msra.gmra.mrb[0].mxu0 %v4438_v28  ;;  %4271 = vmatmul.mubr.bf16.vlgmr.msra.gmra.mrb[0].mxu1 %v4438_v28 }
 0x315   :  { %v3903_v33 = vpop.f32.mrb[0].mxu0  ;;  %v4272_v34 = vpop.f32.mrb[0].mxu1 }
 0x316   :  { %v4297_v36 = vrot.slane %v3903_v33, 4  ;;  %v4355_v37 = vmul.f32 %v3903_v33, %v3903_v33  ;;  %v4309_v38 = vrot.slane %v4272_v34, 4  ;;  %v4357_v39 = vmul.f32 %v4272_v34, %v4272_v34  ;;  %v3905_v40 = vpop.f32.mrb[1].mxu0  ;;  %v4274_v27 = vpop.f32.mrb[1].mxu1 }
 0x317   :  { %v5019_v41 = vpack.c.bf16 %v3905_v40, %v3903_v33  ;;  %v4303_v42 = vrot.slane %v3905_v40, 4  ;;  %v4356_v43 = vmul.f32 %v3905_v40, %v3905_v40  ;;  %v5020_v44 = vpack.c.bf16 %v4274_v27, %v4272_v34  ;;  %v3907_v45 = vpop.f32.mrb[2].mxu0  ;;  %v4276_v46 = vpop.f32.mrb[2].mxu1 }
 0x318   :  { %v4298_v47 = vadd.f32 %v4297_v36, %v3903_v33  ;;  %v4359_v48 = vrot.slane %v4355_v37, 4  ;;  %v4310_v49 = vadd.f32 %v4309_v38, %v4272_v34  ;;  %v4371_v50 = vrot.slane %v4357_v39, 4  ;;  %v3908_v51 = vpop.f32.mrb[3].mxu0  ;;  %v4277_v52 = vpop.f32.mrb[3].mxu1 }
 0x319   :  { %4295 = vst [vmem:[%s7816_s2] sm:$0xff] %v5019_v41  ;;  %v4304_v53 = vadd.f32 %v4303_v42, %v3905_v40  ;;  %v4365_v54 = vrot.slane %v4356_v43, 4  ;;  %4296 = vst [vmem:[%s7816_s2 + $0x8] sm:$0xff] %v5020_v44  ;;  %v4315_v55 = vrot.slane %v4274_v27, 4  ;;  %v4358_v56 = vmul.f32 %v4274_v27, %v4274_v27 }
 0x31a   :  { %v4299_v57 = vrot.slane %v4298_v47, 2  ;;  %v4360_v58 = vadd.f32 %v4359_v48, %v4355_v37  ;;  %v4311_v59 = vrot.slane %v4310_v49, 2  ;;  %v4372_v60 = vadd.f32 %v4371_v50, %v4357_v39 }
 0x31b   :  { %v4305_v61 = vrot.slane %v4304_v53, 2  ;;  %v4366_v62 = vadd.f32 %v4365_v54, %v4356_v43  ;;  %v4316_v63 = vadd.f32 %v4315_v55, %v4274_v27  ;;  %v4377_v0 = vrot.slane %v4358_v56, 4 }
 0x31c   :  { %v4300_v1 = vadd.f32 %v4299_v57, %v4298_v47  ;;  %v4361_v2 = vrot.slane %v4360_v58, 2  ;;  %v4312_v3 = vadd.f32 %v4311_v59, %v4310_v49  ;;  %v4373_v4 = vrot.slane %v4372_v60, 2 }
 0x31d   :  { %v4306_v5 = vadd.f32 %v4305_v61, %v4304_v53  ;;  %v4367_v6 = vrot.slane %v4366_v62, 2  ;;  %v4317_v7 = vrot.slane %v4316_v63, 2  ;;  %v4378_v8 = vadd.f32 %v4377_v0, %v4358_v56 }
 0x31e   :  { %v4301_v9 = vrot.slane %v4300_v1, 1  ;;  %v4362_v10 = vadd.f32 %v4361_v2, %v4360_v58  ;;  %v4313_v12 = vrot.slane %v4312_v3, 1  ;;  %v4374_v13 = vadd.f32 %v4373_v4, %v4372_v60 }
 0x31f   :  { %v4307_v15 = vrot.slane %v4306_v5, 1  ;;  %v4368_v11 = vadd.f32 %v4367_v6, %v4366_v62  ;;  %v4318_v17 = vadd.f32 %v4317_v7, %v4316_v63  ;;  %v4379_v14 = vrot.slane %v4378_v8, 2 }
 0x320   :  { %v4302_v19 = vadd.f32 %v4301_v9, %v4300_v1  ;;  %v4363_v20 = vrot.slane %v4362_v10, 1  ;;  %v4314_v21 = vadd.f32 %v4313_v12, %v4312_v3  ;;  %v4375_v22 = vrot.slane %v4374_v13, 1 }
 0x321   :  { %v4308_v23 = vadd.f32 %v4307_v15, %v4306_v5  ;;  %v4369_v18 = vrot.slane %v4368_v11, 1  ;;  %v4319_v25 = vrot.slane %v4318_v17, 1  ;;  %v4380_v26 = vadd.f32 %v4379_v14, %v4378_v8 }
 0x322   :  { %v4364_v16 = vadd.f32 %v4363_v20, %v4362_v10  ;;  %v4376_v28 = vadd.f32 %v4375_v22, %v4374_v13 }
 0x323   :  { %v4325_v29 = vcombine.low %v4302_v19, %v4308_v23  ;;  %v4370_v24 = vadd.f32 %v4369_v18, %v4368_v11  ;;  %v4320_v31 = vadd.f32 %v4319_v25, %v4318_v17  ;;  %v4381_v32 = vrot.slane %v4380_v26, 1 }
 0x325   :  { %v4333_v33 = vrot.slane %v4325_v29, %v7793_v35  ;;  %v4387_v34 = vcombine.low %v4364_v16, %v4370_v24  ;;  %v4326_v36 = vcombine.low %v4314_v21, %v4320_v31  ;;  %v4382_v37 = vadd.f32 %v4381_v32, %v4380_v26 }
 0x327   :  { %v4395_v38 = vrot.slane %v4387_v34, %v7793_v35  ;;  %v4340_v39 = vrot.slane %v4326_v36, %v7793_v35  ;;  %v4388_v40 = vcombine.low %v4376_v28, %v4382_v37 }
 0x329   :  { %v4341_v27 = vcombine.low %v4333_v33, %v4340_v39  ;;  %v4402_v41 = vrot.slane %v4388_v40, %v7793_v35 }
 0x32b   :  { %v4348_v42 = vrot.slane %v4341_v27, %v7793_v35  ;;  %v4403_v43 = vcombine.low %v4395_v38, %v4402_v41 }
 0x32d   :  { %4354 = vst.msk [vmem:[%s7817_s3] ss:$2 sm:$0xf] %vm4352_vm0, %v4348_v42  ;;  %v4410_v44 = vrot.slane %v4403_v43, %v7793_v35 }
 0x32f   :  { %5018 = vst.msk [vmem:[%s7817_s3 + $0x1] ss:$2 sm:$0xf] %vm4352_vm0, %v4410_v44 }

</bundles_post_ra>
